<compile_context>
chip_gen: v7x
topology: tpu7x:2x2x1
jax: 0.10.0
libtpu: 0.0.40
codegen_flags: <defaults>
</compile_context>

<pallas_src>
import jax
import jax.numpy as jnp
from jax import lax
from jax.experimental import pallas as pl
from jax.experimental.pallas import tpu as pltpu


# ----------------------------- Pallas kernels ------------------------------

def _make_bilstm_layer_kernel(Tc, B, Din, H, nc):
    """Fused fwd+bwd LSTM layer. Grid = (2 directions, nc time-chunks)."""
    G = 4 * H

    def kernel(lens_ref,                    # SMEM (B,) int32   [scalar prefetch]
               x_ref,                       # VMEM (Tc, B, Din)
               wi_ref, wh_ref, b_ref,       # VMEM (1,Din,G) (1,H,G) (1,1,G)
               out_ref,                     # VMEM (Tc, B, H) -> (T, B, 2H) slab
               gx_scr, h_scr, c_scr):       # VMEM scratch
        d = pl.program_id(0)                # direction: 0 = forward, 1 = backward
        s = pl.program_id(1)                # time-chunk index (per direction)

        @pl.when(s == 0)
        def _():
            h_scr[...] = jnp.zeros_like(h_scr)
            c_scr[...] = jnp.zeros_like(c_scr)

        # Absolute start time of this chunk (backward direction walks chunks backwards).
        t_base = (s + d * (nc - 1 - 2 * s)) * Tc

        # Hoisted input projection for the whole chunk: one MXU-shaped matmul.
        x_flat = x_ref[...].reshape(Tc * B, Din)
        gx = jnp.dot(x_flat, wi_ref[0], preferred_element_type=jnp.float32) + b_ref[0]
        gx_scr[...] = gx.reshape(Tc, B, G)

        # Per-batch lengths: SMEM scalars -> (B, 1) column, built once per chunk.
        bidx = lax.broadcasted_iota(jnp.int32, (B, 1), 0)
        lens_col = jnp.zeros((B, 1), jnp.int32)
        for bb in range(B):
            lens_col = jnp.where(bidx == bb, lens_ref[bb], lens_col)

        def step(step_i, carry):
            # Local timestep inside the chunk (reversed iteration for backward dir).
            lt = (1 - d) * step_i + d * (Tc - 1 - step_i)
            t = t_base + lt
            h_prev = h_scr[...]
            c_prev = c_scr[...]
            # Recurrent part only: (B, H) @ (H, 4H).
            g = gx_scr[lt] + jnp.dot(h_prev, wh_ref[0],
                                     preferred_element_type=jnp.float32)
            # Each gate occupies its own lane-aligned 128-wide tile (H = 128 padded).
            i_g = jax.nn.sigmoid(g[:, 0 * H:1 * H])
            f_g = jax.nn.sigmoid(g[:, 1 * H:2 * H])
            g_g = jnp.tanh(g[:, 2 * H:3 * H])
            o_g = jax.nn.sigmoid(g[:, 3 * H:4 * H])
            c_new = f_g * c_prev + i_g * g_g
            h_new = o_g * jnp.tanh(c_new)
            mask = t < lens_col                      # packed-sequence validity
            h_scr[...] = jnp.where(mask, h_new, h_prev)
            c_scr[...] = jnp.where(mask, c_new, c_prev)
            out_ref[lt] = jnp.where(mask, h_new, 0.0)
            return carry

        lax.fori_loop(0, Tc, step, 0, unroll=True)

    return kernel


def bilstm_layer(x, lens, wi, wh, b, *, time_chunk):
    """x: (T, B, Din) f32 (T % Tc == 0, B % 8 == 0); wi: (2, Din, 4H); wh: (2, H, 4H);
       b: (2, 1, 4H). Returns (T, B, 2H) f32: fwd hidden in [..., :H], bwd in [..., H:]."""
    T, B, Din = x.shape
    H = wh.shape[1]
    G = 4 * H
    Tc = time_chunk
    assert T % Tc == 0 and B % 8 == 0
    nc = T // Tc

    kernel = _make_bilstm_layer_kernel(Tc, B, Din, H, nc)
    grid_spec = pltpu.PrefetchScalarGridSpec(
        num_scalar_prefetch=1,
        grid=(2, nc),
        in_specs=[
            pl.BlockSpec((Tc, B, Din), lambda d, s, lens: (s + d * (nc - 1 - 2 * s), 0, 0)),
            pl.BlockSpec((1, Din, G), lambda d, s, lens: (d, 0, 0)),
            pl.BlockSpec((1, H, G), lambda d, s, lens: (d, 0, 0)),
            pl.BlockSpec((1, 1, G), lambda d, s, lens: (d, 0, 0)),
        ],
        out_specs=pl.BlockSpec((Tc, B, H),
                               lambda d, s, lens: (s + d * (nc - 1 - 2 * s), 0, d)),
        scratch_shapes=[
            pltpu.VMEM((Tc, B, G), jnp.float32),   # hoisted input-projection chunk
            pltpu.VMEM((B, H), jnp.float32),       # h state
            pltpu.VMEM((B, H), jnp.float32),       # c state
        ],
    )
    return pl.pallas_call(
        kernel,
        out_shape=jax.ShapeDtypeStruct((T, B, 2 * H), jnp.float32),
        grid_spec=grid_spec,
        # direction axis parallel (2 TCs on v7x; harmless on v5e/v6e), time arbitrary.
        # NOTE: at production H, set vmem_limit_bytes here (v7x has 64 MiB VMEM).
        compiler_params=pltpu.CompilerParams(
            dimension_semantics=("parallel", "arbitrary")),
    )(lens, x, wi, wh, b)


def _make_fc_logsoftmax_kernel(num_classes):
    def kernel(x_ref, w_ref, b_ref, o_ref):
        logits = (jnp.dot(x_ref[...], w_ref[...], preferred_element_type=jnp.float32)
                  + b_ref[...])
        lane = lax.broadcasted_iota(jnp.int32, logits.shape, 1)
        logits = jnp.where(lane < num_classes, logits, jnp.float32(-1e30))
        m = jnp.max(logits, axis=-1, keepdims=True)
        z = logits - m
        lse = jnp.log(jnp.sum(jnp.exp(z), axis=-1, keepdims=True))
        o_ref[...] = z - lse
    return kernel


def fc_logsoftmax(x, w_t_pad, b_pad, num_classes):
    """x: (B_pad, 2*H_pad); w_t_pad: (2*H_pad, C_pad) pre-transposed; b_pad: (1, C_pad)."""
    B = x.shape[0]
    C_pad = w_t_pad.shape[1]
    return pl.pallas_call(
        _make_fc_logsoftmax_kernel(num_classes),
        out_shape=jax.ShapeDtypeStruct((B, C_pad), jnp.float32),
    )(x, w_t_pad, b_pad)


# ------------------------------ Parameters ----------------------------------

def init_params(key, vocab_size, hidden_size, num_classes, emb_dim=100):
    ks = iter(jax.random.split(key, 32))
    k = 1.0 / (hidden_size ** 0.5)
    params = {"emb": jax.random.normal(next(ks), (vocab_size, emb_dim), jnp.float32)}

    def lstm_dir(din):
        return dict(
            w_ih=jax.random.uniform(next(ks), (4 * hidden_size, din), jnp.float32, -k, k),
            w_hh=jax.random.uniform(next(ks), (4 * hidden_size, hidden_size), jnp.float32, -k, k),
            b_ih=jax.random.uniform(next(ks), (4 * hidden_size,), jnp.float32, -k, k),
            b_hh=jax.random.uniform(next(ks), (4 * hidden_size,), jnp.float32, -k, k),
        )

    params["l0f"] = lstm_dir(emb_dim)
    params["l0b"] = lstm_dir(emb_dim)
    params["l1f"] = lstm_dir(2 * hidden_size)
    params["l1b"] = lstm_dir(2 * hidden_size)
    kf = 1.0 / ((2 * hidden_size) ** 0.5)
    params["fc_w"] = jax.random.uniform(next(ks), (num_classes, 2 * hidden_size),
                                        jnp.float32, -kf, kf)
    params["fc_b"] = jax.random.uniform(next(ks), (num_classes,), jnp.float32, -kf, kf)
    return params


def pack_params(params, *, hidden_size, h_pad=128, emb_pad=128, c_pad=128):
    """One-time transform to padded / pre-transposed / direction-stacked tensors."""
    H, HP = hidden_size, h_pad
    E = params["emb"].shape[1]
    C = params["fc_w"].shape[0]

    def gate_cols(wt):
        # wt: (rows, 4H) -> (rows, 4*HP): each gate in its own lane-aligned 128 tile.
        rows = wt.shape[0]
        out = jnp.zeros((rows, 4 * HP), jnp.float32)
        for g in range(4):
            out = out.at[:, g * HP:g * HP + H].set(wt[:, g * H:(g + 1) * H])
        return out

    def pack_dir(p, din_pad, row_map):
        wt = gate_cols(p["w_ih"].T.astype(jnp.float32))           # (Din_real, 4*HP)
        wi = jnp.zeros((din_pad, 4 * HP), jnp.float32)
        for (s0, s1), d0 in row_map:
            wi = wi.at[d0:d0 + (s1 - s0), :].set(wt[s0:s1, :])
        wh = jnp.zeros((HP, 4 * HP), jnp.float32).at[:H, :].set(
            gate_cols(p["w_hh"].T.astype(jnp.float32)))
        b = gate_cols((p["b_ih"] + p["b_hh"]).reshape(1, 4 * H))  # (1, 4*HP)
        return wi, wh, b

    # layer 0 input = padded embedding (real dims 0:E).
    row0 = [((0, E), 0)]
    wi0f, wh0f, b0f = pack_dir(params["l0f"], emb_pad, row0)
    wi0b, wh0b, b0b = pack_dir(params["l0b"], emb_pad, row0)
    # layer 1 input = padded (fwd, bwd) slab: real fwd dims at rows 0:H, bwd at HP:HP+H.
    row1 = [((0, H), 0), ((H, 2 * H), HP)]
    wi1f, wh1f, b1f = pack_dir(params["l1f"], 2 * HP, row1)
    wi1b, wh1b, b1b = pack_dir(params["l1b"], 2 * HP, row1)

    fcw = jnp.zeros((2 * HP, c_pad), jnp.float32)
    fcw = fcw.at[:H, :C].set(params["fc_w"][:, :H].T)
    fcw = fcw.at[HP:HP + H, :C].set(params["fc_w"][:, H:].T)
    fcb = jnp.zeros((1, c_pad), jnp.float32).at[0, :C].set(params["fc_b"])

    emb = jnp.zeros((params["emb"].shape[0], emb_pad), jnp.float32)
    emb = emb.at[:, :E].set(params["emb"])

    return dict(
        emb=emb,
        wi0=jnp.stack([wi0f, wi0b]), wh0=jnp.stack([wh0f, wh0b]), b0=jnp.stack([b0f, b0b]),
        wi1=jnp.stack([wi1f, wi1b]), wh1=jnp.stack([wh1f, wh1b]), b1=jnp.stack([b1f, b1b]),
        fc_w=fcw, fc_b=fcb,
        h_pad=HP, num_classes=C,
    )


# ------------------------------ Model glue ---------------------------------

def lstm_forward(packed, text, text_len, *, time_chunk=8):
    B, T = text.shape
    HP = packed["h_pad"]
    C = packed["num_classes"]
    Tc = time_chunk
    B_pad = ((B + 7) // 8) * 8
    T_pad = ((T + Tc - 1) // Tc) * Tc

    text_p = jnp.zeros((B_pad, T_pad), jnp.int32).at[:B, :T].set(text.astype(jnp.int32))
    lens_p = jnp.zeros((B_pad,), jnp.int32).at[:B].set(text_len.astype(jnp.int32))

    x = packed["emb"][text_p]                  # (B_pad, T_pad, E_pad) embedding gather (glue)
    x = jnp.transpose(x, (1, 0, 2))            # time-major (T_pad, B_pad, E_pad)

    h1 = bilstm_layer(x, lens_p, packed["wi0"], packed["wh0"], packed["b0"],
                      time_chunk=Tc)           # (T_pad, B_pad, 2*HP), concat built in-kernel
    h2 = bilstm_layer(h1, lens_p, packed["wi1"], packed["wh1"], packed["b1"],
                      time_chunk=Tc)

    idx_last = jnp.maximum(lens_p - 1, 0)      # guard against zero-length sequences
    out_forward = h2[idx_last, jnp.arange(B_pad), :HP]   # fwd hidden at last valid t
    out_reverse = h2[0, :, HP:]                           # bwd hidden at t = 0
    out_reduced = jnp.concatenate([out_forward, out_reverse], axis=1)  # (B_pad, 2*HP)
    # TODO(synk): nn.Dropout(p=0.5) is identity in eval mode; training RNG mask omitted.
    logp = fc_logsoftmax(out_reduced, packed["fc_w"], packed["fc_b"], C)
    return logp[:B, :C]


# --------------------------- pure-JAX reference -----------------------------

def _ref_direction(x, lens, p, reverse):
    T, B, _ = x.shape
    H = p["w_hh"].shape[1]
    b = p["b_ih"] + p["b_hh"]
    ts = jnp.arange(T - 1, -1, -1) if reverse else jnp.arange(T)

    def step(carry, t):
        h, c = carry
        g = x[t] @ p["w_ih"].T + h @ p["w_hh"].T + b
        i = jax.nn.sigmoid(g[:, :H])
        f = jax.nn.sigmoid(g[:, H:2 * H])
        gg = jnp.tanh(g[:, 2 * H:3 * H])
        o = jax.nn.sigmoid(g[:, 3 * H:])
        c_new = f * c + i * gg
        h_new = o * jnp.tanh(c_new)
        m = (t < lens)[:, None]
        return (jnp.where(m, h_new, h), jnp.where(m, c_new, c)), jnp.where(m, h_new, 0.0)

    _, outs = lax.scan(step, (jnp.zeros((B, H)), jnp.zeros((B, H))), ts)
    return outs[::-1] if reverse else outs


def ref_forward(params, text, text_len):
    B, T = text.shape
    x = jnp.transpose(params["emb"][text], (1, 0, 2))
    h1f = _ref_direction(x, text_len, params["l0f"], False)
    h1b = _ref_direction(x, text_len, params["l0b"], True)
    x2 = jnp.concatenate([h1f, h1b], axis=-1)
    h2f = _ref_direction(x2, text_len, params["l1f"], False)
    h2b = _ref_direction(x2, text_len, params["l1b"], True)
    out_reduced = jnp.concatenate(
        [h2f[text_len - 1, jnp.arange(B), :], h2b[0]], axis=1)
    logits = out_reduced @ params["fc_w"].T + params["fc_b"]
    return jax.nn.log_softmax(logits, axis=1)


# --------------------------------- main -------------------------------------

if __name__ == "__main__":
    vocab_size, hidden_size, num_classes = 50, 32, 10
    B, T = 2, 8

    key = jax.random.PRNGKey(0)
    kp, kt = jax.random.split(key)
    params = init_params(kp, vocab_size, hidden_size, num_classes)
    packed = pack_params(params, hidden_size=hidden_size)

    text = jax.random.randint(kt, (B, T), 0, vocab_size, dtype=jnp.int32)
    text_len = jnp.array([8, 5], dtype=jnp.int32)

    out = lstm_forward(packed, text, text_len)
    out = jax.block_until_ready(out)

    ref = ref_forward(params, text, text_len)
    assert out.shape == (B, num_classes)
    assert bool(jnp.all(jnp.isfinite(out)))
    assert bool(jnp.allclose(out, ref, atol=2e-3, rtol=2e-3))

    print("KERNEL_OK")
</pallas_src>

<mosaic_0001>
module attributes {stable_mosaic.version = 11 : i64} {
  func.func @kernel(%arg0: i32, %arg1: i32, %arg2: memref<8xi32, #tpu.memory_space<smem>>, %arg3: memref<8x8x128xf32, #tpu.memory_space<vmem>>, %arg4: memref<1x128x512xf32, #tpu.memory_space<vmem>>, %arg5: memref<1x128x512xf32, #tpu.memory_space<vmem>>, %arg6: memref<1x1x512xf32, #tpu.memory_space<vmem>>, %arg7: memref<8x8x128xf32, #tpu.memory_space<vmem>>, %arg8: memref<8x8x512xf32, #tpu.memory_space<vmem>>, %arg9: memref<8x128xf32, #tpu.memory_space<vmem>>, %arg10: memref<8x128xf32, #tpu.memory_space<vmem>>) attributes {dimension_semantics = [#tpu.dimension_semantics<parallel>, #tpu.dimension_semantics<arbitrary>], iteration_bounds = array<i64: 2, 1>, scalar_prefetch = 1 : i64, scratch_operands = 3 : i64, tpu.core_type = #tpu.core_type<tc>, window_params = [{transform_indices = @transform_0, window_bounds = array<i64: 8, 8, 128>}, {transform_indices = @transform_1, window_bounds = array<i64: 1, 128, 512>}, {transform_indices = @transform_2, window_bounds = array<i64: 1, 128, 512>}, {transform_indices = @transform_3, window_bounds = array<i64: 1, 1, 512>}, {transform_indices = @transform_4, window_bounds = array<i64: 8, 8, 128>}]} {
    %c0_i32 = arith.constant 0 : i32
    %0 = arith.cmpi eq, %arg1, %c0_i32 : i32
    %1 = arith.extui %0 : i1 to i32
    %c0_i32_0 = arith.constant 0 : i32
    %2 = arith.cmpi ne, %1, %c0_i32_0 : i32
    scf.if %2 {
      %cst_202 = arith.constant 0.000000e+00 : f32
      %525 = vector.broadcast %cst_202 : f32 to vector<8x128xf32>
      %c0_203 = arith.constant 0 : index
      %c0_204 = arith.constant 0 : index
      %526 = vector.load %arg9[%c0_203, %c0_204] : memref<8x128xf32, #tpu.memory_space<vmem>>, vector<8x128xf32>
      tpu.vector_store %arg9[%c0_203, %c0_204], %525 {strides = array<i32>} : memref<8x128xf32, #tpu.memory_space<vmem>>, vector<8x128xf32>,
      %cst_205 = arith.constant 0.000000e+00 : f32
      %527 = vector.broadcast %cst_205 : f32 to vector<8x128xf32>
      %c0_206 = arith.constant 0 : index
      %c0_207 = arith.constant 0 : index
      %528 = vector.load %arg10[%c0_206, %c0_207] : memref<8x128xf32, #tpu.memory_space<vmem>>, vector<8x128xf32>
      tpu.vector_store %arg10[%c0_206, %c0_207], %527 {strides = array<i32>} : memref<8x128xf32, #tpu.memory_space<vmem>>, vector<8x128xf32>,
    } else {
    }
    %c2_i32 = arith.constant 2 : i32
    %3 = arith.muli %c2_i32, %arg1 : i32
    %c0_i32_1 = arith.constant 0 : i32
    %4 = arith.subi %c0_i32_1, %3 : i32
    %5 = arith.muli %arg0, %4 : i32
    %6 = arith.addi %arg1, %5 : i32
    %c8_i32 = arith.constant 8 : i32
    %7 = arith.muli %6, %c8_i32 : i32
    %c0 = arith.constant 0 : index
    %c0_2 = arith.constant 0 : index
    %c0_3 = arith.constant 0 : index
    %8 = vector.load %arg3[%c0, %c0_2, %c0_3] : memref<8x8x128xf32, #tpu.memory_space<vmem>>, vector<8x8x128xf32>
    %9 = vector.shape_cast %8 : vector<8x8x128xf32> to vector<64x128xf32>
    %c0_4 = arith.constant 0 : index
    %c0_5 = arith.constant 0 : index
    %c0_6 = arith.constant 0 : index
    %10 = vector.load %arg4[%c0_4, %c0_5, %c0_6] : memref<1x128x512xf32, #tpu.memory_space<vmem>>, vector<1x128x512xf32>
    %11 = vector.shape_cast %10 : vector<1x128x512xf32> to vector<128x512xf32>
    %cst = arith.constant dense<0.000000e+00> : vector<64x512xf32>
    %12 = tpu.matmul %9, %11, %cst {dimension_numbers = #tpu.dot_dimension_numbers<[1], [0], [0], [1], [0, 0, 1, 1], [], []>} : vector<64x128xf32>, vector<128x512xf32>, vector<64x512xf32> -> vector<64x512xf32>
    %c0_7 = arith.constant 0 : index
    %c0_8 = arith.constant 0 : index
    %c0_9 = arith.constant 0 : index
    %13 = vector.load %arg6[%c0_7, %c0_8, %c0_9] : memref<1x1x512xf32, #tpu.memory_space<vmem>>, vector<1x1x512xf32>
    %14 = vector.shape_cast %13 : vector<1x1x512xf32> to vector<1x512xf32>
    %15 = vector.broadcast %14 : vector<1x512xf32> to vector<64x512xf32>
    %16 = arith.addf %12, %15 : vector<64x512xf32>
    %17 = vector.shape_cast %16 : vector<64x512xf32> to vector<8x8x512xf32>
    %c0_10 = arith.constant 0 : index
    %c0_11 = arith.constant 0 : index
    %c0_12 = arith.constant 0 : index
    %18 = vector.load %arg8[%c0_10, %c0_11, %c0_12] : memref<8x8x512xf32, #tpu.memory_space<vmem>>, vector<8x8x512xf32>
    tpu.vector_store %arg8[%c0_10, %c0_11, %c0_12], %17 {strides = array<i32>} : memref<8x8x512xf32, #tpu.memory_space<vmem>>, vector<8x8x512xf32>,
    %19 = tpu.iota {dimensions = array<i32: 0>} : vector<8x1xi32>
    %c0_i32_13 = arith.constant 0 : i32
    %20 = vector.broadcast %c0_i32_13 : i32 to vector<8x1xi32>
    %c0_i32_14 = arith.constant 0 : i32
    %21 = vector.broadcast %c0_i32_14 : i32 to vector<8x1xi32>
    %22 = arith.cmpi eq, %19, %21 : vector<8x1xi32>
    %c0_15 = arith.constant 0 : index
    %23 = memref.load %arg2[%c0_15] : memref<8xi32, #tpu.memory_space<smem>>
    %24 = vector.broadcast %23 : i32 to vector<8x1xi32>
    %25 = arith.select %22, %24, %20 : vector<8x1xi1>, vector<8x1xi32>
    %c1_i32 = arith.constant 1 : i32
    %26 = vector.broadcast %c1_i32 : i32 to vector<8x1xi32>
    %27 = arith.cmpi eq, %19, %26 : vector<8x1xi32>
    %c1 = arith.constant 1 : index
    %28 = memref.load %arg2[%c1] : memref<8xi32, #tpu.memory_space<smem>>
    %29 = vector.broadcast %28 : i32 to vector<8x1xi32>
    %30 = arith.select %27, %29, %25 : vector<8x1xi1>, vector<8x1xi32>
    %c2_i32_16 = arith.constant 2 : i32
    %31 = vector.broadcast %c2_i32_16 : i32 to vector<8x1xi32>
    %32 = arith.cmpi eq, %19, %31 : vector<8x1xi32>
    %c2 = arith.constant 2 : index
    %33 = memref.load %arg2[%c2] : memref<8xi32, #tpu.memory_space<smem>>
    %34 = vector.broadcast %33 : i32 to vector<8x1xi32>
    %35 = arith.select %32, %34, %30 : vector<8x1xi1>, vector<8x1xi32>
    %c3_i32 = arith.constant 3 : i32
    %36 = vector.broadcast %c3_i32 : i32 to vector<8x1xi32>
    %37 = arith.cmpi eq, %19, %36 : vector<8x1xi32>
    %c3 = arith.constant 3 : index
    %38 = memref.load %arg2[%c3] : memref<8xi32, #tpu.memory_space<smem>>
    %39 = vector.broadcast %38 : i32 to vector<8x1xi32>
    %40 = arith.select %37, %39, %35 : vector<8x1xi1>, vector<8x1xi32>
    %c4_i32 = arith.constant 4 : i32
    %41 = vector.broadcast %c4_i32 : i32 to vector<8x1xi32>
    %42 = arith.cmpi eq, %19, %41 : vector<8x1xi32>
    %c4 = arith.constant 4 : index
    %43 = memref.load %arg2[%c4] : memref<8xi32, #tpu.memory_space<smem>>
    %44 = vector.broadcast %43 : i32 to vector<8x1xi32>
    %45 = arith.select %42, %44, %40 : vector<8x1xi1>, vector<8x1xi32>
    %c5_i32 = arith.constant 5 : i32
    %46 = vector.broadcast %c5_i32 : i32 to vector<8x1xi32>
    %47 = arith.cmpi eq, %19, %46 : vector<8x1xi32>
    %c5 = arith.constant 5 : index
    %48 = memref.load %arg2[%c5] : memref<8xi32, #tpu.memory_space<smem>>
    %49 = vector.broadcast %48 : i32 to vector<8x1xi32>
    %50 = arith.select %47, %49, %45 : vector<8x1xi1>, vector<8x1xi32>
    %c6_i32 = arith.constant 6 : i32
    %51 = vector.broadcast %c6_i32 : i32 to vector<8x1xi32>
    %52 = arith.cmpi eq, %19, %51 : vector<8x1xi32>
    %c6 = arith.constant 6 : index
    %53 = memref.load %arg2[%c6] : memref<8xi32, #tpu.memory_space<smem>>
    %54 = vector.broadcast %53 : i32 to vector<8x1xi32>
    %55 = arith.select %52, %54, %50 : vector<8x1xi1>, vector<8x1xi32>
    %c7_i32 = arith.constant 7 : i32
    %56 = vector.broadcast %c7_i32 : i32 to vector<8x1xi32>
    %57 = arith.cmpi eq, %19, %56 : vector<8x1xi32>
    %c7 = arith.constant 7 : index
    %58 = memref.load %arg2[%c7] : memref<8xi32, #tpu.memory_space<smem>>
    %59 = vector.broadcast %58 : i32 to vector<8x1xi32>
    %60 = arith.select %57, %59, %55 : vector<8x1xi1>, vector<8x1xi32>
    %c0_i32_17 = arith.constant 0 : i32
    %c1_i32_18 = arith.constant 1 : i32
    %61 = arith.subi %c1_i32_18, %arg0 : i32
    %62 = arith.muli %61, %c0_i32_17 : i32
    %c7_i32_19 = arith.constant 7 : i32
    %63 = arith.subi %c7_i32_19, %c0_i32_17 : i32
    %64 = arith.muli %arg0, %63 : i32
    %65 = arith.addi %62, %64 : i32
    %66 = arith.addi %7, %65 : i32
    %c0_20 = arith.constant 0 : index
    %c0_21 = arith.constant 0 : index
    %67 = vector.load %arg9[%c0_20, %c0_21] : memref<8x128xf32, #tpu.memory_space<vmem>>, vector<8x128xf32>
    %c0_22 = arith.constant 0 : index
    %c0_23 = arith.constant 0 : index
    %68 = vector.load %arg10[%c0_22, %c0_23] : memref<8x128xf32, #tpu.memory_space<vmem>>, vector<8x128xf32>
    %69 = arith.index_cast %65 : i32 to index
    %c0_24 = arith.constant 0 : index
    %c0_25 = arith.constant 0 : index
    %70 = vector.load %arg8[%69, %c0_24, %c0_25] : memref<8x8x512xf32, #tpu.memory_space<vmem>>, vector<1x8x512xf32>
    %71 = vector.shape_cast %70 : vector<1x8x512xf32> to vector<8x512xf32>
    %c0_26 = arith.constant 0 : index
    %c0_27 = arith.constant 0 : index
    %c0_28 = arith.constant 0 : index
    %72 = vector.load %arg5[%c0_26, %c0_27, %c0_28] : memref<1x128x512xf32, #tpu.memory_space<vmem>>, vector<1x128x512xf32>
    %73 = vector.shape_cast %72 : vector<1x128x512xf32> to vector<128x512xf32>
    %cst_29 = arith.constant dense<0.000000e+00> : vector<8x512xf32>
    %74 = tpu.matmul %67, %73, %cst_29 {dimension_numbers = #tpu.dot_dimension_numbers<[1], [0], [0], [1], [0, 0, 1, 1], [], []>} : vector<8x128xf32>, vector<128x512xf32>, vector<8x512xf32> -> vector<8x512xf32>
    %75 = arith.addf %71, %74 : vector<8x512xf32>
    %76 = vector.extract_strided_slice %75 {offsets = [0, 0], sizes = [8, 128], strides = [1, 1]} : vector<8x512xf32> to vector<8x128xf32>
    %77 = arith.negf %76 : vector<8x128xf32>
    %78 = math.exp %77 : vector<8x128xf32>
    %cst_30 = arith.constant 1.000000e+00 : f32
    %79 = vector.broadcast %cst_30 : f32 to vector<8x128xf32>
    %80 = arith.addf %79, %78 : vector<8x128xf32>
    %81 = arith.divf %79, %80 : vector<8x128xf32>
    %82 = vector.extract_strided_slice %75 {offsets = [0, 128], sizes = [8, 128], strides = [1, 1]} : vector<8x512xf32> to vector<8x128xf32>
    %83 = arith.negf %82 : vector<8x128xf32>
    %84 = math.exp %83 : vector<8x128xf32>
    %cst_31 = arith.constant 1.000000e+00 : f32
    %85 = vector.broadcast %cst_31 : f32 to vector<8x128xf32>
    %86 = arith.addf %85, %84 : vector<8x128xf32>
    %87 = arith.divf %85, %86 : vector<8x128xf32>
    %88 = vector.extract_strided_slice %75 {offsets = [0, 256], sizes = [8, 128], strides = [1, 1]} : vector<8x512xf32> to vector<8x128xf32>
    %89 = math.tanh %88 : vector<8x128xf32>
    %90 = vector.extract_strided_slice %75 {offsets = [0, 384], sizes = [8, 128], strides = [1, 1]} : vector<8x512xf32> to vector<8x128xf32>
    %91 = arith.negf %90 : vector<8x128xf32>
    %92 = math.exp %91 : vector<8x128xf32>
    %cst_32 = arith.constant 1.000000e+00 : f32
    %93 = vector.broadcast %cst_32 : f32 to vector<8x128xf32>
    %94 = arith.addf %93, %92 : vector<8x128xf32>
    %95 = arith.divf %93, %94 : vector<8x128xf32>
    %96 = arith.mulf %87, %68 : vector<8x128xf32>
    %97 = arith.mulf %81, %89 : vector<8x128xf32>
    %98 = arith.addf %96, %97 : vector<8x128xf32>
    %99 = math.tanh %98 : vector<8x128xf32>
    %100 = arith.mulf %95, %99 : vector<8x128xf32>
    %101 = vector.broadcast %66 : i32 to vector<8x1xi32>
    %102 = arith.cmpi slt, %101, %60 : vector<8x1xi32>
    %103 = vector.shape_cast %102 : vector<8x1xi1> to vector<8x1xi1>
    %104 = vector.broadcast %103 : vector<8x1xi1> to vector<8x128xi1>
    %105 = arith.select %104, %100, %67 : vector<8x128xi1>, vector<8x128xf32>
    %c0_33 = arith.constant 0 : index
    %c0_34 = arith.constant 0 : index
    %106 = vector.load %arg9[%c0_33, %c0_34] : memref<8x128xf32, #tpu.memory_space<vmem>>, vector<8x128xf32>
    tpu.vector_store %arg9[%c0_33, %c0_34], %105 {strides = array<i32>} : memref<8x128xf32, #tpu.memory_space<vmem>>, vector<8x128xf32>,
    %107 = vector.shape_cast %102 : vector<8x1xi1> to vector<8x1xi1>
    %108 = vector.broadcast %107 : vector<8x1xi1> to vector<8x128xi1>
    %109 = arith.select %108, %98, %68 : vector<8x128xi1>, vector<8x128xf32>
    %c0_35 = arith.constant 0 : index
    %c0_36 = arith.constant 0 : index
    %110 = vector.load %arg10[%c0_35, %c0_36] : memref<8x128xf32, #tpu.memory_space<vmem>>, vector<8x128xf32>
    tpu.vector_store %arg10[%c0_35, %c0_36], %109 {strides = array<i32>} : memref<8x128xf32, #tpu.memory_space<vmem>>, vector<8x128xf32>,
    %cst_37 = arith.constant 0.000000e+00 : f32
    %111 = vector.shape_cast %102 : vector<8x1xi1> to vector<8x1xi1>
    %112 = vector.broadcast %111 : vector<8x1xi1> to vector<8x128xi1>
    %113 = vector.broadcast %cst_37 : f32 to vector<8x128xf32>
    %114 = arith.select %112, %100, %113 : vector<8x128xi1>, vector<8x128xf32>
    %115 = arith.index_cast %65 : i32 to index
    %c0_38 = arith.constant 0 : index
    %c0_39 = arith.constant 0 : index
    %116 = vector.load %arg7[%115, %c0_38, %c0_39] : memref<8x8x128xf32, #tpu.memory_space<vmem>>, vector<1x8x128xf32>
    %117 = vector.shape_cast %116 : vector<1x8x128xf32> to vector<8x128xf32>
    %118 = vector.shape_cast %114 : vector<8x128xf32> to vector<1x8x128xf32>
    tpu.vector_store %arg7[%115, %c0_38, %c0_39], %118 {strides = array<i32>} : memref<8x8x128xf32, #tpu.memory_space<vmem>>, vector<1x8x128xf32>,
    %c1_i32_40 = arith.constant 1 : i32
    %c1_i32_41 = arith.constant 1 : i32
    %119 = arith.subi %c1_i32_41, %arg0 : i32
    %120 = arith.muli %119, %c1_i32_40 : i32
    %c7_i32_42 = arith.constant 7 : i32
    %121 = arith.subi %c7_i32_42, %c1_i32_40 : i32
    %122 = arith.muli %arg0, %121 : i32
    %123 = arith.addi %120, %122 : i32
    %124 = arith.addi %7, %123 : i32
    %c0_43 = arith.constant 0 : index
    %c0_44 = arith.constant 0 : index
    %125 = vector.load %arg9[%c0_43, %c0_44] : memref<8x128xf32, #tpu.memory_space<vmem>>, vector<8x128xf32>
    %c0_45 = arith.constant 0 : index
    %c0_46 = arith.constant 0 : index
    %126 = vector.load %arg10[%c0_45, %c0_46] : memref<8x128xf32, #tpu.memory_space<vmem>>, vector<8x128xf32>
    %127 = arith.index_cast %123 : i32 to index
    %c0_47 = arith.constant 0 : index
    %c0_48 = arith.constant 0 : index
    %128 = vector.load %arg8[%127, %c0_47, %c0_48] : memref<8x8x512xf32, #tpu.memory_space<vmem>>, vector<1x8x512xf32>
    %129 = vector.shape_cast %128 : vector<1x8x512xf32> to vector<8x512xf32>
    %c0_49 = arith.constant 0 : index
    %c0_50 = arith.constant 0 : index
    %c0_51 = arith.constant 0 : index
    %130 = vector.load %arg5[%c0_49, %c0_50, %c0_51] : memref<1x128x512xf32, #tpu.memory_space<vmem>>, vector<1x128x512xf32>
    %131 = vector.shape_cast %130 : vector<1x128x512xf32> to vector<128x512xf32>
    %cst_52 = arith.constant dense<0.000000e+00> : vector<8x512xf32>
    %132 = tpu.matmul %125, %131, %cst_52 {dimension_numbers = #tpu.dot_dimension_numbers<[1], [0], [0], [1], [0, 0, 1, 1], [], []>} : vector<8x128xf32>, vector<128x512xf32>, vector<8x512xf32> -> vector<8x512xf32>
    %133 = arith.addf %129, %132 : vector<8x512xf32>
    %134 = vector.extract_strided_slice %133 {offsets = [0, 0], sizes = [8, 128], strides = [1, 1]} : vector<8x512xf32> to vector<8x128xf32>
    %135 = arith.negf %134 : vector<8x128xf32>
    %136 = math.exp %135 : vector<8x128xf32>
    %cst_53 = arith.constant 1.000000e+00 : f32
    %137 = vector.broadcast %cst_53 : f32 to vector<8x128xf32>
    %138 = arith.addf %137, %136 : vector<8x128xf32>
    %139 = arith.divf %137, %138 : vector<8x128xf32>
    %140 = vector.extract_strided_slice %133 {offsets = [0, 128], sizes = [8, 128], strides = [1, 1]} : vector<8x512xf32> to vector<8x128xf32>
    %141 = arith.negf %140 : vector<8x128xf32>
    %142 = math.exp %141 : vector<8x128xf32>
    %cst_54 = arith.constant 1.000000e+00 : f32
    %143 = vector.broadcast %cst_54 : f32 to vector<8x128xf32>
    %144 = arith.addf %143, %142 : vector<8x128xf32>
    %145 = arith.divf %143, %144 : vector<8x128xf32>
    %146 = vector.extract_strided_slice %133 {offsets = [0, 256], sizes = [8, 128], strides = [1, 1]} : vector<8x512xf32> to vector<8x128xf32>
    %147 = math.tanh %146 : vector<8x128xf32>
    %148 = vector.extract_strided_slice %133 {offsets = [0, 384], sizes = [8, 128], strides = [1, 1]} : vector<8x512xf32> to vector<8x128xf32>
    %149 = arith.negf %148 : vector<8x128xf32>
    %150 = math.exp %149 : vector<8x128xf32>
    %cst_55 = arith.constant 1.000000e+00 : f32
    %151 = vector.broadcast %cst_55 : f32 to vector<8x128xf32>
    %152 = arith.addf %151, %150 : vector<8x128xf32>
    %153 = arith.divf %151, %152 : vector<8x128xf32>
    %154 = arith.mulf %145, %126 : vector<8x128xf32>
    %155 = arith.mulf %139, %147 : vector<8x128xf32>
    %156 = arith.addf %154, %155 : vector<8x128xf32>
    %157 = math.tanh %156 : vector<8x128xf32>
    %158 = arith.mulf %153, %157 : vector<8x128xf32>
    %159 = vector.broadcast %124 : i32 to vector<8x1xi32>
    %160 = arith.cmpi slt, %159, %60 : vector<8x1xi32>
    %161 = vector.shape_cast %160 : vector<8x1xi1> to vector<8x1xi1>
    %162 = vector.broadcast %161 : vector<8x1xi1> to vector<8x128xi1>
    %163 = arith.select %162, %158, %125 : vector<8x128xi1>, vector<8x128xf32>
    %c0_56 = arith.constant 0 : index
    %c0_57 = arith.constant 0 : index
    %164 = vector.load %arg9[%c0_56, %c0_57] : memref<8x128xf32, #tpu.memory_space<vmem>>, vector<8x128xf32>
    tpu.vector_store %arg9[%c0_56, %c0_57], %163 {strides = array<i32>} : memref<8x128xf32, #tpu.memory_space<vmem>>, vector<8x128xf32>,
    %165 = vector.shape_cast %160 : vector<8x1xi1> to vector<8x1xi1>
    %166 = vector.broadcast %165 : vector<8x1xi1> to vector<8x128xi1>
    %167 = arith.select %166, %156, %126 : vector<8x128xi1>, vector<8x128xf32>
    %c0_58 = arith.constant 0 : index
    %c0_59 = arith.constant 0 : index
    %168 = vector.load %arg10[%c0_58, %c0_59] : memref<8x128xf32, #tpu.memory_space<vmem>>, vector<8x128xf32>
    tpu.vector_store %arg10[%c0_58, %c0_59], %167 {strides = array<i32>} : memref<8x128xf32, #tpu.memory_space<vmem>>, vector<8x128xf32>,
    %cst_60 = arith.constant 0.000000e+00 : f32
    %169 = vector.shape_cast %160 : vector<8x1xi1> to vector<8x1xi1>
    %170 = vector.broadcast %169 : vector<8x1xi1> to vector<8x128xi1>
    %171 = vector.broadcast %cst_60 : f32 to vector<8x128xf32>
    %172 = arith.select %170, %158, %171 : vector<8x128xi1>, vector<8x128xf32>
    %173 = arith.index_cast %123 : i32 to index
    %c0_61 = arith.constant 0 : index
    %c0_62 = arith.constant 0 : index
    %174 = vector.load %arg7[%173, %c0_61, %c0_62] : memref<8x8x128xf32, #tpu.memory_space<vmem>>, vector<1x8x128xf32>
    %175 = vector.shape_cast %174 : vector<1x8x128xf32> to vector<8x128xf32>
    %176 = vector.shape_cast %172 : vector<8x128xf32> to vector<1x8x128xf32>
    tpu.vector_store %arg7[%173, %c0_61, %c0_62], %176 {strides = array<i32>} : memref<8x8x128xf32, #tpu.memory_space<vmem>>, vector<1x8x128xf32>,
    %c2_i32_63 = arith.constant 2 : i32
    %c1_i32_64 = arith.constant 1 : i32
    %177 = arith.subi %c1_i32_64, %arg0 : i32
    %178 = arith.muli %177, %c2_i32_63 : i32
    %c7_i32_65 = arith.constant 7 : i32
    %179 = arith.subi %c7_i32_65, %c2_i32_63 : i32
    %180 = arith.muli %arg0, %179 : i32
    %181 = arith.addi %178, %180 : i32
    %182 = arith.addi %7, %181 : i32
    %c0_66 = arith.constant 0 : index
    %c0_67 = arith.constant 0 : index
    %183 = vector.load %arg9[%c0_66, %c0_67] : memref<8x128xf32, #tpu.memory_space<vmem>>, vector<8x128xf32>
    %c0_68 = arith.constant 0 : index
    %c0_69 = arith.constant 0 : index
    %184 = vector.load %arg10[%c0_68, %c0_69] : memref<8x128xf32, #tpu.memory_space<vmem>>, vector<8x128xf32>
    %185 = arith.index_cast %181 : i32 to index
    %c0_70 = arith.constant 0 : index
    %c0_71 = arith.constant 0 : index
    %186 = vector.load %arg8[%185, %c0_70, %c0_71] : memref<8x8x512xf32, #tpu.memory_space<vmem>>, vector<1x8x512xf32>
    %187 = vector.shape_cast %186 : vector<1x8x512xf32> to vector<8x512xf32>
    %c0_72 = arith.constant 0 : index
    %c0_73 = arith.constant 0 : index
    %c0_74 = arith.constant 0 : index
    %188 = vector.load %arg5[%c0_72, %c0_73, %c0_74] : memref<1x128x512xf32, #tpu.memory_space<vmem>>, vector<1x128x512xf32>
    %189 = vector.shape_cast %188 : vector<1x128x512xf32> to vector<128x512xf32>
    %cst_75 = arith.constant dense<0.000000e+00> : vector<8x512xf32>
    %190 = tpu.matmul %183, %189, %cst_75 {dimension_numbers = #tpu.dot_dimension_numbers<[1], [0], [0], [1], [0, 0, 1, 1], [], []>} : vector<8x128xf32>, vector<128x512xf32>, vector<8x512xf32> -> vector<8x512xf32>
    %191 = arith.addf %187, %190 : vector<8x512xf32>
    %192 = vector.extract_strided_slice %191 {offsets = [0, 0], sizes = [8, 128], strides = [1, 1]} : vector<8x512xf32> to vector<8x128xf32>
    %193 = arith.negf %192 : vector<8x128xf32>
    %194 = math.exp %193 : vector<8x128xf32>
    %cst_76 = arith.constant 1.000000e+00 : f32
    %195 = vector.broadcast %cst_76 : f32 to vector<8x128xf32>
    %196 = arith.addf %195, %194 : vector<8x128xf32>
    %197 = arith.divf %195, %196 : vector<8x128xf32>
    %198 = vector.extract_strided_slice %191 {offsets = [0, 128], sizes = [8, 128], strides = [1, 1]} : vector<8x512xf32> to vector<8x128xf32>
    %199 = arith.negf %198 : vector<8x128xf32>
    %200 = math.exp %199 : vector<8x128xf32>
    %cst_77 = arith.constant 1.000000e+00 : f32
    %201 = vector.broadcast %cst_77 : f32 to vector<8x128xf32>
    %202 = arith.addf %201, %200 : vector<8x128xf32>
    %203 = arith.divf %201, %202 : vector<8x128xf32>
    %204 = vector.extract_strided_slice %191 {offsets = [0, 256], sizes = [8, 128], strides = [1, 1]} : vector<8x512xf32> to vector<8x128xf32>
    %205 = math.tanh %204 : vector<8x128xf32>
    %206 = vector.extract_strided_slice %191 {offsets = [0, 384], sizes = [8, 128], strides = [1, 1]} : vector<8x512xf32> to vector<8x128xf32>
    %207 = arith.negf %206 : vector<8x128xf32>
    %208 = math.exp %207 : vector<8x128xf32>
    %cst_78 = arith.constant 1.000000e+00 : f32
    %209 = vector.broadcast %cst_78 : f32 to vector<8x128xf32>
    %210 = arith.addf %209, %208 : vector<8x128xf32>
    %211 = arith.divf %209, %210 : vector<8x128xf32>
    %212 = arith.mulf %203, %184 : vector<8x128xf32>
    %213 = arith.mulf %197, %205 : vector<8x128xf32>
    %214 = arith.addf %212, %213 : vector<8x128xf32>
    %215 = math.tanh %214 : vector<8x128xf32>
    %216 = arith.mulf %211, %215 : vector<8x128xf32>
    %217 = vector.broadcast %182 : i32 to vector<8x1xi32>
    %218 = arith.cmpi slt, %217, %60 : vector<8x1xi32>
    %219 = vector.shape_cast %218 : vector<8x1xi1> to vector<8x1xi1>
    %220 = vector.broadcast %219 : vector<8x1xi1> to vector<8x128xi1>
    %221 = arith.select %220, %216, %183 : vector<8x128xi1>, vector<8x128xf32>
    %c0_79 = arith.constant 0 : index
    %c0_80 = arith.constant 0 : index
    %222 = vector.load %arg9[%c0_79, %c0_80] : memref<8x128xf32, #tpu.memory_space<vmem>>, vector<8x128xf32>
    tpu.vector_store %arg9[%c0_79, %c0_80], %221 {strides = array<i32>} : memref<8x128xf32, #tpu.memory_space<vmem>>, vector<8x128xf32>,
    %223 = vector.shape_cast %218 : vector<8x1xi1> to vector<8x1xi1>
    %224 = vector.broadcast %223 : vector<8x1xi1> to vector<8x128xi1>
    %225 = arith.select %224, %214, %184 : vector<8x128xi1>, vector<8x128xf32>
    %c0_81 = arith.constant 0 : index
    %c0_82 = arith.constant 0 : index
    %226 = vector.load %arg10[%c0_81, %c0_82] : memref<8x128xf32, #tpu.memory_space<vmem>>, vector<8x128xf32>
    tpu.vector_store %arg10[%c0_81, %c0_82], %225 {strides = array<i32>} : memref<8x128xf32, #tpu.memory_space<vmem>>, vector<8x128xf32>,
    %cst_83 = arith.constant 0.000000e+00 : f32
    %227 = vector.shape_cast %218 : vector<8x1xi1> to vector<8x1xi1>
    %228 = vector.broadcast %227 : vector<8x1xi1> to vector<8x128xi1>
    %229 = vector.broadcast %cst_83 : f32 to vector<8x128xf32>
    %230 = arith.select %228, %216, %229 : vector<8x128xi1>, vector<8x128xf32>
    %231 = arith.index_cast %181 : i32 to index
    %c0_84 = arith.constant 0 : index
    %c0_85 = arith.constant 0 : index
    %232 = vector.load %arg7[%231, %c0_84, %c0_85] : memref<8x8x128xf32, #tpu.memory_space<vmem>>, vector<1x8x128xf32>
    %233 = vector.shape_cast %232 : vector<1x8x128xf32> to vector<8x128xf32>
    %234 = vector.shape_cast %230 : vector<8x128xf32> to vector<1x8x128xf32>
    tpu.vector_store %arg7[%231, %c0_84, %c0_85], %234 {strides = array<i32>} : memref<8x8x128xf32, #tpu.memory_space<vmem>>, vector<1x8x128xf32>,
    %c3_i32_86 = arith.constant 3 : i32
    %c1_i32_87 = arith.constant 1 : i32
    %235 = arith.subi %c1_i32_87, %arg0 : i32
    %236 = arith.muli %235, %c3_i32_86 : i32
    %c7_i32_88 = arith.constant 7 : i32
    %237 = arith.subi %c7_i32_88, %c3_i32_86 : i32
    %238 = arith.muli %arg0, %237 : i32
    %239 = arith.addi %236, %238 : i32
    %240 = arith.addi %7, %239 : i32
    %c0_89 = arith.constant 0 : index
    %c0_90 = arith.constant 0 : index
    %241 = vector.load %arg9[%c0_89, %c0_90] : memref<8x128xf32, #tpu.memory_space<vmem>>, vector<8x128xf32>
    %c0_91 = arith.constant 0 : index
    %c0_92 = arith.constant 0 : index
    %242 = vector.load %arg10[%c0_91, %c0_92] : memref<8x128xf32, #tpu.memory_space<vmem>>, vector<8x128xf32>
    %243 = arith.index_cast %239 : i32 to index
    %c0_93 = arith.constant 0 : index
    %c0_94 = arith.constant 0 : index
    %244 = vector.load %arg8[%243, %c0_93, %c0_94] : memref<8x8x512xf32, #tpu.memory_space<vmem>>, vector<1x8x512xf32>
    %245 = vector.shape_cast %244 : vector<1x8x512xf32> to vector<8x512xf32>
    %c0_95 = arith.constant 0 : index
    %c0_96 = arith.constant 0 : index
    %c0_97 = arith.constant 0 : index
    %246 = vector.load %arg5[%c0_95, %c0_96, %c0_97] : memref<1x128x512xf32, #tpu.memory_space<vmem>>, vector<1x128x512xf32>
    %247 = vector.shape_cast %246 : vector<1x128x512xf32> to vector<128x512xf32>
    %cst_98 = arith.constant dense<0.000000e+00> : vector<8x512xf32>
    %248 = tpu.matmul %241, %247, %cst_98 {dimension_numbers = #tpu.dot_dimension_numbers<[1], [0], [0], [1], [0, 0, 1, 1], [], []>} : vector<8x128xf32>, vector<128x512xf32>, vector<8x512xf32> -> vector<8x512xf32>
    %249 = arith.addf %245, %248 : vector<8x512xf32>
    %250 = vector.extract_strided_slice %249 {offsets = [0, 0], sizes = [8, 128], strides = [1, 1]} : vector<8x512xf32> to vector<8x128xf32>
    %251 = arith.negf %250 : vector<8x128xf32>
    %252 = math.exp %251 : vector<8x128xf32>
    %cst_99 = arith.constant 1.000000e+00 : f32
    %253 = vector.broadcast %cst_99 : f32 to vector<8x128xf32>
    %254 = arith.addf %253, %252 : vector<8x128xf32>
    %255 = arith.divf %253, %254 : vector<8x128xf32>
    %256 = vector.extract_strided_slice %249 {offsets = [0, 128], sizes = [8, 128], strides = [1, 1]} : vector<8x512xf32> to vector<8x128xf32>
    %257 = arith.negf %256 : vector<8x128xf32>
    %258 = math.exp %257 : vector<8x128xf32>
    %cst_100 = arith.constant 1.000000e+00 : f32
    %259 = vector.broadcast %cst_100 : f32 to vector<8x128xf32>
    %260 = arith.addf %259, %258 : vector<8x128xf32>
    %261 = arith.divf %259, %260 : vector<8x128xf32>
    %262 = vector.extract_strided_slice %249 {offsets = [0, 256], sizes = [8, 128], strides = [1, 1]} : vector<8x512xf32> to vector<8x128xf32>
    %263 = math.tanh %262 : vector<8x128xf32>
    %264 = vector.extract_strided_slice %249 {offsets = [0, 384], sizes = [8, 128], strides = [1, 1]} : vector<8x512xf32> to vector<8x128xf32>
    %265 = arith.negf %264 : vector<8x128xf32>
    %266 = math.exp %265 : vector<8x128xf32>
    %cst_101 = arith.constant 1.000000e+00 : f32
    %267 = vector.broadcast %cst_101 : f32 to vector<8x128xf32>
    %268 = arith.addf %267, %266 : vector<8x128xf32>
    %269 = arith.divf %267, %268 : vector<8x128xf32>
    %270 = arith.mulf %261, %242 : vector<8x128xf32>
    %271 = arith.mulf %255, %263 : vector<8x128xf32>
    %272 = arith.addf %270, %271 : vector<8x128xf32>
    %273 = math.tanh %272 : vector<8x128xf32>
    %274 = arith.mulf %269, %273 : vector<8x128xf32>
    %275 = vector.broadcast %240 : i32 to vector<8x1xi32>
    %276 = arith.cmpi slt, %275, %60 : vector<8x1xi32>
    %277 = vector.shape_cast %276 : vector<8x1xi1> to vector<8x1xi1>
    %278 = vector.broadcast %277 : vector<8x1xi1> to vector<8x128xi1>
    %279 = arith.select %278, %274, %241 : vector<8x128xi1>, vector<8x128xf32>
    %c0_102 = arith.constant 0 : index
    %c0_103 = arith.constant 0 : index
    %280 = vector.load %arg9[%c0_102, %c0_103] : memref<8x128xf32, #tpu.memory_space<vmem>>, vector<8x128xf32>
    tpu.vector_store %arg9[%c0_102, %c0_103], %279 {strides = array<i32>} : memref<8x128xf32, #tpu.memory_space<vmem>>, vector<8x128xf32>,
    %281 = vector.shape_cast %276 : vector<8x1xi1> to vector<8x1xi1>
    %282 = vector.broadcast %281 : vector<8x1xi1> to vector<8x128xi1>
    %283 = arith.select %282, %272, %242 : vector<8x128xi1>, vector<8x128xf32>
    %c0_104 = arith.constant 0 : index
    %c0_105 = arith.constant 0 : index
    %284 = vector.load %arg10[%c0_104, %c0_105] : memref<8x128xf32, #tpu.memory_space<vmem>>, vector<8x128xf32>
    tpu.vector_store %arg10[%c0_104, %c0_105], %283 {strides = array<i32>} : memref<8x128xf32, #tpu.memory_space<vmem>>, vector<8x128xf32>,
    %cst_106 = arith.constant 0.000000e+00 : f32
    %285 = vector.shape_cast %276 : vector<8x1xi1> to vector<8x1xi1>
    %286 = vector.broadcast %285 : vector<8x1xi1> to vector<8x128xi1>
    %287 = vector.broadcast %cst_106 : f32 to vector<8x128xf32>
    %288 = arith.select %286, %274, %287 : vector<8x128xi1>, vector<8x128xf32>
    %289 = arith.index_cast %239 : i32 to index
    %c0_107 = arith.constant 0 : index
    %c0_108 = arith.constant 0 : index
    %290 = vector.load %arg7[%289, %c0_107, %c0_108] : memref<8x8x128xf32, #tpu.memory_space<vmem>>, vector<1x8x128xf32>
    %291 = vector.shape_cast %290 : vector<1x8x128xf32> to vector<8x128xf32>
    %292 = vector.shape_cast %288 : vector<8x128xf32> to vector<1x8x128xf32>
    tpu.vector_store %arg7[%289, %c0_107, %c0_108], %292 {strides = array<i32>} : memref<8x8x128xf32, #tpu.memory_space<vmem>>, vector<1x8x128xf32>,
    %c4_i32_109 = arith.constant 4 : i32
    %c1_i32_110 = arith.constant 1 : i32
    %293 = arith.subi %c1_i32_110, %arg0 : i32
    %294 = arith.muli %293, %c4_i32_109 : i32
    %c7_i32_111 = arith.constant 7 : i32
    %295 = arith.subi %c7_i32_111, %c4_i32_109 : i32
    %296 = arith.muli %arg0, %295 : i32
    %297 = arith.addi %294, %296 : i32
    %298 = arith.addi %7, %297 : i32
    %c0_112 = arith.constant 0 : index
    %c0_113 = arith.constant 0 : index
    %299 = vector.load %arg9[%c0_112, %c0_113] : memref<8x128xf32, #tpu.memory_space<vmem>>, vector<8x128xf32>
    %c0_114 = arith.constant 0 : index
    %c0_115 = arith.constant 0 : index
    %300 = vector.load %arg10[%c0_114, %c0_115] : memref<8x128xf32, #tpu.memory_space<vmem>>, vector<8x128xf32>
    %301 = arith.index_cast %297 : i32 to index
    %c0_116 = arith.constant 0 : index
    %c0_117 = arith.constant 0 : index
    %302 = vector.load %arg8[%301, %c0_116, %c0_117] : memref<8x8x512xf32, #tpu.memory_space<vmem>>, vector<1x8x512xf32>
    %303 = vector.shape_cast %302 : vector<1x8x512xf32> to vector<8x512xf32>
    %c0_118 = arith.constant 0 : index
    %c0_119 = arith.constant 0 : index
    %c0_120 = arith.constant 0 : index
    %304 = vector.load %arg5[%c0_118, %c0_119, %c0_120] : memref<1x128x512xf32, #tpu.memory_space<vmem>>, vector<1x128x512xf32>
    %305 = vector.shape_cast %304 : vector<1x128x512xf32> to vector<128x512xf32>
    %cst_121 = arith.constant dense<0.000000e+00> : vector<8x512xf32>
    %306 = tpu.matmul %299, %305, %cst_121 {dimension_numbers = #tpu.dot_dimension_numbers<[1], [0], [0], [1], [0, 0, 1, 1], [], []>} : vector<8x128xf32>, vector<128x512xf32>, vector<8x512xf32> -> vector<8x512xf32>
    %307 = arith.addf %303, %306 : vector<8x512xf32>
    %308 = vector.extract_strided_slice %307 {offsets = [0, 0], sizes = [8, 128], strides = [1, 1]} : vector<8x512xf32> to vector<8x128xf32>
    %309 = arith.negf %308 : vector<8x128xf32>
    %310 = math.exp %309 : vector<8x128xf32>
    %cst_122 = arith.constant 1.000000e+00 : f32
    %311 = vector.broadcast %cst_122 : f32 to vector<8x128xf32>
    %312 = arith.addf %311, %310 : vector<8x128xf32>
    %313 = arith.divf %311, %312 : vector<8x128xf32>
    %314 = vector.extract_strided_slice %307 {offsets = [0, 128], sizes = [8, 128], strides = [1, 1]} : vector<8x512xf32> to vector<8x128xf32>
    %315 = arith.negf %314 : vector<8x128xf32>
    %316 = math.exp %315 : vector<8x128xf32>
    %cst_123 = arith.constant 1.000000e+00 : f32
    %317 = vector.broadcast %cst_123 : f32 to vector<8x128xf32>
    %318 = arith.addf %317, %316 : vector<8x128xf32>
    %319 = arith.divf %317, %318 : vector<8x128xf32>
    %320 = vector.extract_strided_slice %307 {offsets = [0, 256], sizes = [8, 128], strides = [1, 1]} : vector<8x512xf32> to vector<8x128xf32>
    %321 = math.tanh %320 : vector<8x128xf32>
    %322 = vector.extract_strided_slice %307 {offsets = [0, 384], sizes = [8, 128], strides = [1, 1]} : vector<8x512xf32> to vector<8x128xf32>
    %323 = arith.negf %322 : vector<8x128xf32>
    %324 = math.exp %323 : vector<8x128xf32>
    %cst_124 = arith.constant 1.000000e+00 : f32
    %325 = vector.broadcast %cst_124 : f32 to vector<8x128xf32>
    %326 = arith.addf %325, %324 : vector<8x128xf32>
    %327 = arith.divf %325, %326 : vector<8x128xf32>
    %328 = arith.mulf %319, %300 : vector<8x128xf32>
    %329 = arith.mulf %313, %321 : vector<8x128xf32>
    %330 = arith.addf %328, %329 : vector<8x128xf32>
    %331 = math.tanh %330 : vector<8x128xf32>
    %332 = arith.mulf %327, %331 : vector<8x128xf32>
    %333 = vector.broadcast %298 : i32 to vector<8x1xi32>
    %334 = arith.cmpi slt, %333, %60 : vector<8x1xi32>
    %335 = vector.shape_cast %334 : vector<8x1xi1> to vector<8x1xi1>
    %336 = vector.broadcast %335 : vector<8x1xi1> to vector<8x128xi1>
    %337 = arith.select %336, %332, %299 : vector<8x128xi1>, vector<8x128xf32>
    %c0_125 = arith.constant 0 : index
    %c0_126 = arith.constant 0 : index
    %338 = vector.load %arg9[%c0_125, %c0_126] : memref<8x128xf32, #tpu.memory_space<vmem>>, vector<8x128xf32>
    tpu.vector_store %arg9[%c0_125, %c0_126], %337 {strides = array<i32>} : memref<8x128xf32, #tpu.memory_space<vmem>>, vector<8x128xf32>,
    %339 = vector.shape_cast %334 : vector<8x1xi1> to vector<8x1xi1>
    %340 = vector.broadcast %339 : vector<8x1xi1> to vector<8x128xi1>
    %341 = arith.select %340, %330, %300 : vector<8x128xi1>, vector<8x128xf32>
    %c0_127 = arith.constant 0 : index
    %c0_128 = arith.constant 0 : index
    %342 = vector.load %arg10[%c0_127, %c0_128] : memref<8x128xf32, #tpu.memory_space<vmem>>, vector<8x128xf32>
    tpu.vector_store %arg10[%c0_127, %c0_128], %341 {strides = array<i32>} : memref<8x128xf32, #tpu.memory_space<vmem>>, vector<8x128xf32>,
    %cst_129 = arith.constant 0.000000e+00 : f32
    %343 = vector.shape_cast %334 : vector<8x1xi1> to vector<8x1xi1>
    %344 = vector.broadcast %343 : vector<8x1xi1> to vector<8x128xi1>
    %345 = vector.broadcast %cst_129 : f32 to vector<8x128xf32>
    %346 = arith.select %344, %332, %345 : vector<8x128xi1>, vector<8x128xf32>
    %347 = arith.index_cast %297 : i32 to index
    %c0_130 = arith.constant 0 : index
    %c0_131 = arith.constant 0 : index
    %348 = vector.load %arg7[%347, %c0_130, %c0_131] : memref<8x8x128xf32, #tpu.memory_space<vmem>>, vector<1x8x128xf32>
    %349 = vector.shape_cast %348 : vector<1x8x128xf32> to vector<8x128xf32>
    %350 = vector.shape_cast %346 : vector<8x128xf32> to vector<1x8x128xf32>
    tpu.vector_store %arg7[%347, %c0_130, %c0_131], %350 {strides = array<i32>} : memref<8x8x128xf32, #tpu.memory_space<vmem>>, vector<1x8x128xf32>,
    %c5_i32_132 = arith.constant 5 : i32
    %c1_i32_133 = arith.constant 1 : i32
    %351 = arith.subi %c1_i32_133, %arg0 : i32
    %352 = arith.muli %351, %c5_i32_132 : i32
    %c7_i32_134 = arith.constant 7 : i32
    %353 = arith.subi %c7_i32_134, %c5_i32_132 : i32
    %354 = arith.muli %arg0, %353 : i32
    %355 = arith.addi %352, %354 : i32
    %356 = arith.addi %7, %355 : i32
    %c0_135 = arith.constant 0 : index
    %c0_136 = arith.constant 0 : index
    %357 = vector.load %arg9[%c0_135, %c0_136] : memref<8x128xf32, #tpu.memory_space<vmem>>, vector<8x128xf32>
    %c0_137 = arith.constant 0 : index
    %c0_138 = arith.constant 0 : index
    %358 = vector.load %arg10[%c0_137, %c0_138] : memref<8x128xf32, #tpu.memory_space<vmem>>, vector<8x128xf32>
    %359 = arith.index_cast %355 : i32 to index
    %c0_139 = arith.constant 0 : index
    %c0_140 = arith.constant 0 : index
    %360 = vector.load %arg8[%359, %c0_139, %c0_140] : memref<8x8x512xf32, #tpu.memory_space<vmem>>, vector<1x8x512xf32>
    %361 = vector.shape_cast %360 : vector<1x8x512xf32> to vector<8x512xf32>
    %c0_141 = arith.constant 0 : index
    %c0_142 = arith.constant 0 : index
    %c0_143 = arith.constant 0 : index
    %362 = vector.load %arg5[%c0_141, %c0_142, %c0_143] : memref<1x128x512xf32, #tpu.memory_space<vmem>>, vector<1x128x512xf32>
    %363 = vector.shape_cast %362 : vector<1x128x512xf32> to vector<128x512xf32>
    %cst_144 = arith.constant dense<0.000000e+00> : vector<8x512xf32>
    %364 = tpu.matmul %357, %363, %cst_144 {dimension_numbers = #tpu.dot_dimension_numbers<[1], [0], [0], [1], [0, 0, 1, 1], [], []>} : vector<8x128xf32>, vector<128x512xf32>, vector<8x512xf32> -> vector<8x512xf32>
    %365 = arith.addf %361, %364 : vector<8x512xf32>
    %366 = vector.extract_strided_slice %365 {offsets = [0, 0], sizes = [8, 128], strides = [1, 1]} : vector<8x512xf32> to vector<8x128xf32>
    %367 = arith.negf %366 : vector<8x128xf32>
    %368 = math.exp %367 : vector<8x128xf32>
    %cst_145 = arith.constant 1.000000e+00 : f32
    %369 = vector.broadcast %cst_145 : f32 to vector<8x128xf32>
    %370 = arith.addf %369, %368 : vector<8x128xf32>
    %371 = arith.divf %369, %370 : vector<8x128xf32>
    %372 = vector.extract_strided_slice %365 {offsets = [0, 128], sizes = [8, 128], strides = [1, 1]} : vector<8x512xf32> to vector<8x128xf32>
    %373 = arith.negf %372 : vector<8x128xf32>
    %374 = math.exp %373 : vector<8x128xf32>
    %cst_146 = arith.constant 1.000000e+00 : f32
    %375 = vector.broadcast %cst_146 : f32 to vector<8x128xf32>
    %376 = arith.addf %375, %374 : vector<8x128xf32>
    %377 = arith.divf %375, %376 : vector<8x128xf32>
    %378 = vector.extract_strided_slice %365 {offsets = [0, 256], sizes = [8, 128], strides = [1, 1]} : vector<8x512xf32> to vector<8x128xf32>
    %379 = math.tanh %378 : vector<8x128xf32>
    %380 = vector.extract_strided_slice %365 {offsets = [0, 384], sizes = [8, 128], strides = [1, 1]} : vector<8x512xf32> to vector<8x128xf32>
    %381 = arith.negf %380 : vector<8x128xf32>
    %382 = math.exp %381 : vector<8x128xf32>
    %cst_147 = arith.constant 1.000000e+00 : f32
    %383 = vector.broadcast %cst_147 : f32 to vector<8x128xf32>
    %384 = arith.addf %383, %382 : vector<8x128xf32>
    %385 = arith.divf %383, %384 : vector<8x128xf32>
    %386 = arith.mulf %377, %358 : vector<8x128xf32>
    %387 = arith.mulf %371, %379 : vector<8x128xf32>
    %388 = arith.addf %386, %387 : vector<8x128xf32>
    %389 = math.tanh %388 : vector<8x128xf32>
    %390 = arith.mulf %385, %389 : vector<8x128xf32>
    %391 = vector.broadcast %356 : i32 to vector<8x1xi32>
    %392 = arith.cmpi slt, %391, %60 : vector<8x1xi32>
    %393 = vector.shape_cast %392 : vector<8x1xi1> to vector<8x1xi1>
    %394 = vector.broadcast %393 : vector<8x1xi1> to vector<8x128xi1>
    %395 = arith.select %394, %390, %357 : vector<8x128xi1>, vector<8x128xf32>
    %c0_148 = arith.constant 0 : index
    %c0_149 = arith.constant 0 : index
    %396 = vector.load %arg9[%c0_148, %c0_149] : memref<8x128xf32, #tpu.memory_space<vmem>>, vector<8x128xf32>
    tpu.vector_store %arg9[%c0_148, %c0_149], %395 {strides = array<i32>} : memref<8x128xf32, #tpu.memory_space<vmem>>, vector<8x128xf32>,
    %397 = vector.shape_cast %392 : vector<8x1xi1> to vector<8x1xi1>
    %398 = vector.broadcast %397 : vector<8x1xi1> to vector<8x128xi1>
    %399 = arith.select %398, %388, %358 : vector<8x128xi1>, vector<8x128xf32>
    %c0_150 = arith.constant 0 : index
    %c0_151 = arith.constant 0 : index
    %400 = vector.load %arg10[%c0_150, %c0_151] : memref<8x128xf32, #tpu.memory_space<vmem>>, vector<8x128xf32>
    tpu.vector_store %arg10[%c0_150, %c0_151], %399 {strides = array<i32>} : memref<8x128xf32, #tpu.memory_space<vmem>>, vector<8x128xf32>,
    %cst_152 = arith.constant 0.000000e+00 : f32
    %401 = vector.shape_cast %392 : vector<8x1xi1> to vector<8x1xi1>
    %402 = vector.broadcast %401 : vector<8x1xi1> to vector<8x128xi1>
    %403 = vector.broadcast %cst_152 : f32 to vector<8x128xf32>
    %404 = arith.select %402, %390, %403 : vector<8x128xi1>, vector<8x128xf32>
    %405 = arith.index_cast %355 : i32 to index
    %c0_153 = arith.constant 0 : index
    %c0_154 = arith.constant 0 : index
    %406 = vector.load %arg7[%405, %c0_153, %c0_154] : memref<8x8x128xf32, #tpu.memory_space<vmem>>, vector<1x8x128xf32>
    %407 = vector.shape_cast %406 : vector<1x8x128xf32> to vector<8x128xf32>
    %408 = vector.shape_cast %404 : vector<8x128xf32> to vector<1x8x128xf32>
    tpu.vector_store %arg7[%405, %c0_153, %c0_154], %408 {strides = array<i32>} : memref<8x8x128xf32, #tpu.memory_space<vmem>>, vector<1x8x128xf32>,
    %c6_i32_155 = arith.constant 6 : i32
    %c1_i32_156 = arith.constant 1 : i32
    %409 = arith.subi %c1_i32_156, %arg0 : i32
    %410 = arith.muli %409, %c6_i32_155 : i32
    %c7_i32_157 = arith.constant 7 : i32
    %411 = arith.subi %c7_i32_157, %c6_i32_155 : i32
    %412 = arith.muli %arg0, %411 : i32
    %413 = arith.addi %410, %412 : i32
    %414 = arith.addi %7, %413 : i32
    %c0_158 = arith.constant 0 : index
    %c0_159 = arith.constant 0 : index
    %415 = vector.load %arg9[%c0_158, %c0_159] : memref<8x128xf32, #tpu.memory_space<vmem>>, vector<8x128xf32>
    %c0_160 = arith.constant 0 : index
    %c0_161 = arith.constant 0 : index
    %416 = vector.load %arg10[%c0_160, %c0_161] : memref<8x128xf32, #tpu.memory_space<vmem>>, vector<8x128xf32>
    %417 = arith.index_cast %413 : i32 to index
    %c0_162 = arith.constant 0 : index
    %c0_163 = arith.constant 0 : index
    %418 = vector.load %arg8[%417, %c0_162, %c0_163] : memref<8x8x512xf32, #tpu.memory_space<vmem>>, vector<1x8x512xf32>
    %419 = vector.shape_cast %418 : vector<1x8x512xf32> to vector<8x512xf32>
    %c0_164 = arith.constant 0 : index
    %c0_165 = arith.constant 0 : index
    %c0_166 = arith.constant 0 : index
    %420 = vector.load %arg5[%c0_164, %c0_165, %c0_166] : memref<1x128x512xf32, #tpu.memory_space<vmem>>, vector<1x128x512xf32>
    %421 = vector.shape_cast %420 : vector<1x128x512xf32> to vector<128x512xf32>
    %cst_167 = arith.constant dense<0.000000e+00> : vector<8x512xf32>
    %422 = tpu.matmul %415, %421, %cst_167 {dimension_numbers = #tpu.dot_dimension_numbers<[1], [0], [0], [1], [0, 0, 1, 1], [], []>} : vector<8x128xf32>, vector<128x512xf32>, vector<8x512xf32> -> vector<8x512xf32>
    %423 = arith.addf %419, %422 : vector<8x512xf32>
    %424 = vector.extract_strided_slice %423 {offsets = [0, 0], sizes = [8, 128], strides = [1, 1]} : vector<8x512xf32> to vector<8x128xf32>
    %425 = arith.negf %424 : vector<8x128xf32>
    %426 = math.exp %425 : vector<8x128xf32>
    %cst_168 = arith.constant 1.000000e+00 : f32
    %427 = vector.broadcast %cst_168 : f32 to vector<8x128xf32>
    %428 = arith.addf %427, %426 : vector<8x128xf32>
    %429 = arith.divf %427, %428 : vector<8x128xf32>
    %430 = vector.extract_strided_slice %423 {offsets = [0, 128], sizes = [8, 128], strides = [1, 1]} : vector<8x512xf32> to vector<8x128xf32>
    %431 = arith.negf %430 : vector<8x128xf32>
    %432 = math.exp %431 : vector<8x128xf32>
    %cst_169 = arith.constant 1.000000e+00 : f32
    %433 = vector.broadcast %cst_169 : f32 to vector<8x128xf32>
    %434 = arith.addf %433, %432 : vector<8x128xf32>
    %435 = arith.divf %433, %434 : vector<8x128xf32>
    %436 = vector.extract_strided_slice %423 {offsets = [0, 256], sizes = [8, 128], strides = [1, 1]} : vector<8x512xf32> to vector<8x128xf32>
    %437 = math.tanh %436 : vector<8x128xf32>
    %438 = vector.extract_strided_slice %423 {offsets = [0, 384], sizes = [8, 128], strides = [1, 1]} : vector<8x512xf32> to vector<8x128xf32>
    %439 = arith.negf %438 : vector<8x128xf32>
    %440 = math.exp %439 : vector<8x128xf32>
    %cst_170 = arith.constant 1.000000e+00 : f32
    %441 = vector.broadcast %cst_170 : f32 to vector<8x128xf32>
    %442 = arith.addf %441, %440 : vector<8x128xf32>
    %443 = arith.divf %441, %442 : vector<8x128xf32>
    %444 = arith.mulf %435, %416 : vector<8x128xf32>
    %445 = arith.mulf %429, %437 : vector<8x128xf32>
    %446 = arith.addf %444, %445 : vector<8x128xf32>
    %447 = math.tanh %446 : vector<8x128xf32>
    %448 = arith.mulf %443, %447 : vector<8x128xf32>
    %449 = vector.broadcast %414 : i32 to vector<8x1xi32>
    %450 = arith.cmpi slt, %449, %60 : vector<8x1xi32>
    %451 = vector.shape_cast %450 : vector<8x1xi1> to vector<8x1xi1>
    %452 = vector.broadcast %451 : vector<8x1xi1> to vector<8x128xi1>
    %453 = arith.select %452, %448, %415 : vector<8x128xi1>, vector<8x128xf32>
    %c0_171 = arith.constant 0 : index
    %c0_172 = arith.constant 0 : index
    %454 = vector.load %arg9[%c0_171, %c0_172] : memref<8x128xf32, #tpu.memory_space<vmem>>, vector<8x128xf32>
    tpu.vector_store %arg9[%c0_171, %c0_172], %453 {strides = array<i32>} : memref<8x128xf32, #tpu.memory_space<vmem>>, vector<8x128xf32>,
    %455 = vector.shape_cast %450 : vector<8x1xi1> to vector<8x1xi1>
    %456 = vector.broadcast %455 : vector<8x1xi1> to vector<8x128xi1>
    %457 = arith.select %456, %446, %416 : vector<8x128xi1>, vector<8x128xf32>
    %c0_173 = arith.constant 0 : index
    %c0_174 = arith.constant 0 : index
    %458 = vector.load %arg10[%c0_173, %c0_174] : memref<8x128xf32, #tpu.memory_space<vmem>>, vector<8x128xf32>
    tpu.vector_store %arg10[%c0_173, %c0_174], %457 {strides = array<i32>} : memref<8x128xf32, #tpu.memory_space<vmem>>, vector<8x128xf32>,
    %cst_175 = arith.constant 0.000000e+00 : f32
    %459 = vector.shape_cast %450 : vector<8x1xi1> to vector<8x1xi1>
    %460 = vector.broadcast %459 : vector<8x1xi1> to vector<8x128xi1>
    %461 = vector.broadcast %cst_175 : f32 to vector<8x128xf32>
    %462 = arith.select %460, %448, %461 : vector<8x128xi1>, vector<8x128xf32>
    %463 = arith.index_cast %413 : i32 to index
    %c0_176 = arith.constant 0 : index
    %c0_177 = arith.constant 0 : index
    %464 = vector.load %arg7[%463, %c0_176, %c0_177] : memref<8x8x128xf32, #tpu.memory_space<vmem>>, vector<1x8x128xf32>
    %465 = vector.shape_cast %464 : vector<1x8x128xf32> to vector<8x128xf32>
    %466 = vector.shape_cast %462 : vector<8x128xf32> to vector<1x8x128xf32>
    tpu.vector_store %arg7[%463, %c0_176, %c0_177], %466 {strides = array<i32>} : memref<8x8x128xf32, #tpu.memory_space<vmem>>, vector<1x8x128xf32>,
    %c7_i32_178 = arith.constant 7 : i32
    %c1_i32_179 = arith.constant 1 : i32
    %467 = arith.subi %c1_i32_179, %arg0 : i32
    %468 = arith.muli %467, %c7_i32_178 : i32
    %c7_i32_180 = arith.constant 7 : i32
    %469 = arith.subi %c7_i32_180, %c7_i32_178 : i32
    %470 = arith.muli %arg0, %469 : i32
    %471 = arith.addi %468, %470 : i32
    %472 = arith.addi %7, %471 : i32
    %c0_181 = arith.constant 0 : index
    %c0_182 = arith.constant 0 : index
    %473 = vector.load %arg9[%c0_181, %c0_182] : memref<8x128xf32, #tpu.memory_space<vmem>>, vector<8x128xf32>
    %c0_183 = arith.constant 0 : index
    %c0_184 = arith.constant 0 : index
    %474 = vector.load %arg10[%c0_183, %c0_184] : memref<8x128xf32, #tpu.memory_space<vmem>>, vector<8x128xf32>
    %475 = arith.index_cast %471 : i32 to index
    %c0_185 = arith.constant 0 : index
    %c0_186 = arith.constant 0 : index
    %476 = vector.load %arg8[%475, %c0_185, %c0_186] : memref<8x8x512xf32, #tpu.memory_space<vmem>>, vector<1x8x512xf32>
    %477 = vector.shape_cast %476 : vector<1x8x512xf32> to vector<8x512xf32>
    %c0_187 = arith.constant 0 : index
    %c0_188 = arith.constant 0 : index
    %c0_189 = arith.constant 0 : index
    %478 = vector.load %arg5[%c0_187, %c0_188, %c0_189] : memref<1x128x512xf32, #tpu.memory_space<vmem>>, vector<1x128x512xf32>
    %479 = vector.shape_cast %478 : vector<1x128x512xf32> to vector<128x512xf32>
    %cst_190 = arith.constant dense<0.000000e+00> : vector<8x512xf32>
    %480 = tpu.matmul %473, %479, %cst_190 {dimension_numbers = #tpu.dot_dimension_numbers<[1], [0], [0], [1], [0, 0, 1, 1], [], []>} : vector<8x128xf32>, vector<128x512xf32>, vector<8x512xf32> -> vector<8x512xf32>
    %481 = arith.addf %477, %480 : vector<8x512xf32>
    %482 = vector.extract_strided_slice %481 {offsets = [0, 0], sizes = [8, 128], strides = [1, 1]} : vector<8x512xf32> to vector<8x128xf32>
    %483 = arith.negf %482 : vector<8x128xf32>
    %484 = math.exp %483 : vector<8x128xf32>
    %cst_191 = arith.constant 1.000000e+00 : f32
    %485 = vector.broadcast %cst_191 : f32 to vector<8x128xf32>
    %486 = arith.addf %485, %484 : vector<8x128xf32>
    %487 = arith.divf %485, %486 : vector<8x128xf32>
    %488 = vector.extract_strided_slice %481 {offsets = [0, 128], sizes = [8, 128], strides = [1, 1]} : vector<8x512xf32> to vector<8x128xf32>
    %489 = arith.negf %488 : vector<8x128xf32>
    %490 = math.exp %489 : vector<8x128xf32>
    %cst_192 = arith.constant 1.000000e+00 : f32
    %491 = vector.broadcast %cst_192 : f32 to vector<8x128xf32>
    %492 = arith.addf %491, %490 : vector<8x128xf32>
    %493 = arith.divf %491, %492 : vector<8x128xf32>
    %494 = vector.extract_strided_slice %481 {offsets = [0, 256], sizes = [8, 128], strides = [1, 1]} : vector<8x512xf32> to vector<8x128xf32>
    %495 = math.tanh %494 : vector<8x128xf32>
    %496 = vector.extract_strided_slice %481 {offsets = [0, 384], sizes = [8, 128], strides = [1, 1]} : vector<8x512xf32> to vector<8x128xf32>
    %497 = arith.negf %496 : vector<8x128xf32>
    %498 = math.exp %497 : vector<8x128xf32>
    %cst_193 = arith.constant 1.000000e+00 : f32
    %499 = vector.broadcast %cst_193 : f32 to vector<8x128xf32>
    %500 = arith.addf %499, %498 : vector<8x128xf32>
    %501 = arith.divf %499, %500 : vector<8x128xf32>
    %502 = arith.mulf %493, %474 : vector<8x128xf32>
    %503 = arith.mulf %487, %495 : vector<8x128xf32>
    %504 = arith.addf %502, %503 : vector<8x128xf32>
    %505 = math.tanh %504 : vector<8x128xf32>
    %506 = arith.mulf %501, %505 : vector<8x128xf32>
    %507 = vector.broadcast %472 : i32 to vector<8x1xi32>
    %508 = arith.cmpi slt, %507, %60 : vector<8x1xi32>
    %509 = vector.shape_cast %508 : vector<8x1xi1> to vector<8x1xi1>
    %510 = vector.broadcast %509 : vector<8x1xi1> to vector<8x128xi1>
    %511 = arith.select %510, %506, %473 : vector<8x128xi1>, vector<8x128xf32>
    %c0_194 = arith.constant 0 : index
    %c0_195 = arith.constant 0 : index
    %512 = vector.load %arg9[%c0_194, %c0_195] : memref<8x128xf32, #tpu.memory_space<vmem>>, vector<8x128xf32>
    tpu.vector_store %arg9[%c0_194, %c0_195], %511 {strides = array<i32>} : memref<8x128xf32, #tpu.memory_space<vmem>>, vector<8x128xf32>,
    %513 = vector.shape_cast %508 : vector<8x1xi1> to vector<8x1xi1>
    %514 = vector.broadcast %513 : vector<8x1xi1> to vector<8x128xi1>
    %515 = arith.select %514, %504, %474 : vector<8x128xi1>, vector<8x128xf32>
    %c0_196 = arith.constant 0 : index
    %c0_197 = arith.constant 0 : index
    %516 = vector.load %arg10[%c0_196, %c0_197] : memref<8x128xf32, #tpu.memory_space<vmem>>, vector<8x128xf32>
    tpu.vector_store %arg10[%c0_196, %c0_197], %515 {strides = array<i32>} : memref<8x128xf32, #tpu.memory_space<vmem>>, vector<8x128xf32>,
    %cst_198 = arith.constant 0.000000e+00 : f32
    %517 = vector.shape_cast %508 : vector<8x1xi1> to vector<8x1xi1>
    %518 = vector.broadcast %517 : vector<8x1xi1> to vector<8x128xi1>
    %519 = vector.broadcast %cst_198 : f32 to vector<8x128xf32>
    %520 = arith.select %518, %506, %519 : vector<8x128xi1>, vector<8x128xf32>
    %521 = arith.index_cast %471 : i32 to index
    %c0_199 = arith.constant 0 : index
    %c0_200 = arith.constant 0 : index
    %522 = vector.load %arg7[%521, %c0_199, %c0_200] : memref<8x8x128xf32, #tpu.memory_space<vmem>>, vector<1x8x128xf32>
    %523 = vector.shape_cast %522 : vector<1x8x128xf32> to vector<8x128xf32>
    %524 = vector.shape_cast %520 : vector<8x128xf32> to vector<1x8x128xf32>
    tpu.vector_store %arg7[%521, %c0_199, %c0_200], %524 {strides = array<i32>} : memref<8x8x128xf32, #tpu.memory_space<vmem>>, vector<1x8x128xf32>,
    %c8_i32_201 = arith.constant 8 : i32
    return
  }
  func.func @transform_0(%arg0: i32, %arg1: i32, %arg2: memref<8xi32, #tpu.memory_space<smem>>) -> (i32, i32, i32) {
    %c2_i32 = arith.constant 2 : i32
    %0 = arith.muli %c2_i32, %arg1 : i32
    %c0_i32 = arith.constant 0 : i32
    %1 = arith.subi %c0_i32, %0 : i32
    %2 = arith.muli %arg0, %1 : i32
    %3 = arith.addi %arg1, %2 : i32
    %c0_i32_0 = arith.constant 0 : i32
    %c0_i32_1 = arith.constant 0 : i32
    %c0_i32_2 = arith.constant 0 : i32
    return %3, %c0_i32_0, %c0_i32_1 : i32, i32, i32
  }
  func.func @transform_1(%arg0: i32, %arg1: i32, %arg2: memref<8xi32, #tpu.memory_space<smem>>) -> (i32, i32, i32) {
    %c0_i32 = arith.constant 0 : i32
    %c0_i32_0 = arith.constant 0 : i32
    %c0_i32_1 = arith.constant 0 : i32
    return %arg0, %c0_i32, %c0_i32_0 : i32, i32, i32
  }
  func.func @transform_2(%arg0: i32, %arg1: i32, %arg2: memref<8xi32, #tpu.memory_space<smem>>) -> (i32, i32, i32) {
    %c0_i32 = arith.constant 0 : i32
    %c0_i32_0 = arith.constant 0 : i32
    %c0_i32_1 = arith.constant 0 : i32
    return %arg0, %c0_i32, %c0_i32_0 : i32, i32, i32
  }
  func.func @transform_3(%arg0: i32, %arg1: i32, %arg2: memref<8xi32, #tpu.memory_space<smem>>) -> (i32, i32, i32) {
    %c0_i32 = arith.constant 0 : i32
    %c0_i32_0 = arith.constant 0 : i32
    %c0_i32_1 = arith.constant 0 : i32
    return %arg0, %c0_i32, %c0_i32_0 : i32, i32, i32
  }
  func.func @transform_4(%arg0: i32, %arg1: i32, %arg2: memref<8xi32, #tpu.memory_space<smem>>) -> (i32, i32, i32) {
    %c2_i32 = arith.constant 2 : i32
    %0 = arith.muli %c2_i32, %arg1 : i32
    %c0_i32 = arith.constant 0 : i32
    %1 = arith.subi %c0_i32, %0 : i32
    %2 = arith.muli %arg0, %1 : i32
    %3 = arith.addi %arg1, %2 : i32
    %c0_i32_0 = arith.constant 0 : i32
    %c0_i32_1 = arith.constant 0 : i32
    return %3, %c0_i32_0, %arg0 : i32, i32, i32
  }
}

</mosaic_0001>

<bundles_post_ra>
// kernel: tpu_custom_call.1
= control target key start
LH: loop header
LB: loop body
LE: loop exit
PB: predicated region body
PF: predicated region fallthrough
CT: control target
= control target key end

     0   :  { %s5376_s0 = inlined_call_operand.hbm [shape: s32[8], index: 0, kind: input, shape index: {}]   ;;  %s5377_s1 = inlined_call_operand.hbm [shape: f32[8,8,128], index: 1, kind: input, shape index: {}]   ;;  %s5378_s2 = inlined_call_operand.hbm [shape: f32[2,128,512], index: 2, kind: input, shape index: {}]   ;;  %s5379_s3 = inlined_call_operand.hbm [shape: f32[2,128,512], index: 3, kind: input, shape index: {}]   ;;  %s5380_s4 = inlined_call_operand.vmem [shape: f32[2,1,512], index: 4, kind: input, shape index: {}]   ;;  %s5381_s5 = inlined_call_operand.hbm [shape: f32[8,8,256], index: 5, kind: output, shape index: {}]  }
   0x1   :  { %5394 = sst [smem:[#allocation20_spill]] %s5378_s2  ;;  %s3929_s20 = scalar_lea.hbm %s5376_s0, 16 }
   0x2   :  { %p3930_p0 = scmp.ne.s32.totalorder %s5376_s0, %s3929_s20  ;;  %p3933_p1 = scmp.lt.u32.totalorder %s3929_s20, %s5376_s0 }
   0x4   :  { %p3935_p2 = pnand %p3933_p1, %p3930_p0 }
   0x6   :  { %3938 = shalt.err (!%p3935_p2)  }
   0x7   :  { %s4117_s25 = smov [#allocation6]  }
   0x8   :  { %11 = dma.hbm_to_smem %s5376_s0, 16, %s4117_s25, [#allocation5] }
   0x9   :  { %4079 = dma.done.wait [#allocation5], 16 }
   0xa   :  { %4080 = vsyncadd [#allocation5], 4294967280 }
   0xb   :  { %13 = sfence }
   0xc   :  { %14 = vsyncpa [#allocation8], 0 }
   0xd   :  { %16 = vsyncpa [#allocation8 + $0x1], 0 }
   0xe   :  { %17 = vsyncpa [#allocation11], 0 }
   0xf   :  { %19 = vsyncpa [#allocation11 + $0x1], 0 }
  0x10   :  { %20 = vsyncpa [#allocation9], 0 }
  0x11   :  { %22 = vsyncpa [#allocation9 + $0x1], 0  ;;  %s4172_s28 = smov 0   ;;  %s4174_s29 = smov 0  }
  0x12   :  { %s4176_s30 = smov 0   ;;  %s4178_s6 = smov 0  }
  0x13   :  { %s4180_s7 = smov 0   ;;  %s4182_s0 = smov 0  }
  0x14 LB: > { %5395 = sst [smem:[#allocation18_spill]] %s4111_s7  ;;  %s4203_s8 = sadd.s32 4294967295, %s4115_s0   ;;  %s4115_s0 = sphi %s4182_s0, %s28_s0   ;;  %s4111_s7 = sphi %s4180_s7, %s5422_s7   ;;  %s4107_s6 = sphi %s4178_s6, %s5421_s6   ;;  %s4103_s30 = sphi %s4176_s30, %s5425_s30   ;;  %s4099_s29 = sphi %s4174_s29, %s5424_s29   ;;  %s4095_s28 = sphi %s4172_s28, %s5423_s28  }
  0x15   : > { %s3048_s9 = sadd.s32 4294967294, %s4115_s0   ;;  %s40_s10 = sadd.s32 1, %s4111_s7 }
  0x16   : > { %s81_s11 = sadd.s32 1, %s4103_s30  ;;  %p42_p3 = scmp.ge.s32.totalorder %s40_s10, 2 }
  0x17   : > { %p88_p4 = scmp.ne.s32.totalorder %s4103_s30, %s4099_s29  ;;  %p5384_p5 = scmp.eq.s32.totalorder %s4115_s0, 0 }
  0x18   : > { %p94_p6 = scmp.ne.s32.totalorder %s4099_s29, %s4095_s28  ;;  %s5427_s10 = smov (%p42_p3, %s40_s10), 0 }
  0x19   : > { %5396 = sst [smem:[#allocation19_spill]] %s5427_s10  ;;  %p4217_p7 = por %p5384_p5, %p88_p4 }
  0x1a   : > { %p5382_p8 = scmp.eq.s32.totalorder %s4203_s8, 0  ;;  %s78_s13 = ssub.s32 %s4111_s7, %s5427_s10 }
  0x1b   : > { %p180_p9 = scmp.eq.s32.totalorder %s4203_s8, 1  ;;  %p79_p10 = scmp.eq.s32.totalorder %s78_s13, 0 }
  0x1c   : > { %p4227_p11 = por %p5382_p8, %p94_p6  ;;  %p186_p13 = scmp.eq.s32.totalorder %s3048_s9, 1 }
  0x1d   : > { %p4231_p12 = por %p180_p9, %p88_p4  ;;  %p5383_p2 = scmp.lt.s32.totalorder %s4115_s0, 2 }
  0x1e   : > { %s5398_s14 = scalar_select %p4227_p11, 1, 0 }
  0x1f   : > { %s5399_s15 = scalar_select %p4231_p12, 1, 0 }
  0x20   : > { %s4236_s16 = scalar_select %p79_p10, %s4103_s30, %s81_s11  }
  0x21   : > { %p4238_p0 = por %p186_p13, %p94_p6  ;;  %s231_s18 = sand.u32 1, %s4115_s0  }
  0x22   : > { %s233_s19 = sand.u32 1, %s4103_s30   ;;  %s3127_s21 = sshll.u32 %s4111_s7, 13 }
  0x23   : > { %s5400_s17 = scalar_select %p4238_p0, 1, 0 }
  0x24   : > { %s4246_s20 = sshll.u32 %s233_s19, 9  ;;  %s5401_s2 = sld [smem:[#allocation20_spill]] }
  0x25   : > { %s235_s25 = scalar_lea.vmem [#allocation10], %s4246_s20  ;;  %p4263_p3 = pnand %p5383_p2, %p4217_p7 }
  0x26   : > { %s242_s26 = sshll.u32 %s235_s25, 4  ;;  %s4267_s9 = scalar_lea.sflag [#allocation11], %s231_s18  ;;  %s4257_s26 = int_to_ptr.vmem [resolvable:$true] %s242_s26 }
  0x27   : > { %s5402_s27 = scalar_select %p4263_p3, 1, 0 }
  0x28   : > { %p5388_p6 = pneg %p4263_p3 }
  0x2a   : > { %s4254_s24 = scalar_lea.hbm %s5401_s2, %s3127_s21  ;;  %s3944_s12 = scalar_lea.hbm %s5401_s2, 16384 }
  0x2b   : > { %s3939_s11 = scalar_lea.hbm %s4254_s24, 8192  ;;  %p3945_p7 = scmp.lt.u32.totalorder %s4254_s24, %s5401_s2 }
  0x2c   : > { %p3940_p4 = scmp.ne.s32.totalorder %s4254_s24, %s3939_s11  ;;  %p3946_p13 = scmp.lt.u32.totalorder %s3944_s12, %s3939_s11 }
  0x2d   : > { %p3948_p8 = scmp.lt.u32.totalorder %s3939_s11, %s4254_s24 }
  0x2e   : > { %p3942_p9 = pnand %p5388_p6, %p3940_p4  ;;  %p3947_p1 = por %p3946_p13, %p3945_p7 }
  0x30   : > { %p3943_p10 = pneg %p3942_p9  ;;  %p3949_p2 = por %p3948_p8, %p3947_p1 }
  0x32   : > { %p3950_p5 = pnand %p3949_p2, %p3943_p10 }
  0x34   : > { %3953 = shalt.err (!%p3950_p5)
}
  0x35   : > { %s3954_s18 = scalar_lea.vmem %s4257_s26, 8192  ;;  %s4118_s25 = smov [#allocation10]  }
  0x36   : > { %p3955_p4 = scmp.ne.s32.totalorder %s4257_s26, %s3954_s18  ;;  %s3959_s13 = sshll.u32 %s4118_s25, 4  ;;  %s3960_s13 = int_to_ptr.vmem [resolvable:$false] %s3959_s13 }
  0x37   : > { %s3961_s19 = scalar_lea.vmem %s3960_s13, 16384  ;;  %p3962_p12 = scmp.lt.s32.totalorder %s4257_s26, %s3960_s13 }
  0x38   : > { %p3957_p9 = pnand %p3955_p4, %p5388_p6  ;;  %p3963_p7 = scmp.lt.s32.totalorder %s3961_s19, %s3954_s18 }
  0x3a   : > { %p3958_p0 = pneg %p3957_p9  ;;  %p3964_p13 = por %p3963_p7, %p3962_p12 }
  0x3c   : > { %p3965_p8 = pnand %p3964_p13, %p3958_p0 }
  0x3e   : > { %3968 = shalt.err (!%p3965_p8)
}
  0x3f   : > { %s5387_s11 = smov 512   ;;  %s5392_s12 = smov 32  }
  0x40   : > { %3731 = dma.hbm_to_vmem [thread:$0]  (!%p4263_p3), %s4254_s24, 8192, %s4257_s26, %s4267_s9, %s5387_s11, %s5387_s11, %s5392_s12  }
  0x41   : > { %s4303_s18 = scalar_lea.hbm %s5379_s3, %s3127_s21  ;;  %s256_s25 = scalar_lea.vmem [#allocation12], %s4246_s20 }
  0x42   : > { %s263_s13 = sshll.u32 %s256_s25, 4  ;;  %p3058_p5 = scmp.ge.s32.totalorder %s4115_s0, 1  ;;  %s4306_s13 = int_to_ptr.vmem [resolvable:$true] %s263_s13 }
  0x43   : > { %p278_p12 = scmp.lt.s32.totalorder %s4115_s0, 3  ;;  %s4121_s2 = smov [#allocation7]  }
  0x44   : > { %s221_s10 = sshll.u32 %s4121_s2, 4  ;;  %p5404_p1 = scmp.eq.s32.totalorder %s4115_s0, 0  ;;  %s222_s10 = int_to_ptr.vmem [resolvable:$true] %s221_s10 }
  0x45   : > { %p4310_p0 = pnand %p3058_p5, %p278_p12  ;;  %p5405_p2 = scmp.lt.s32.totalorder %s4115_s0, 2 }
  0x46   : > { %s3969_s26 = scalar_lea.hbm %s5377_s1, 1024 }
  0x47   : > { %s5403_s19 = scalar_select %p4310_p0, 1, 0 }
  0x48   : > { %p4318_p10 = pnand %p5405_p2, %p5404_p1  ;;  %p3970_p4 = scmp.ne.s32.totalorder %s5377_s1, %s3969_s26 }
  0x49   : > { %p3976_p8 = scmp.lt.u32.totalorder %s3969_s26, %s5377_s1 }
  0x4a   : > { %p3971_p9 = pneg %p4318_p10 }
  0x4c   : > { %p3972_p7 = pnand %p3971_p9, %p3970_p4 }
  0x4e   : > { %p3973_p13 = pneg %p3972_p7 }
  0x50   : > { %p3978_p5 = pnand %p3976_p8, %p3973_p13 }
  0x52   : > { %3981 = shalt.err (!%p3978_p5)
}
  0x53   : > { %s3982_s11 = scalar_lea.vmem %s222_s10, 1024  ;;  %s3989_s21 = scalar_lea.vmem %s222_s10, 2048 }
  0x54   : > { %p3983_p12 = scmp.ne.s32.totalorder %s222_s10, %s3982_s11  ;;  %p3990_p6 = scmp.lt.s32.totalorder %s222_s10, %s222_s10 }
  0x55   : > { %p3991_p11 = scmp.lt.s32.totalorder %s3989_s21, %s3982_s11 }
  0x56   : > { %p3985_p1 = pnand %p3983_p12, %p3971_p9 }
  0x57   : > { %p3992_p0 = por %p3991_p11, %p3990_p6 }
  0x58   : > { %p3986_p2 = pneg %p3985_p1 }
  0x5a   : > { %p3993_p3 = pnand %p3992_p0, %p3986_p2 }
  0x5c   : > { %3996 = shalt.err (!%p3993_p3)
}
  0x5d   : > { %s4122_s20 = smov 128   ;;  %s4123_s26 = smov 8  }
  0x5e   : > { %3728 = dma.hbm_to_vmem [thread:$0]  (!%p4318_p10), %s5377_s1, 1024, %s222_s10, [#allocation8], %s4122_s20, %s4122_s20, %s4123_s26  }
  0x5f   : > { %s3997_s2 = scalar_lea.hbm %s4303_s18, 8192  ;;  %p5407_p9 = scmp.ne.s32.totalorder %s5402_s27, 0 }
  0x60   : > { %p3998_p4 = scmp.ne.s32.totalorder %s4303_s18, %s3997_s2  ;;  %s4002_s21 = scalar_lea.hbm %s5379_s3, 16384 }
  0x61   : > { %p5408_p7 = pneg %p5407_p9  ;;  %p4003_p3 = scmp.lt.u32.totalorder %s4303_s18, %s5379_s3 }
  0x62   : > { %p4004_p0 = scmp.lt.u32.totalorder %s4002_s21, %s3997_s2  ;;  %p4006_p8 = scmp.lt.u32.totalorder %s3997_s2, %s4303_s18 }
  0x63   : > { %p4000_p11 = pnand %p3998_p4, %p5408_p7 }
  0x64   : > { %p4005_p13 = por %p4004_p0, %p4003_p3 }
  0x65   : > { %p4001_p6 = pneg %p4000_p11 }
  0x66   : > { %p4007_p5 = por %p4006_p8, %p4005_p13 }
  0x68   : > { %p4008_p12 = pnand %p4007_p5, %p4001_p6 }
  0x6a   : > { %4011 = shalt.err (!%p4008_p12)
}
  0x6b   : > { %s4012_s10 = scalar_lea.vmem %s4306_s13, 8192  ;;  %p5409_p1 = pmov %p5408_p7 }
  0x6c   : > { %p4013_p10 = scmp.ne.s32.totalorder %s4306_s13, %s4012_s10  ;;  %s4124_s24 = smov [#allocation12]  }
  0x6d   : > { %s4017_s20 = sshll.u32 %s4124_s24, 4  ;;  %s4018_s20 = int_to_ptr.vmem [resolvable:$false] %s4017_s20 }
  0x6e   : > { %p4015_p2 = pnand %p4013_p10, %p5409_p1  ;;  %s4019_s7 = scalar_lea.vmem %s4018_s20, 16384 }
  0x6f   : > { %p4020_p7 = scmp.lt.s32.totalorder %s4306_s13, %s4018_s20  ;;  %p4021_p11 = scmp.lt.s32.totalorder %s4019_s7, %s4012_s10 }
  0x70   : > { %p4016_p4 = pneg %p4015_p2 }
  0x71   : > { %p4022_p3 = por %p4021_p11, %p4020_p7 }
  0x73   : > { %p4023_p0 = pnand %p4022_p3, %p4016_p4 }
  0x75   : > { %4026 = shalt.err (!%p4023_p0)
}
  0x76   : > { %s5410_s12 = smov 32   ;;  %s5411_s26 = smov 512  }
  0x77   : > { %3734 = dma.hbm_to_vmem [thread:$0]  (!%p5407_p9), %s4303_s18, 8192, %s4306_s13, %s4267_s9, %s5411_s26, %s5411_s26, %s5410_s12  }
  0x78   : > { %p5412_p6 = scmp.ne.s32.totalorder %s5403_s19, 0 }
  0x79   : > { %p5413_p13 = scmp.eq.s32.totalorder (!%p5412_p6), %s4203_s8, 0 }
  0x7a   : > { %282 = sbr.rel (%p5412_p6) target bundleno = 2298 (0x8fa), region = 36 }
  0x81   : > { %4082 = dma.done.wait (%p5413_p13), [#allocation8], 1024   ;;  %p5414_p8 = pmov %p5413_p13 }
  0x82   : > { %s293_s27 = sand.u32 1, %s4203_s8   ;;  %s4373_s22 = sand.u32 1, %s4099_s29  }
  0x83   : > { %4084 = vsyncadd (%p5414_p8), [#allocation8], 4294966272  ;;  %s3060_s23 = sshll.u32 %s4373_s22, 9  ;;  %s294_s2 = scalar_lea.sflag [#allocation11], %s293_s27 }
  0x84   : > { %s4378_s9 = scalar_lea.vmem [#allocation10], %s3060_s23  ;;  %p5415_p9 = scmp.ne.s32.totalorder %s5398_s14, 0 }
  0x86   : > { %4086 = dma.done.wait (%p5415_p9), %s294_s2, 16384  }
  0x87   : > { %4088 = vsyncadd (%p5415_p9), %s294_s2, 4294950912  ;;  %v4125_v0 = vmov 0.0   ;;  %v379_v1 = vld [vmem:[%s4378_s9 + $0x8] sm:$0xff]  ;;  %v381_v3 = vld [vmem:[%s4378_s9 + $0x18] sm:$0xff]  ;;  %s4452_s8 = scalar_lea.vmem [#allocation12], %s3060_s23  ;;  %p350_p5 = scmp.lt.s32.totalorder %s4107_s6, 1 }
  0x88   : > { %528 = vmatprep.mubr.f32.mxu0 %v4125_v0  ;;  %641 = vmatprep.mubr.f32.mxu1 %v4125_v0  ;;  %v383_v2 = vld [vmem:[%s4378_s9 + $0x28] sm:$0xff]  ;;  %v385_v5 = vld [vmem:[%s4378_s9 + $0x38] sm:$0xff]  ;;  %v378_v6 = vld [vmem:[%s4378_s9] sm:$0xff]  ;;  %s3129_s25 = smul.u32 224, %s4107_s6  ;;  %s725_s21 = sld [smem:[#allocation6]] }
  0x89   : > { %v3139_v4 = vpack.c.bf16 %v383_v2, %v379_v1  ;;  %v382_v7 = vld [vmem:[%s4378_s9 + $0x20] sm:$0xff]  ;;  %v3171_v8 = vpack.c.bf16 %v385_v5, %v381_v3  ;;  %v380_v10 = vld [vmem:[%s4378_s9 + $0x10] sm:$0xff]  ;;  %v387_v12 = vld [vmem:[%s4378_s9 + $0x48] sm:$0xff]  ;;  %s351_s14 = scalar_select %p350_p5, %s4107_s6, 1 }
  0x8a   : > { %v3141_v9 = vpack.c.bf16 %v382_v7, %v378_v6  ;;  %v384_v11 = vld [vmem:[%s4378_s9 + $0x30] sm:$0xff]  ;;  %v391_v14 = vld [vmem:[%s4378_s9 + $0x68] sm:$0xff]  ;;  %v389_v15 = vld [vmem:[%s4378_s9 + $0x58] sm:$0xff]  ;;  %s3064_s10 = sld [smem:[#allocation6 + $0x1]]  ;;  %s762_s24 = scalar_lea.vmem [#allocation2], %s3129_s25 }
  0x8b   : > { %3140 = vmatprep.subr.bf16.mxu0 %v3139_v4  ;;  %v3173_v13 = vpack.c.bf16 %v384_v11, %v380_v10  ;;  %v393_v16 = vld [vmem:[%s4378_s9 + $0x78] sm:$0xff]  ;;  %3172 = vmatprep.subr.bf16.mxu1 %v3171_v8  ;;  %v3143_v17 = vpack.c.bf16 %v391_v14, %v387_v12  ;;  %v386_v19 = vld [vmem:[%s4378_s9 + $0x40] sm:$0xff]  ;;  %v388_v21 = vld [vmem:[%s4378_s9 + $0x50] sm:$0xff]  ;;  %s3063_s18 = sshll.u32 %s351_s14, 2  ;;  %s3065_s20 = sld [smem:[#allocation6 + $0x2]] }
  0x8c   : > { %3142 = vmatpush1.bf16.msra.mxu0 %v3141_v9  ;;  %v3175_v18 = vpack.c.bf16 %v393_v16, %v389_v15  ;;  %v390_v20 = vld [vmem:[%s4378_s9 + $0x60] sm:$0xff]  ;;  %v392_v23 = vld [vmem:[%s4378_s9 + $0x70] sm:$0xff]  ;;  %v395_v24 = vld [vmem:[%s4378_s9 + $0x88] sm:$0xff]  ;;  %s353_s11 = scalar_lea.vmem %s5380_s4, %s3063_s18  ;;  %s3066_s7 = sld [smem:[#allocation6 + $0x3]] }
  0x8d   : > { %3174 = vmatpush1.bf16.msra.mxu1 %v3173_v13  ;;  %v3145_v22 = vpack.c.bf16 %v390_v20, %v386_v19  ;;  %v399_v25 = vld [vmem:[%s4378_s9 + $0xa8] sm:$0xff]  ;;  %3144 = vmatprep.subr.bf16.mxu0 %v3143_v17  ;;  %v3177_v26 = vpack.c.bf16 %v392_v23, %v388_v21  ;;  %v397_v28 = vld [vmem:[%s4378_s9 + $0x98] sm:$0xff]  ;;  %v394_v30 = vld [vmem:[%s4378_s9 + $0x80] sm:$0xff]  ;;  %s3067_s12 = sld [smem:[#allocation6 + $0x4]]  ;;  %s3068_s26 = sld [smem:[#allocation6 + $0x5]] }
  0x8e   : > { %3176 = vmatprep.subr.bf16.mxu1 %v3175_v18  ;;  %v3147_v27 = vpack.c.bf16 %v399_v25, %v395_v24  ;;  %v401_v29 = vld [vmem:[%s4378_s9 + $0xb8] sm:$0xff]  ;;  %v398_v32 = vld [vmem:[%s4378_s9 + $0xa0] sm:$0xff]  ;;  %v396_v33 = vld [vmem:[%s4378_s9 + $0x90] sm:$0xff]  ;;  %s3069_s27 = sld [smem:[#allocation6 + $0x6]]  ;;  %s3070_s23 = sld [smem:[#allocation6 + $0x7]] }
  0x8f   : > { %v3179_v31 = vpack.c.bf16 %v401_v29, %v397_v28  ;;  %v400_v34 = vld [vmem:[%s4378_s9 + $0xb0] sm:$0xff]  ;;  %v3149_v35 = vpack.c.bf16 %v398_v32, %v394_v30  ;;  %v403_v36 = vld [vmem:[%s4378_s9 + $0xc8] sm:$0xff]  ;;  %v405_v38 = vld [vmem:[%s4378_s9 + $0xd8] sm:$0xff]  ;;  %s756_s2 = smul.u32 7, %s4107_s6  ;;  %p5418_p10 = scmp.ne.s32.totalorder %s5399_s15, 0 }
  0x90   : > { %3146 = vmatpush1.bf16.msra.mxu0 %v3145_v22  ;;  %v407_v37 = vld [vmem:[%s4378_s9 + $0xe8] sm:$0xff]  ;;  %v3181_v39 = vpack.c.bf16 %v400_v34, %v396_v33  ;;  %v409_v41 = vld [vmem:[%s4378_s9 + $0xf8] sm:$0xff]  ;;  %v402_v42 = vld [vmem:[%s4378_s9 + $0xc0] sm:$0xff]  ;;  %s3076_s14 = smul.u32 56, %s4107_s6 }
  0x91   : > { %3178 = vmatpush1.bf16.msra.mxu1 %v3177_v26  ;;  %3148 = vmatprep.subr.bf16.mxu0 %v3147_v27  ;;  %v3151_v40 = vpack.c.bf16 %v407_v37, %v403_v36  ;;  %v406_v43 = vld [vmem:[%s4378_s9 + $0xe0] sm:$0xff]  ;;  %v3183_v44 = vpack.c.bf16 %v409_v41, %v405_v38  ;;  %v404_v45 = vld [vmem:[%s4378_s9 + $0xd0] sm:$0xff]  ;;  %v411_v47 = vld [vmem:[%s4378_s9 + $0x108] sm:$0xff]  ;;  %s1014_s19 = smul.u32 6, %s4107_s6 }
  0x92   : > { %3180 = vmatprep.subr.bf16.mxu1 %v3179_v31  ;;  %v408_v46 = vld [vmem:[%s4378_s9 + $0xf0] sm:$0xff]  ;;  %v415_v48 = vld [vmem:[%s4378_s9 + $0x128] sm:$0xff]  ;;  %v413_v49 = vld [vmem:[%s4378_s9 + $0x118] sm:$0xff]  ;;  %v3153_v51 = vpack.c.bf16 %v406_v43, %v402_v42 }
  0x93   : > { %v417_v50 = vld [vmem:[%s4378_s9 + $0x138] sm:$0xff]  ;;  %v3185_v52 = vpack.c.bf16 %v408_v46, %v404_v45  ;;  %v3155_v53 = vpack.c.bf16 %v415_v48, %v411_v47  ;;  %v410_v54 = vld [vmem:[%s4378_s9 + $0x100] sm:$0xff]  ;;  %v412_v56 = vld [vmem:[%s4378_s9 + $0x110] sm:$0xff] }
  0x94   : > { %3150 = vmatpush1.bf16.msra.mxu0 %v3149_v35  ;;  %v414_v55 = vld [vmem:[%s4378_s9 + $0x120] sm:$0xff]  ;;  %v3187_v57 = vpack.c.bf16 %v417_v50, %v413_v49  ;;  %v416_v58 = vld [vmem:[%s4378_s9 + $0x130] sm:$0xff]  ;;  %v419_v59 = vld [vmem:[%s4378_s9 + $0x148] sm:$0xff] }
  0x95   : > { %3182 = vmatpush1.bf16.msra.mxu1 %v3181_v39  ;;  %3152 = vmatprep.subr.bf16.mxu0 %v3151_v40  ;;  %v423_v60 = vld [vmem:[%s4378_s9 + $0x168] sm:$0xff]  ;;  %v421_v61 = vld [vmem:[%s4378_s9 + $0x158] sm:$0xff]  ;;  %v3157_v63 = vpack.c.bf16 %v414_v55, %v410_v54  ;;  %v3189_v1 = vpack.c.bf16 %v416_v58, %v412_v56  ;;  %v418_v3 = vld [vmem:[%s4378_s9 + $0x140] sm:$0xff] }
  0x96   : > { %3184 = vmatprep.subr.bf16.mxu1 %v3183_v44  ;;  %v425_v62 = vld [vmem:[%s4378_s9 + $0x178] sm:$0xff]  ;;  %v3159_v2 = vpack.c.bf16 %v423_v60, %v419_v59  ;;  %v422_v4 = vld [vmem:[%s4378_s9 + $0x160] sm:$0xff]  ;;  %v420_v5 = vld [vmem:[%s4378_s9 + $0x150] sm:$0xff] }
  0x97   : > { %v3191_v6 = vpack.c.bf16 %v425_v62, %v421_v61  ;;  %v424_v7 = vld [vmem:[%s4378_s9 + $0x170] sm:$0xff]  ;;  %v427_v8 = vld [vmem:[%s4378_s9 + $0x188] sm:$0xff]  ;;  %v429_v10 = vld [vmem:[%s4378_s9 + $0x198] sm:$0xff]  ;;  %v3161_v12 = vpack.c.bf16 %v422_v4, %v418_v3 }
  0x98   : > { %3154 = vmatpush1.bf16.msra.mxu0 %v3153_v51  ;;  %v431_v9 = vld [vmem:[%s4378_s9 + $0x1a8] sm:$0xff]  ;;  %v433_v11 = vld [vmem:[%s4378_s9 + $0x1b8] sm:$0xff]  ;;  %v3193_v13 = vpack.c.bf16 %v424_v7, %v420_v5  ;;  %v426_v15 = vld [vmem:[%s4378_s9 + $0x180] sm:$0xff] }
  0x99   : > { %3186 = vmatpush1.bf16.msra.mxu1 %v3185_v52  ;;  %3156 = vmatprep.subr.bf16.mxu0 %v3155_v53  ;;  %v3163_v14 = vpack.c.bf16 %v431_v9, %v427_v8  ;;  %v430_v16 = vld [vmem:[%s4378_s9 + $0x1a0] sm:$0xff]  ;;  %v428_v17 = vld [vmem:[%s4378_s9 + $0x190] sm:$0xff]  ;;  %v3195_v18 = vpack.c.bf16 %v433_v11, %v429_v10  ;;  %v435_v20 = vld [vmem:[%s4378_s9 + $0x1c8] sm:$0xff] }
  0x9a   : > { %3188 = vmatprep.subr.bf16.mxu1 %v3187_v57  ;;  %v432_v19 = vld [vmem:[%s4378_s9 + $0x1b0] sm:$0xff]  ;;  %v439_v21 = vld [vmem:[%s4378_s9 + $0x1e8] sm:$0xff]  ;;  %v437_v22 = vld [vmem:[%s4378_s9 + $0x1d8] sm:$0xff]  ;;  %v3165_v24 = vpack.c.bf16 %v430_v16, %v426_v15 }
  0x9b   : > { %v441_v23 = vld [vmem:[%s4378_s9 + $0x1f8] sm:$0xff]  ;;  %v3197_v25 = vpack.c.bf16 %v432_v19, %v428_v17  ;;  %v3167_v26 = vpack.c.bf16 %v439_v21, %v435_v20  ;;  %v434_v27 = vld [vmem:[%s4378_s9 + $0x1c0] sm:$0xff]  ;;  %v436_v29 = vld [vmem:[%s4378_s9 + $0x1d0] sm:$0xff] }
  0x9c   : > { %3158 = vmatpush1.bf16.msra.mxu0 %v3157_v63  ;;  %v438_v28 = vld [vmem:[%s4378_s9 + $0x1e0] sm:$0xff]  ;;  %v3199_v30 = vpack.c.bf16 %v441_v23, %v437_v22  ;;  %v440_v31 = vld [vmem:[%s4378_s9 + $0x1f0] sm:$0xff]  ;;  %v768_v32 = vld [vmem:[%s4452_s8 + $0x8] sm:$0xff]  ;;  %s3062_s9 = sshll.u32 %s4373_s22, 6 }
  0x9d   : > { %3190 = vmatpush1.bf16.msra.mxu1 %v3189_v1  ;;  %3160 = vmatprep.subr.bf16.mxu0 %v3159_v2  ;;  %v772_v33 = vld [vmem:[%s4452_s8 + $0x28] sm:$0xff]  ;;  %v770_v34 = vld [vmem:[%s4452_s8 + $0x18] sm:$0xff]  ;;  %v3169_v36 = vpack.c.bf16 %v438_v28, %v434_v27  ;;  %v3201_v37 = vpack.c.bf16 %v440_v31, %v436_v29  ;;  %v767_v39 = vld [vmem:[%s4452_s8] sm:$0xff]  ;;  %s4736_s18 = scalar_lea.vmem [#allocation13], %s3062_s9 }
  0x9e   : > { %3192 = vmatprep.subr.bf16.mxu1 %v3191_v6  ;;  %v774_v35 = vld [vmem:[%s4452_s8 + $0x38] sm:$0xff]  ;;  %v4458_v38 = vpack.c.bf16 %v772_v33, %v768_v32  ;;  %v771_v40 = vld [vmem:[%s4452_s8 + $0x20] sm:$0xff]  ;;  %v769_v42 = vld [vmem:[%s4452_s8 + $0x10] sm:$0xff]  ;;  %s1011_s13 = scalar_lea.vmem %s4736_s18, %s3076_s14 [#allocation13] }
  0x9f   : > { %v4462_v41 = vpack.c.bf16 %v774_v35, %v770_v34  ;;  %v773_v43 = vld [vmem:[%s4452_s8 + $0x30] sm:$0xff]  ;;  %v776_v44 = vld [vmem:[%s4452_s8 + $0x48] sm:$0xff]  ;;  %v370_v46 = vld [vmem:[#allocation7] sm:$0xff]  ;;  %v4471_v49 = vpack.c.bf16 %v771_v40, %v767_v39 }
  0xa0   : > { %3162 = vmatpush1.bf16.msra.mxu0 %v3161_v12  ;;  %v780_v45 = vld [vmem:[%s4452_s8 + $0x68] sm:$0xff]  ;;  %v778_v47 = vld [vmem:[%s4452_s8 + $0x58] sm:$0xff]  ;;  %v4474_v50 = vpack.c.bf16 %v773_v43, %v769_v42  ;;  %v775_v52 = vld [vmem:[%s4452_s8 + $0x40] sm:$0xff] }
  0xa1   : > { %3194 = vmatpush1.bf16.msra.mxu1 %v3193_v13  ;;  %3164 = vmatprep.subr.bf16.mxu0 %v3163_v14  ;;  %v782_v48 = vld [vmem:[%s4452_s8 + $0x78] sm:$0xff]  ;;  %v4476_v51 = vpack.c.bf16 %v780_v45, %v776_v44  ;;  %v779_v53 = vld [vmem:[%s4452_s8 + $0x60] sm:$0xff]  ;;  %v777_v54 = vld [vmem:[%s4452_s8 + $0x50] sm:$0xff] }
  0xa2   : > { %3196 = vmatprep.subr.bf16.mxu1 %v3195_v18  ;;  %v4481_v55 = vpack.c.bf16 %v782_v48, %v778_v47  ;;  %v781_v56 = vld [vmem:[%s4452_s8 + $0x70] sm:$0xff]  ;;  %v784_v57 = vld [vmem:[%s4452_s8 + $0x88] sm:$0xff]  ;;  %v786_v60 = vld [vmem:[%s4452_s8 + $0x98] sm:$0xff]  ;;  %v4491_v62 = vpack.c.bf16 %v779_v53, %v775_v52 }
  0xa3   : > { %v788_v58 = vld [vmem:[%s4452_s8 + $0xa8] sm:$0xff]  ;;  %v790_v61 = vld [vmem:[%s4452_s8 + $0xb8] sm:$0xff]  ;;  %v4495_v63 = vpack.c.bf16 %v781_v56, %v777_v54  ;;  %v783_v2 = vld [vmem:[%s4452_s8 + $0x80] sm:$0xff] }
  0xa4   : > { %3166 = vmatpush1.bf16.msra.mxu0 %v3165_v24  ;;  %v371_v59 = vld [vmem:[#allocation7 + $0x8] sm:$0xff]  ;;  %v4497_v1 = vpack.c.bf16 %v788_v58, %v784_v57  ;;  %v787_v3 = vld [vmem:[%s4452_s8 + $0xa0] sm:$0xff]  ;;  %v785_v4 = vld [vmem:[%s4452_s8 + $0x90] sm:$0xff]  ;;  %v4503_v5 = vpack.c.bf16 %v790_v61, %v786_v60 }
  0xa5   : > { %3198 = vmatpush1.bf16.msra.mxu1 %v3197_v25  ;;  %3168 = vmatprep.subr.bf16.mxu0 %v3167_v26  ;;  %v789_v6 = vld [vmem:[%s4452_s8 + $0xb0] sm:$0xff]  ;;  %v792_v7 = vld [vmem:[%s4452_s8 + $0xc8] sm:$0xff]  ;;  %v794_v10 = vld [vmem:[%s4452_s8 + $0xd8] sm:$0xff]  ;;  %v4513_v12 = vpack.c.bf16 %v787_v3, %v783_v2 }
  0xa6   : > { %3200 = vmatprep.subr.bf16.mxu1 %v3199_v30  ;;  %v796_v8 = vld [vmem:[%s4452_s8 + $0xe8] sm:$0xff]  ;;  %v372_v9 = vld [vmem:[#allocation7 + $0x10] sm:$0xff]  ;;  %v798_v11 = vld [vmem:[%s4452_s8 + $0xf8] sm:$0xff]  ;;  %v4517_v13 = vpack.c.bf16 %v789_v6, %v785_v4 }
  0xa7   : > { %v4519_v14 = vpack.c.bf16 %v796_v8, %v792_v7  ;;  %v791_v15 = vld [vmem:[%s4452_s8 + $0xc0] sm:$0xff]  ;;  %v793_v17 = vld [vmem:[%s4452_s8 + $0xd0] sm:$0xff]  ;;  %v4525_v18 = vpack.c.bf16 %v798_v11, %v794_v10  ;;  %v800_v20 = vld [vmem:[%s4452_s8 + $0x108] sm:$0xff] }
  0xa8   : > { %3170 = vmatpush1.bf16.msra.mxu0 %v3169_v36  ;;  %v795_v16 = vld [vmem:[%s4452_s8 + $0xe0] sm:$0xff]  ;;  %v797_v19 = vld [vmem:[%s4452_s8 + $0xf0] sm:$0xff]  ;;  %v804_v21 = vld [vmem:[%s4452_s8 + $0x128] sm:$0xff] }
  0xa9   : > { %3202 = vmatpush1.bf16.msra.mxu1 %v3201_v37  ;;  %3204 = vmatprep.subr.bf16.mxu0 %v4458_v38  ;;  %v373_v22 = vld [vmem:[#allocation7 + $0x18] sm:$0xff]  ;;  %v4535_v25 = vpack.c.bf16 %v795_v16, %v791_v15  ;;  %v4539_v26 = vpack.c.bf16 %v797_v19, %v793_v17  ;;  %v4541_v27 = vpack.c.bf16 %v804_v21, %v800_v20  ;;  %v799_v28 = vld [vmem:[%s4452_s8 + $0x100] sm:$0xff]  ;;  %v801_v30 = vld [vmem:[%s4452_s8 + $0x110] sm:$0xff] }
  0xaa   : > { %3236 = vmatprep.subr.bf16.mxu1 %v4462_v41  ;;  %v802_v23 = vld [vmem:[%s4452_s8 + $0x118] sm:$0xff]  ;;  %v803_v29 = vld [vmem:[%s4452_s8 + $0x120] sm:$0xff]  ;;  %v805_v32 = vld [vmem:[%s4452_s8 + $0x130] sm:$0xff] }
  0xab   : > { %529 = vmatmul.mubr.f32.vlgmr.msra.gmra.mrb[0].mxu0 %v370_v46  ;;  %v806_v24 = vld [vmem:[%s4452_s8 + $0x138] sm:$0xff]  ;;  %v808_v33 = vld [vmem:[%s4452_s8 + $0x148] sm:$0xff]  ;;  %v374_v35 = vld [vmem:[#allocation7 + $0x20] sm:$0xff]  ;;  %v4557_v39 = vpack.c.bf16 %v803_v29, %v799_v28  ;;  %v4561_v40 = vpack.c.bf16 %v805_v32, %v801_v30  ;;  %v444_v29 = vlaneseq }
  0xac   : > { %642 = vmatmul.mubr.f32.vlgmr.msra.gmra.mrb[0].mxu1 %v370_v46  ;;  %534 = vmatprep.mubr.f32.mxu0 %v4125_v0  ;;  %v4547_v31 = vpack.c.bf16 %v806_v24, %v802_v23  ;;  %v812_v34 = vld [vmem:[%s4452_s8 + $0x168] sm:$0xff]  ;;  %v810_v36 = vld [vmem:[%s4452_s8 + $0x158] sm:$0xff]  ;;  %v807_v43 = vld [vmem:[%s4452_s8 + $0x140] sm:$0xff] }
  0xad   : > { %647 = vmatprep.mubr.f32.mxu1 %v4125_v0  ;;  %3206 = vmatpush1.bf16.msra.mxu0 %v4471_v49  ;;  %v814_v37 = vld [vmem:[%s4452_s8 + $0x178] sm:$0xff]  ;;  %v4563_v42 = vpack.c.bf16 %v812_v34, %v808_v33  ;;  %v811_v44 = vld [vmem:[%s4452_s8 + $0x160] sm:$0xff]  ;;  %v809_v45 = vld [vmem:[%s4452_s8 + $0x150] sm:$0xff]  ;;  %v4670_v30 = vshrl.u32 %v444_v29, 7 }
  0xae   : > { %3238 = vmatpush1.bf16.msra.mxu1 %v4474_v50  ;;  %3208 = vmatprep.subr.bf16.mxu0 %v4476_v51  ;;  %v4569_v46 = vpack.c.bf16 %v814_v37, %v810_v36  ;;  %v813_v47 = vld [vmem:[%s4452_s8 + $0x170] sm:$0xff]  ;;  %v816_v48 = vld [vmem:[%s4452_s8 + $0x188] sm:$0xff]  ;;  %v818_v54 = vld [vmem:[%s4452_s8 + $0x198] sm:$0xff]  ;;  %v4579_v57 = vpack.c.bf16 %v811_v44, %v807_v43 }
  0xaf   : > { %535 = vmatmul.mubr.f32.gmra.mrb[2].mxu0 %v371_v59  ;;  %3240 = vmatprep.subr.bf16.mxu1 %v4481_v55  ;;  %v820_v52 = vld [vmem:[%s4452_s8 + $0x1a8] sm:$0xff]  ;;  %v822_v56 = vld [vmem:[%s4452_s8 + $0x1b8] sm:$0xff]  ;;  %v4583_v58 = vpack.c.bf16 %v813_v47, %v809_v45  ;;  %v815_v60 = vld [vmem:[%s4452_s8 + $0x180] sm:$0xff]  ;;  %v446_v32 = vsub.s32 0, %v4670_v30  ;;  %v454_v34 = vsub.s32 2, %v4670_v30  ;;  %vm724_vm0 = vcmp.eq.s32.totalorder %v4670_v30, 0 }
  0xb0   : > { %648 = vmatmul.mubr.f32.gmra.mrb[2].mxu1 %v371_v59  ;;  %540 = vmatprep.mubr.f32.mxu0 %v4125_v0  ;;  %v375_v53 = vld [vmem:[#allocation7 + $0x28] sm:$0xff]  ;;  %v4585_v59 = vpack.c.bf16 %v820_v52, %v816_v48  ;;  %v819_v61 = vld [vmem:[%s4452_s8 + $0x1a0] sm:$0xff]  ;;  %v817_v2 = vld [vmem:[%s4452_s8 + $0x190] sm:$0xff]  ;;  %v4591_v3 = vpack.c.bf16 %v822_v56, %v818_v54  ;;  %vm728_vm1 = vcmp.eq.s32.totalorder %v4670_v30, 1  ;;  %vm732_vm2 = vcmp.eq.s32.totalorder %v4670_v30, 2 }
  0xb1   : > { %653 = vmatprep.mubr.f32.mxu1 %v4125_v0  ;;  %3210 = vmatpush1.bf16.msra.mxu0 %v4491_v62  ;;  %v821_v4 = vld [vmem:[%s4452_s8 + $0x1b0] sm:$0xff]  ;;  %v824_v6 = vld [vmem:[%s4452_s8 + $0x1c8] sm:$0xff]  ;;  %v830_v10 = vld [vmem:[%s4452_s8 + $0x1f8] sm:$0xff]  ;;  %v4601_v11 = vpack.c.bf16 %v819_v61, %v815_v60  ;;  %vm736_vm3 = vcmp.eq.s32.totalorder %v4670_v30, 3  ;;  %vm740_vm4 = vcmp.eq.s32.totalorder %v4670_v30, 4  ;;  %vm744_vm5 = vcmp.eq.s32.totalorder %v4670_v30, 5 }
  0xb2   : > { %3242 = vmatpush1.bf16.msra.mxu1 %v4495_v63  ;;  %3212 = vmatprep.subr.bf16.mxu0 %v4497_v1  ;;  %v828_v7 = vld [vmem:[%s4452_s8 + $0x1e8] sm:$0xff]  ;;  %v376_v8 = vld [vmem:[#allocation7 + $0x30] sm:$0xff]  ;;  %v4605_v15 = vpack.c.bf16 %v821_v4, %v817_v2  ;;  %v823_v17 = vld [vmem:[%s4452_s8 + $0x1c0] sm:$0xff]  ;;  %vm748_vm6 = vcmp.eq.s32.totalorder %v4670_v30, 6  ;;  %vm752_vm7 = vcmp.eq.s32.totalorder %v4670_v30, 7 }
  0xb3   : > { %541 = vmatmul.mubr.f32.gmra.mrb[4].mxu0 %v372_v9  ;;  %3244 = vmatprep.subr.bf16.mxu1 %v4503_v5  ;;  %v4607_v16 = vpack.c.bf16 %v828_v7, %v824_v6  ;;  %v827_v19 = vld [vmem:[%s4452_s8 + $0x1e0] sm:$0xff]  ;;  %v825_v21 = vld [vmem:[%s4452_s8 + $0x1d0] sm:$0xff]  ;;  %v377_v23 = vld [vmem:[#allocation7 + $0x38] sm:$0xff] }
  0xb4   : > { %654 = vmatmul.mubr.f32.gmra.mrb[4].mxu1 %v372_v9  ;;  %546 = vmatprep.mubr.f32.mxu0 %v4125_v0  ;;  %v826_v9 = vld [vmem:[%s4452_s8 + $0x1d8] sm:$0xff]  ;;  %v4619_v24 = vpack.c.bf16 %v827_v19, %v823_v17 }
  0xb5   : > { %659 = vmatprep.mubr.f32.mxu1 %v4125_v0  ;;  %3214 = vmatpush1.bf16.msra.mxu0 %v4513_v12  ;;  %v4612_v20 = vpack.c.bf16 %v830_v10, %v826_v9  ;;  %v442_v33 = vld [vmem:[%s353_s11] sm:$0xf]  ;;  %s4776_s11 = ssub.s32 1, %s4107_s6 }
  0xb6   : > { %3246 = vmatpush1.bf16.msra.mxu1 %v4517_v13  ;;  %3216 = vmatprep.subr.bf16.mxu0 %v4519_v14  ;;  %v4681_v36 = vrot.slane %v442_v33, %v454_v34  ;;  %s4779_s25 = sadd.s32 %s1014_s19, %s4776_s11  ;;  %s1531_s14 = smul.u32 3, %s4776_s11 }
  0xb7   : > { %547 = vmatmul.mubr.f32.gmra.mrb[6].mxu0 %v373_v22  ;;  %3248 = vmatprep.subr.bf16.mxu1 %v4525_v18 }
  0xb8   : > { %660 = vmatmul.mubr.f32.gmra.mrb[6].mxu1 %v373_v22  ;;  %552 = vmatprep.mubr.f32.mxu0 %v4125_v0  ;;  %v829_v22 = vld [vmem:[%s4452_s8 + $0x1f0] sm:$0xff] }
  0xb9   : > { %665 = vmatprep.mubr.f32.mxu1 %v4125_v0  ;;  %3218 = vmatpush1.bf16.msra.mxu0 %v4535_v25  ;;  %v4623_v28 = vpack.c.bf16 %v829_v22, %v825_v21 }
  0xba   : > { %3250 = vmatpush1.bf16.msra.mxu1 %v4539_v26  ;;  %3220 = vmatprep.subr.bf16.mxu0 %v4541_v27 }
  0xbb   : > { %553 = vmatmul.mubr.f32.gmra.mrb[8].mxu0 %v374_v35  ;;  %3252 = vmatprep.subr.bf16.mxu1 %v4547_v31 }
  0xbc   : > { %666 = vmatmul.mubr.f32.gmra.mrb[8].mxu1 %v374_v35  ;;  %558 = vmatprep.mubr.f32.mxu0 %v4125_v0  ;;  %v450_v35 = vsub.s32 1, %v4670_v30 }
  0xbd   : > { %671 = vmatprep.mubr.f32.mxu1 %v4125_v0  ;;  %3222 = vmatpush1.bf16.msra.mxu0 %v4557_v39 }
  0xbe   : > { %3254 = vmatpush1.bf16.msra.mxu1 %v4561_v40  ;;  %3224 = vmatprep.subr.bf16.mxu0 %v4563_v42  ;;  %v4683_v37 = vrot.slane %v442_v33, %v450_v35 }
  0xbf   : > { %559 = vmatmul.mubr.f32.gmra.mrb[10].mxu0 %v375_v53  ;;  %3256 = vmatprep.subr.bf16.mxu1 %v4569_v46 }
  0xc0   : > { %672 = vmatmul.mubr.f32.gmra.mrb[10].mxu1 %v375_v53  ;;  %564 = vmatprep.mubr.f32.mxu0 %v4125_v0 }
  0xc1   : > { %677 = vmatprep.mubr.f32.mxu1 %v4125_v0  ;;  %3226 = vmatpush1.bf16.msra.mxu0 %v4579_v57 }
  0xc2   : > { %3258 = vmatpush1.bf16.msra.mxu1 %v4583_v58  ;;  %3228 = vmatprep.subr.bf16.mxu0 %v4585_v59 }
  0xc3   : > { %565 = vmatmul.mubr.f32.gmra.mrb[12].mxu0 %v376_v8  ;;  %3260 = vmatprep.subr.bf16.mxu1 %v4591_v3 }
  0xc4   : > { %678 = vmatmul.mubr.f32.gmra.mrb[12].mxu1 %v376_v8  ;;  %570 = vmatprep.mubr.f32.mxu0 %v4125_v0 }
  0xc5   : > { %683 = vmatprep.mubr.f32.mxu1 %v4125_v0  ;;  %3230 = vmatpush1.bf16.msra.mxu0 %v4601_v11 }
  0xc6   : > { %3262 = vmatpush1.bf16.msra.mxu1 %v4605_v15  ;;  %3232 = vmatprep.subr.bf16.mxu0 %v4607_v16 }
  0xc7   : > { %571 = vmatmul.mubr.f32.gmra.mrb[14].mxu0 %v377_v23  ;;  %3264 = vmatprep.subr.bf16.mxu1 %v4612_v20 }
  0xc8   : > { %684 = vmatmul.mubr.f32.gmra.mrb[14].mxu1 %v377_v23  ;;  %895 = vmatprep.mubr.f32.mxu0 %v4125_v0 }
  0xc9   : > { %3234 = vmatpush1.bf16.msra.mxu0 %v4619_v24  ;;  %966 = vmatprep.mubr.f32.mxu1 %v4125_v0 }
  0xca   : > { %3266 = vmatpush1.bf16.msra.mxu1 %v4623_v28  ;;  %3268 = vmatprep.subr.bf16.mxu0 %v4458_v38 }
  0xcb   : > { %3300 = vmatprep.subr.bf16.mxu1 %v4462_v41 }
  0xcc   : > { %896 = vmatmul.mubr.f32.vlgmr.msra.gmra.mrb[16].mxu0 %v4125_v0 }
  0xcd   : > { %967 = vmatmul.mubr.f32.vlgmr.msra.gmra.mrb[16].mxu1 %v4125_v0  ;;  %3270 = vmatpush1.bf16.msra.mxu0 %v4471_v49 }
  0xce   : > { %3302 = vmatpush1.bf16.msra.mxu1 %v4474_v50  ;;  %3272 = vmatprep.subr.bf16.mxu0 %v4476_v51 }
  0xcf   : > { %3304 = vmatprep.subr.bf16.mxu1 %v4481_v55  ;;  %1154 = vmatprep.mubr.f32.mxu0 %v4125_v0 }
  0xd0   : > { %1225 = vmatprep.mubr.f32.mxu1 %v4125_v0 }
  0xd1   : > { %3274 = vmatpush1.bf16.msra.mxu0 %v4491_v62 }
  0xd2   : > { %3306 = vmatpush1.bf16.msra.mxu1 %v4495_v63  ;;  %3276 = vmatprep.subr.bf16.mxu0 %v4497_v1 }
  0xd3   : > { %3308 = vmatprep.subr.bf16.mxu1 %v4503_v5 }
  0xd5   : > { %3278 = vmatpush1.bf16.msra.mxu0 %v4513_v12 }
  0xd6   : > { %3310 = vmatpush1.bf16.msra.mxu1 %v4517_v13  ;;  %3280 = vmatprep.subr.bf16.mxu0 %v4519_v14 }
  0xd7   : > { %3312 = vmatprep.subr.bf16.mxu1 %v4525_v18 }
  0xd9   : > { %3282 = vmatpush1.bf16.msra.mxu0 %v4535_v25 }
  0xda   : > { %3314 = vmatpush1.bf16.msra.mxu1 %v4539_v26  ;;  %3284 = vmatprep.subr.bf16.mxu0 %v4541_v27 }
  0xdb   : > { %3316 = vmatprep.subr.bf16.mxu1 %v4547_v31 }
  0xdd   : > { %3286 = vmatpush1.bf16.msra.mxu0 %v4557_v39 }
  0xde   : > { %3318 = vmatpush1.bf16.msra.mxu1 %v4561_v40  ;;  %3288 = vmatprep.subr.bf16.mxu0 %v4563_v42 }
  0xdf   : > { %3320 = vmatprep.subr.bf16.mxu1 %v4569_v46 }
  0xe1   : > { %3290 = vmatpush1.bf16.msra.mxu0 %v4579_v57 }
  0xe2   : > { %3322 = vmatpush1.bf16.msra.mxu1 %v4583_v58  ;;  %3292 = vmatprep.subr.bf16.mxu0 %v4585_v59 }
  0xe3   : > { %3324 = vmatprep.subr.bf16.mxu1 %v4591_v3 }
  0xe5   : > { %3294 = vmatpush1.bf16.msra.mxu0 %v4601_v11 }
  0xe6   : > { %3326 = vmatpush1.bf16.msra.mxu1 %v4605_v15  ;;  %3296 = vmatprep.subr.bf16.mxu0 %v4607_v16 }
  0xe7   : > { %3328 = vmatprep.subr.bf16.mxu1 %v4612_v20 }
  0xe9   : > { %3298 = vmatpush1.bf16.msra.mxu0 %v4619_v24 }
  0xea   : > { %3330 = vmatpush1.bf16.msra.mxu1 %v4623_v28  ;;  %3332 = vmatprep.subr.bf16.mxu0 %v4458_v38  ;;  %v458_v38 = vsub.s32 3, %v4670_v30 }
  0xeb   : > { %3364 = vmatprep.subr.bf16.mxu1 %v4462_v41  ;;  %v4679_v41 = vrot.slane %v442_v33, %v446_v32 }
  0xec   : > { %v4685_v43 = vrot.slane %v442_v33, %v458_v38 }
 0x17e   : > { %v530_v44 = vpop.f32.mrb[0].mxu0 }
 0x17f   : > { %v531_v45 = vadd.f32 %v530_v44, %v4679_v41  ;;  %v643_v47 = vpop.f32.mrb[0].mxu1  ;;  %v532_v48 = vpop.f32.mrb[1].mxu0 }
 0x180   : > { %v644_v52 = vadd.f32 %v643_v47, %v4681_v36  ;;  %v533_v53 = vadd.f32 %v532_v48, %v4683_v37  ;;  %v645_v54 = vpop.f32.mrb[1].mxu1 }
 0x181   : > { %690 = vst [vmem:[#allocation2] sm:$0xff] %v531_v45  ;;  %v646_v56 = vadd.f32 %v645_v54, %v4685_v43 }
 0x182   : > { %692 = vst [vmem:[#allocation2 + $0x10] sm:$0xff] %v644_v52  ;;  %691 = vst [vmem:[#allocation2 + $0x8] sm:$0xff] %v533_v53  ;;  %v536_v60 = vpop.f32.mrb[2].mxu0 }
 0x183   : > { %693 = vst [vmem:[#allocation2 + $0x18] sm:$0xff] %v646_v56  ;;  %v537_v61 = vadd.f32 %v536_v60, %v4679_v41  ;;  %v649_v2 = vpop.f32.mrb[2].mxu1  ;;  %v538_v4 = vpop.f32.mrb[3].mxu0 }
 0x184   : > { %v650_v6 = vadd.f32 %v649_v2, %v4681_v36  ;;  %v539_v7 = vadd.f32 %v538_v4, %v4683_v37  ;;  %v651_v8 = vpop.f32.mrb[3].mxu1 }
 0x185   : > { %694 = vst [vmem:[#allocation2 + $0x20] sm:$0xff] %v537_v61  ;;  %v652_v9 = vadd.f32 %v651_v8, %v4685_v43 }
 0x186   : > { %696 = vst [vmem:[#allocation2 + $0x30] sm:$0xff] %v650_v6  ;;  %695 = vst [vmem:[#allocation2 + $0x28] sm:$0xff] %v539_v7  ;;  %v542_v10 = vpop.f32.mrb[4].mxu0 }
 0x187   : > { %697 = vst [vmem:[#allocation2 + $0x38] sm:$0xff] %v652_v9  ;;  %v543_v17 = vadd.f32 %v542_v10, %v4679_v41  ;;  %v655_v19 = vpop.f32.mrb[4].mxu1  ;;  %v544_v21 = vpop.f32.mrb[5].mxu0 }
 0x188   : > { %v656_v22 = vadd.f32 %v655_v19, %v4681_v36  ;;  %v545_v23 = vadd.f32 %v544_v21, %v4683_v37  ;;  %v657_v29 = vpop.f32.mrb[5].mxu1 }
 0x189   : > { %698 = vst [vmem:[#allocation2 + $0x40] sm:$0xff] %v543_v17  ;;  %v658_v32 = vadd.f32 %v657_v29, %v4685_v43 }
 0x18a   : > { %700 = vst [vmem:[#allocation2 + $0x50] sm:$0xff] %v656_v22  ;;  %699 = vst [vmem:[#allocation2 + $0x48] sm:$0xff] %v545_v23  ;;  %v548_v33 = vpop.f32.mrb[6].mxu0 }
 0x18b   : > { %701 = vst [vmem:[#allocation2 + $0x58] sm:$0xff] %v658_v32  ;;  %v549_v34 = vadd.f32 %v548_v33, %v4679_v41  ;;  %v661_v35 = vpop.f32.mrb[6].mxu1  ;;  %v550_v38 = vpop.f32.mrb[7].mxu0 }
 0x18c   : > { %v662_v44 = vadd.f32 %v661_v35, %v4681_v36  ;;  %v551_v45 = vadd.f32 %v550_v38, %v4683_v37  ;;  %v663_v47 = vpop.f32.mrb[7].mxu1 }
 0x18d   : > { %702 = vst [vmem:[#allocation2 + $0x60] sm:$0xff] %v549_v34  ;;  %v664_v48 = vadd.f32 %v663_v47, %v4685_v43 }
 0x18e   : > { %704 = vst [vmem:[#allocation2 + $0x70] sm:$0xff] %v662_v44  ;;  %703 = vst [vmem:[#allocation2 + $0x68] sm:$0xff] %v551_v45  ;;  %v554_v52 = vpop.f32.mrb[8].mxu0 }
 0x18f   : > { %705 = vst [vmem:[#allocation2 + $0x78] sm:$0xff] %v664_v48  ;;  %v555_v53 = vadd.f32 %v554_v52, %v4679_v41  ;;  %v667_v54 = vpop.f32.mrb[8].mxu1  ;;  %v556_v56 = vpop.f32.mrb[9].mxu0 }
 0x190   : > { %v668_v60 = vadd.f32 %v667_v54, %v4681_v36  ;;  %v557_v61 = vadd.f32 %v556_v56, %v4683_v37  ;;  %v669_v2 = vpop.f32.mrb[9].mxu1 }
 0x191   : > { %706 = vst [vmem:[#allocation2 + $0x80] sm:$0xff] %v555_v53  ;;  %v670_v4 = vadd.f32 %v669_v2, %v4685_v43 }
 0x192   : > { %708 = vst [vmem:[#allocation2 + $0x90] sm:$0xff] %v668_v60  ;;  %707 = vst [vmem:[#allocation2 + $0x88] sm:$0xff] %v557_v61  ;;  %v560_v6 = vpop.f32.mrb[10].mxu0 }
 0x193   : > { %709 = vst [vmem:[#allocation2 + $0x98] sm:$0xff] %v670_v4  ;;  %v561_v7 = vadd.f32 %v560_v6, %v4679_v41  ;;  %v673_v8 = vpop.f32.mrb[10].mxu1  ;;  %v562_v9 = vpop.f32.mrb[11].mxu0 }
 0x194   : > { %v674_v10 = vadd.f32 %v673_v8, %v4681_v36  ;;  %v563_v17 = vadd.f32 %v562_v9, %v4683_v37  ;;  %v675_v19 = vpop.f32.mrb[11].mxu1 }
 0x195   : > { %710 = vst [vmem:[#allocation2 + $0xa0] sm:$0xff] %v561_v7  ;;  %v676_v21 = vadd.f32 %v675_v19, %v4685_v43 }
 0x196   : > { %712 = vst [vmem:[#allocation2 + $0xb0] sm:$0xff] %v674_v10  ;;  %711 = vst [vmem:[#allocation2 + $0xa8] sm:$0xff] %v563_v17  ;;  %v566_v22 = vpop.f32.mrb[12].mxu0  ;;  %v730_v17 = vstv %s3064_s10 }
 0x197   : > { %713 = vst [vmem:[#allocation2 + $0xb8] sm:$0xff] %v676_v21  ;;  %v567_v23 = vadd.f32 %v566_v22, %v4679_v41  ;;  %v679_v29 = vpop.f32.mrb[12].mxu1  ;;  %v568_v32 = vpop.f32.mrb[13].mxu0  ;;  %v734_v22 = vstv %s3065_s20 }
 0x198   : > { %v680_v33 = vadd.f32 %v679_v29, %v4681_v36  ;;  %v569_v34 = vadd.f32 %v568_v32, %v4683_v37  ;;  %v681_v35 = vpop.f32.mrb[13].mxu1 }
 0x199   : > { %714 = vst [vmem:[#allocation2 + $0xc0] sm:$0xff] %v567_v23  ;;  %v682_v38 = vadd.f32 %v681_v35, %v4685_v43 }
 0x19a   : > { %716 = vst [vmem:[#allocation2 + $0xd0] sm:$0xff] %v680_v33  ;;  %715 = vst [vmem:[#allocation2 + $0xc8] sm:$0xff] %v569_v34  ;;  %v572_v44 = vpop.f32.mrb[14].mxu0  ;;  %v738_v33 = vstv %s3066_s7  ;;  %s1273_s7 = smul.u32 5, %s4107_s6 }
 0x19b   : > { %717 = vst [vmem:[#allocation2 + $0xd8] sm:$0xff] %v682_v38  ;;  %v573_v45 = vadd.f32 %v572_v44, %v4679_v41  ;;  %v685_v47 = vpop.f32.mrb[14].mxu1  ;;  %v574_v48 = vpop.f32.mrb[15].mxu0 }
 0x19c   : > { %v686_v52 = vadd.f32 %v685_v47, %v4681_v36  ;;  %v575_v53 = vadd.f32 %v574_v48, %v4683_v37  ;;  %v687_v54 = vpop.f32.mrb[15].mxu1  ;;  %v742_v47 = vstv %s3067_s12  ;;  %s3083_s12 = sshll.u32 %s4776_s11, 1 }
 0x19d   : > { %718 = vst [vmem:[#allocation2 + $0xe0] sm:$0xff] %v573_v45  ;;  %v688_v56 = vadd.f32 %v687_v54, %v4685_v43  ;;  %v726_v43 = vstv %s725_s21  ;;  %s3130_s21 = sshll.u32 %s4779_s25, 5 }
 0x19e   : > { %720 = vst [vmem:[#allocation2 + $0xf0] sm:$0xff] %v686_v52  ;;  %719 = vst [vmem:[#allocation2 + $0xe8] sm:$0xff] %v575_v53  ;;  %v727_v10 = vsel %vm724_vm0, %v726_v43, 0  ;;  %v746_v53 = vstv %s3068_s26  ;;  %s1021_s10 = scalar_lea.vmem [#allocation2], %s3130_s21  ;;  %s4961_s26 = sadd.s32 %s3083_s12, %s1273_s7 }
 0x19f   : > { %721 = vst [vmem:[#allocation2 + $0xf8] sm:$0xff] %v688_v56  ;;  %v897_v60 = vpop.f32.mrb[16].mxu0  ;;  %v731_v21 = vsel %vm728_vm1, %v730_v17, %v727_v10  ;;  %v750_v56 = vstv %s3069_s27  ;;  %s3131_s27 = sshll.u32 %s4961_s26, 5  ;;  %s3097_s7 = sshll.u32 %s4776_s11, 2 }
 0x1a0   : > { %v899_v61 = vpop.f32.mrb[17].mxu0  ;;  %v968_v2 = vpop.f32.mrb[16].mxu1  ;;  %v735_v32 = vsel %vm732_vm2, %v734_v22, %v731_v21 }
 0x1a1   : > { %v970_v4 = vpop.f32.mrb[17].mxu1  ;;  %v739_v38 = vsel %vm736_vm3, %v738_v33, %v735_v32  ;;  %v1545_v33 = vld [vmem:[%s4452_s8 + $0x8] sm:$0xff] }
 0x1a2   : > { %v743_v52 = vsel %vm740_vm4, %v742_v47, %v739_v38  ;;  %v1548_v47 = vld [vmem:[%s4452_s8 + $0x20] sm:$0xff] }
 0x1a3   : > { %v747_v54 = vsel %vm744_vm5, %v746_v53, %v743_v52  ;;  %v1546_v53 = vld [vmem:[%s4452_s8 + $0x10] sm:$0xff] }
 0x1a6   : > { %v763_v41 = vld [vmem:[%s762_s24] sm:$0xff]  ;;  %v764_v6 = vld [vmem:[%s762_s24 + $0x8] sm:$0xff]  ;;  %v766_v9 = vld [vmem:[%s762_s24 + $0x18] sm:$0xff] }
 0x1a7   : > { %v973_v36 = vadd.f32 %v897_v60, %v763_v41  ;;  %v974_v7 = vadd.f32 %v899_v61, %v764_v6  ;;  %v976_v19 = vadd.f32 %v970_v4, %v766_v9  ;;  %v765_v23 = vld [vmem:[%s762_s24 + $0x10] sm:$0xff]  ;;  %v751_v60 = vsel %vm748_vm6, %v750_v56, %v747_v54  ;;  %s3082_s24 = sshll.u32 %s4779_s25, 3  ;;  %v1550_v54 = vld [vmem:[%s4452_s8 + $0x30] sm:$0xff] }
 0x1a8   : > { %v975_v34 = vadd.f32 %v968_v2, %v765_v23  ;;  %v754_v61 = vstv %s3070_s23  ;;  %s1270_s20 = scalar_lea.vmem %s4736_s18, %s3082_s24 [#allocation13]  ;;  %v4812_v56 = vpack.c.bf16 %v1550_v54, %v1546_v53  ;;  %v1588_v54 = vld [vmem:[%s4452_s8 + $0x160] sm:$0xff]  ;;  %s1280_s23 = scalar_lea.vmem [#allocation2], %s3131_s27 }
 0x1a9   : > { %v3073_v37 = vmul.f32 -1.442695, %v973_v36  ;;  %v3074_v8 = vmul.f32 -1.442695, %v974_v7  ;;  %v3075_v29 = vmul.f32 -1.442695, %v976_v19  ;;  %v4729_v6 = vsel %vm752_vm7, %v754_v61, %v751_v60 }
 0x1aa   : > { %v1001_v36 = vstv %s756_s2  ;;  %v1553_v60 = vld [vmem:[%s4452_s8 + $0x48] sm:$0xff]  ;;  %s3089_s2 = sshll.u32 %s4961_s26, 3 }
 0x1ab   : > { %3801 = vpow2.f32 %v3073_v37  ;;  %vm1002_vm8 = vcmp.lt.s32.totalorder %v1001_v36, %v4729_v6  ;;  %v1557_v61 = vld [vmem:[%s4452_s8 + $0x68] sm:$0xff]  ;;  %v1552_v36 = vld [vmem:[%s4452_s8 + $0x40] sm:$0xff]  ;;  %s1529_s9 = scalar_lea.vmem %s4736_s18, %s3089_s2 [#allocation13] }
 0x1ac   : > { %3803 = vpow2.f32 %v3074_v8 }
 0x1ad   : > { %3805 = vpow2.f32 %v3075_v29 }
 0x1ae   : > { %3807 = vtanh.f32 %v975_v34  ;;  %v1549_v34 = vld [vmem:[%s4452_s8 + $0x28] sm:$0xff] }
 0x1af   : > { %v4800_v38 = vpack.c.bf16 %v1549_v34, %v1545_v33  ;;  %v1589_v33 = vld [vmem:[%s4452_s8 + $0x168] sm:$0xff] }
 0x1b5   : > { %v3802_v35 = vpop.eup %3801 }
 0x1b6   : > { %v3804_v44 = vpop.eup %3803  ;;  %v980_v45 = vadd.f32 1.0, %v3802_v35  ;;  %v1547_v35 = vld [vmem:[%s4452_s8 + $0x18] sm:$0xff] }
 0x1b7   : > { %v986_v48 = vadd.f32 1.0, %v3804_v44  ;;  %v3806_v2 = vpop.eup %3805  ;;  %v1551_v44 = vld [vmem:[%s4452_s8 + $0x38] sm:$0xff] }
 0x1b8   : > { %3809 = vrcp.f32 %v980_v45  ;;  %v3808_v4 = vpop.eup %3807  ;;  %v993_v8 = vadd.f32 1.0, %v3806_v2  ;;  %v1544_v45 = vld [vmem:[%s4452_s8] sm:$0xff]  ;;  %v1555_v2 = vld [vmem:[%s4452_s8 + $0x58] sm:$0xff] }
 0x1b9   : > { %3811 = vrcp.f32 %v986_v48  ;;  %v4805_v48 = vpack.c.bf16 %v1551_v44, %v1547_v35  ;;  %v4807_v52 = vpack.c.bf16 %v1548_v47, %v1544_v45  ;;  %v1587_v44 = vld [vmem:[%s4452_s8 + $0x158] sm:$0xff]  ;;  %v1584_v47 = vld [vmem:[%s4452_s8 + $0x140] sm:$0xff] }
 0x1ba   : > { %3813 = vrcp.f32 %v993_v8  ;;  %v1591_v45 = vld [vmem:[%s4452_s8 + $0x178] sm:$0xff] }
 0x1bb   : > { %v4902_v53 = vpack.c.bf16 %v1591_v45, %v1587_v44 }
 0x1c2   : > { %v3810_v41 = vpop.eup %3809 }
 0x1c3   : > { %v3812_v7 = vpop.eup %3811  ;;  %v997_v37 = vmul.f32 %v3810_v41, %v3808_v4  ;;  %v4820_v4 = vpack.c.bf16 %v1557_v61, %v1553_v60  ;;  %v1559_v41 = vld [vmem:[%s4452_s8 + $0x78] sm:$0xff]  ;;  %v1586_v60 = vld [vmem:[%s4452_s8 + $0x150] sm:$0xff] }
 0x1c4   : > { %v996_v43 = vmul.f32 0.0, %v3812_v7  ;;  %v3814_v30 = vpop.eup %3813  ;;  %v1556_v7 = vld [vmem:[%s4452_s8 + $0x60] sm:$0xff]  ;;  %v1590_v61 = vld [vmem:[%s4452_s8 + $0x170] sm:$0xff] }
 0x1c5   : > { %v4827_v8 = vpack.c.bf16 %v1556_v7, %v1552_v36  ;;  %v1597_v36 = vld [vmem:[%s4452_s8 + $0x1a8] sm:$0xff]  ;;  %v1595_v7 = vld [vmem:[%s4452_s8 + $0x198] sm:$0xff] }
 0x1c6   : > { %v998_v9 = vadd.f32 %v997_v37, %v996_v43  ;;  %v4825_v37 = vpack.c.bf16 %v1559_v41, %v1555_v2  ;;  %v1554_v43 = vld [vmem:[%s4452_s8 + $0x50] sm:$0xff]  ;;  %v4908_v2 = vpack.c.bf16 %v1588_v54, %v1584_v47  ;;  %v1593_v41 = vld [vmem:[%s4452_s8 + $0x188] sm:$0xff] }
 0x1c8   : > { %3815 = vtanh.f32 %v998_v9  ;;  %v4732_v10 = vsel %vm1002_vm8, %v998_v9, 0.0  ;;  %v1558_v9 = vld [vmem:[%s4452_s8 + $0x70] sm:$0xff] }
 0x1d2   : > { %v3816_v17 = vpop.eup %3815 }
 0x1d3   : > { %v1000_v19 = vmul.f32 %v3816_v17, %v3814_v30  ;;  %v1561_v30 = vld [vmem:[%s4452_s8 + $0x88] sm:$0xff] }
 0x1d4   : > { %v1565_v17 = vld [vmem:[%s4452_s8 + $0xa8] sm:$0xff] }
 0x1d5   : > { %3137 = vmatmul.mubr.msk.f32.vlgmr.msra.gmra.mrb[18].mxu0 %vm1002_vm8, %v1000_v19  ;;  %3138 = vmatmul.mubr.msk.f32.vlgmr.msra.gmra.mrb[18].mxu1 %vm1002_vm8, %v1000_v19  ;;  %v4739_v21 = vsel %vm1002_vm8, %v1000_v19, 0.0  ;;  %v1563_v19 = vld [vmem:[%s4452_s8 + $0x98] sm:$0xff] }
 0x1d6   : > { %3334 = vmatpush1.bf16.msra.mxu0 %v4471_v49  ;;  %3366 = vmatpush1.bf16.msra.mxu1 %v4474_v50  ;;  %1012 = vst [vmem:[%s1011_s13] sm:$0xff] %v4739_v21  ;;  %v1022_v49 = vld [vmem:[%s1021_s10] sm:$0xff]  ;;  %s3090_s13 = sshll.u32 %s4107_s6, 2 }
 0x1d7   : > { %3336 = vmatprep.subr.bf16.mxu0 %v4476_v51  ;;  %3368 = vmatprep.subr.bf16.mxu1 %v4481_v55  ;;  %s5013_s19 = sadd.s32 %s3090_s13, %s1531_s14 }
 0x1d8   : > { %1413 = vmatprep.mubr.f32.mxu0 %v4125_v0  ;;  %1484 = vmatprep.mubr.f32.mxu1 %v4125_v0 }
 0x1da   : > { %3338 = vmatpush1.bf16.msra.mxu0 %v4491_v62  ;;  %3370 = vmatpush1.bf16.msra.mxu1 %v4495_v63  ;;  %v1023_v62 = vld [vmem:[%s1021_s10 + $0x8] sm:$0xff] }
 0x1db   : > { %3340 = vmatprep.subr.bf16.mxu0 %v4497_v1  ;;  %3372 = vmatprep.subr.bf16.mxu1 %v4503_v5 }
 0x1de   : > { %3342 = vmatpush1.bf16.msra.mxu0 %v4513_v12  ;;  %3374 = vmatpush1.bf16.msra.mxu1 %v4517_v13 }
 0x1df   : > { %3344 = vmatprep.subr.bf16.mxu0 %v4519_v14  ;;  %3376 = vmatprep.subr.bf16.mxu1 %v4525_v18  ;;  %v1025_v14 = vld [vmem:[%s1021_s10 + $0x18] sm:$0xff] }
 0x1e2   : > { %3346 = vmatpush1.bf16.msra.mxu0 %v4535_v25  ;;  %3378 = vmatpush1.bf16.msra.mxu1 %v4539_v26  ;;  %v1024_v25 = vld [vmem:[%s1021_s10 + $0x10] sm:$0xff]  ;;  %s3096_s10 = sshll.u32 %s5013_s19, 3 }
 0x1e3   : > { %3348 = vmatprep.subr.bf16.mxu0 %v4541_v27  ;;  %3380 = vmatprep.subr.bf16.mxu1 %v4547_v31  ;;  %s1788_s24 = scalar_lea.vmem %s4736_s18, %s3096_s10 [#allocation13]  ;;  %s2308_s10 = smul.u32 6, %s4776_s11 }
 0x1e6   : > { %3350 = vmatpush1.bf16.msra.mxu0 %v4557_v39  ;;  %3382 = vmatpush1.bf16.msra.mxu1 %v4561_v40 }
 0x1e7   : > { %3352 = vmatprep.subr.bf16.mxu0 %v4563_v42  ;;  %3384 = vmatprep.subr.bf16.mxu1 %v4569_v46 }
 0x1ea   : > { %3354 = vmatpush1.bf16.msra.mxu0 %v4579_v57  ;;  %3386 = vmatpush1.bf16.msra.mxu1 %v4583_v58 }
 0x1eb   : > { %3356 = vmatprep.subr.bf16.mxu0 %v4585_v59  ;;  %3388 = vmatprep.subr.bf16.mxu1 %v4591_v3  ;;  %v1260_v59 = vstv %s4779_s25  ;;  %s3132_s25 = sshll.u32 %s5013_s19, 5 }
 0x1ec   : > { %vm1261_vm9 = vcmp.lt.s32.totalorder %v1260_v59, %v4729_v6  ;;  %v1579_v59 = vld [vmem:[%s4452_s8 + $0x118] sm:$0xff]  ;;  %s1539_s21 = scalar_lea.vmem [#allocation2], %s3132_s25 }
 0x1ee   : > { %3358 = vmatpush1.bf16.msra.mxu0 %v4601_v11  ;;  %3390 = vmatpush1.bf16.msra.mxu1 %v4605_v15 }
 0x1ef   : > { %3360 = vmatprep.subr.bf16.mxu0 %v4607_v16  ;;  %3392 = vmatprep.subr.bf16.mxu1 %v4612_v20 }
 0x1f2   : > { %3362 = vmatpush1.bf16.msra.mxu0 %v4619_v24  ;;  %3394 = vmatpush1.bf16.msra.mxu1 %v4623_v28 }
 0x1f3   : > { %3396 = vmatprep.subr.bf16.mxu0 %v4800_v38  ;;  %3428 = vmatprep.subr.bf16.mxu1 %v4805_v48 }
 0x2a8   : > { %v1156_v50 = vpop.f32.mrb[18].mxu0  ;;  %v1227_v51 = vpop.f32.mrb[18].mxu1 }
 0x2a9   : > { %v1232_v55 = vadd.f32 %v1156_v50, %v1022_v49  ;;  %v1158_v63 = vpop.f32.mrb[19].mxu0  ;;  %v1229_v1 = vpop.f32.mrb[19].mxu1  ;;  %v1234_v27 = vadd.f32 %v1227_v51, %v1024_v25  ;;  %v1567_v49 = vld [vmem:[%s4452_s8 + $0xb8] sm:$0xff]  ;;  %v1560_v50 = vld [vmem:[%s4452_s8 + $0x80] sm:$0xff] }
 0x2aa   : > { %v1233_v5 = vadd.f32 %v1158_v63, %v1023_v62  ;;  %v1235_v18 = vadd.f32 %v1229_v1, %v1025_v14  ;;  %v1564_v51 = vld [vmem:[%s4452_s8 + $0xa0] sm:$0xff]  ;;  %v1562_v63 = vld [vmem:[%s4452_s8 + $0x90] sm:$0xff]  ;;  %v1571_v14 = vld [vmem:[%s4452_s8 + $0xd8] sm:$0xff] }
 0x2ab   : > { %v3079_v12 = vmul.f32 -1.442695, %v1232_v55  ;;  %v4845_v55 = vpack.c.bf16 %v1567_v49, %v1563_v19  ;;  %v4847_v62 = vpack.c.bf16 %v1564_v51, %v1560_v50  ;;  %v1566_v1 = vld [vmem:[%s4452_s8 + $0xb0] sm:$0xff]  ;;  %v1575_v25 = vld [vmem:[%s4452_s8 + $0xf8] sm:$0xff]  ;;  %v1596_v19 = vld [vmem:[%s4452_s8 + $0x1a0] sm:$0xff] }
 0x2ac   : > { %v3080_v13 = vmul.f32 -1.442695, %v1233_v5  ;;  %v3081_v26 = vmul.f32 -1.442695, %v1235_v18  ;;  %v4852_v5 = vpack.c.bf16 %v1566_v1, %v1562_v63  ;;  %v1594_v50 = vld [vmem:[%s4452_s8 + $0x190] sm:$0xff]  ;;  %v1601_v63 = vld [vmem:[%s4452_s8 + $0x1c8] sm:$0xff] }
 0x2ad   : > { %3817 = vpow2.f32 %v3079_v12  ;;  %v1569_v12 = vld [vmem:[%s4452_s8 + $0xc8] sm:$0xff]  ;;  %v1598_v51 = vld [vmem:[%s4452_s8 + $0x1b0] sm:$0xff] }
 0x2ae   : > { %3819 = vpow2.f32 %v3080_v13  ;;  %v1573_v13 = vld [vmem:[%s4452_s8 + $0xe8] sm:$0xff] }
 0x2af   : > { %3821 = vpow2.f32 %v3081_v26  ;;  %v4860_v18 = vpack.c.bf16 %v1573_v13, %v1569_v12  ;;  %v1568_v26 = vld [vmem:[%s4452_s8 + $0xc0] sm:$0xff]  ;;  %v1605_v1 = vld [vmem:[%s4452_s8 + $0x1e8] sm:$0xff]  ;;  %v1603_v12 = vld [vmem:[%s4452_s8 + $0x1d8] sm:$0xff] }
 0x2b0   : > { %3823 = vtanh.f32 %v1234_v27  ;;  %v1572_v27 = vld [vmem:[%s4452_s8 + $0xe0] sm:$0xff]  ;;  %v1607_v13 = vld [vmem:[%s4452_s8 + $0x1f8] sm:$0xff] }
 0x2b7   : > { %v3818_v31 = vpop.eup %3817 }
 0x2b8   : > { %v3820_v39 = vpop.eup %3819  ;;  %v1239_v40 = vadd.f32 1.0, %v3818_v31  ;;  %v4865_v31 = vpack.c.bf16 %v1575_v25, %v1571_v14  ;;  %v4936_v25 = vpack.c.bf16 %v1598_v51, %v1594_v50 }
 0x2b9   : > { %v1245_v42 = vadd.f32 1.0, %v3820_v39  ;;  %v3822_v46 = vpop.eup %3821  ;;  %v4867_v39 = vpack.c.bf16 %v1572_v27, %v1568_v26  ;;  %v4938_v26 = vpack.c.bf16 %v1605_v1, %v1601_v63  ;;  %v1600_v27 = vld [vmem:[%s4452_s8 + $0x1c0] sm:$0xff] }
 0x2ba   : > { %3825 = vrcp.f32 %v1239_v40  ;;  %v3824_v57 = vpop.eup %3823  ;;  %v1252_v15 = vadd.f32 1.0, %v3822_v46  ;;  %v1570_v40 = vld [vmem:[%s4452_s8 + $0xd0] sm:$0xff]  ;;  %v1577_v46 = vld [vmem:[%s4452_s8 + $0x108] sm:$0xff] }
 0x2bb   : > { %3827 = vrcp.f32 %v1245_v42  ;;  %v1574_v42 = vld [vmem:[%s4452_s8 + $0xf0] sm:$0xff] }
 0x2bc   : > { %3829 = vrcp.f32 %v1252_v15 }
 0x2c4   : > { %v3826_v58 = vpop.eup %3825 }
 0x2c5   : > { %v3828_v3 = vpop.eup %3827  ;;  %v1256_v11 = vmul.f32 %v3826_v58, %v3824_v57  ;;  %v4873_v57 = vpack.c.bf16 %v1574_v42, %v1570_v40  ;;  %v1581_v58 = vld [vmem:[%s4452_s8 + $0x128] sm:$0xff]  ;;  %v1604_v40 = vld [vmem:[%s4452_s8 + $0x1e0] sm:$0xff]  ;;  %v4943_v42 = vpack.c.bf16 %v1607_v13, %v1603_v12  ;;  %v1519_v12 = vstv %s4961_s26 }
 0x2c6   : > { %v1255_v16 = vmul.f32 %v3828_v3, %v4732_v10  ;;  %v3830_v28 = vpop.eup %3829  ;;  %v1583_v3 = vld [vmem:[%s4452_s8 + $0x138] sm:$0xff]  ;;  %vm1520_vm10 = vcmp.lt.s32.totalorder %v1519_v12, %v4729_v6 }
 0x2c7   : > { %v4882_v15 = vpack.c.bf16 %v1583_v3, %v1579_v59  ;;  %v4948_v59 = vpack.c.bf16 %v1604_v40, %v1600_v27 }
 0x2c8   : > { %v1257_v20 = vadd.f32 %v1256_v11, %v1255_v16  ;;  %v4880_v11 = vpack.c.bf16 %v1581_v58, %v1577_v46  ;;  %v1576_v16 = vld [vmem:[%s4452_s8 + $0x100] sm:$0xff]  ;;  %v1602_v46 = vld [vmem:[%s4452_s8 + $0x1d0] sm:$0xff] }
 0x2c9   : > { %v1606_v58 = vld [vmem:[%s4452_s8 + $0x1f0] sm:$0xff] }
 0x2ca   : > { %3831 = vtanh.f32 %v1257_v20  ;;  %v4786_v24 = vsel %vm1261_vm9, %v1257_v20, %v4732_v10  ;;  %v4832_v10 = vpack.c.bf16 %v1558_v9, %v1554_v43  ;;  %v1580_v20 = vld [vmem:[%s4452_s8 + $0x120] sm:$0xff]  ;;  %v4915_v43 = vpack.c.bf16 %v1590_v61, %v1586_v60  ;;  %v1284_v60 = vld [vmem:[%s1280_s23 + $0x18] sm:$0xff] }
 0x2cb   : > { %v4917_v9 = vpack.c.bf16 %v1597_v36, %v1593_v41  ;;  %v4952_v3 = vpack.c.bf16 %v1606_v58, %v1602_v46  ;;  %v1283_v41 = vld [vmem:[%s1280_s23 + $0x10] sm:$0xff] }
 0x2d4   : > { %v3832_v22 = vpop.eup %3831 }
 0x2d5   : > { %v1259_v23 = vmul.f32 %v3832_v22, %v3830_v28  ;;  %v1578_v28 = vld [vmem:[%s4452_s8 + $0x110] sm:$0xff]  ;;  %v4888_v22 = vpack.c.bf16 %v1580_v20, %v1576_v16  ;;  %v1281_v16 = vld [vmem:[%s1280_s23] sm:$0xff] }
 0x2d7   : > { %v4791_v29 = vsel %vm1261_vm9, %v1259_v23, %v4739_v21  ;;  %v1268_v32 = vsel %vm1261_vm9, %v1259_v23, 0.0  ;;  %v4840_v21 = vpack.c.bf16 %v1565_v17, %v1561_v30  ;;  %v1582_v23 = vld [vmem:[%s4452_s8 + $0x130] sm:$0xff]  ;;  %v1599_v30 = vld [vmem:[%s4452_s8 + $0x1b8] sm:$0xff]  ;;  %v1592_v17 = vld [vmem:[%s4452_s8 + $0x180] sm:$0xff] }
 0x2d8   : > { %1271 = vst [vmem:[%s1270_s20] sm:$0xff] %v1268_v32  ;;  %1414 = vmatmul.mubr.f32.vlgmr.msra.gmra.mrb[20].mxu0 %v4791_v29  ;;  %1485 = vmatmul.mubr.f32.vlgmr.msra.gmra.mrb[20].mxu1 %v4791_v29  ;;  %v1585_v32 = vld [vmem:[%s4452_s8 + $0x148] sm:$0xff]  ;;  %v4895_v34 = vpack.c.bf16 %v1582_v23, %v1578_v28  ;;  %v4923_v49 = vpack.c.bf16 %v1599_v30, %v1595_v7  ;;  %s1791_s20 = smul.u32 3, %s4107_s6 }
 0x2d9   : > { %1672 = vmatprep.mubr.f32.mxu0 %v4125_v0  ;;  %1743 = vmatprep.mubr.f32.mxu1 %v4125_v0  ;;  %v4897_v35 = vpack.c.bf16 %v1589_v33, %v1585_v32  ;;  %v4932_v14 = vpack.c.bf16 %v1596_v19, %v1592_v17  ;;  %v1282_v32 = vld [vmem:[%s1280_s23 + $0x8] sm:$0xff] }
 0x2da   : > { %3398 = vmatpush1.bf16.msra.mxu0 %v4807_v52  ;;  %3430 = vmatpush1.bf16.msra.mxu1 %v4812_v56  ;;  %s5063_s12 = sadd.s32 %s3097_s7, %s1791_s20 }
 0x2db   : > { %3400 = vmatprep.subr.bf16.mxu0 %v4820_v4  ;;  %3432 = vmatprep.subr.bf16.mxu1 %v4825_v37  ;;  %s3133_s26 = sshll.u32 %s5063_s12, 5  ;;  %s3103_s23 = sshll.u32 %s5063_s12, 3 }
 0x2dc   : > { %s1798_s27 = scalar_lea.vmem [#allocation2], %s3133_s26  ;;  %s2047_s2 = scalar_lea.vmem %s4736_s18, %s3103_s23 [#allocation13] }
 0x2de   : > { %3402 = vmatpush1.bf16.msra.mxu0 %v4827_v8  ;;  %3434 = vmatpush1.bf16.msra.mxu1 %v4832_v10 }
 0x2df   : > { %3404 = vmatprep.subr.bf16.mxu0 %v4840_v21  ;;  %3436 = vmatprep.subr.bf16.mxu1 %v4845_v55 }
 0x2e2   : > { %3406 = vmatpush1.bf16.msra.mxu0 %v4847_v62  ;;  %3438 = vmatpush1.bf16.msra.mxu1 %v4852_v5 }
 0x2e3   : > { %3408 = vmatprep.subr.bf16.mxu0 %v4860_v18  ;;  %3440 = vmatprep.subr.bf16.mxu1 %v4865_v31 }
 0x2e6   : > { %3410 = vmatpush1.bf16.msra.mxu0 %v4867_v39  ;;  %3442 = vmatpush1.bf16.msra.mxu1 %v4873_v57 }
 0x2e7   : > { %3412 = vmatprep.subr.bf16.mxu0 %v4880_v11  ;;  %3444 = vmatprep.subr.bf16.mxu1 %v4882_v15 }
 0x2ea   : > { %3414 = vmatpush1.bf16.msra.mxu0 %v4888_v22  ;;  %3446 = vmatpush1.bf16.msra.mxu1 %v4895_v34 }
 0x2eb   : > { %3416 = vmatprep.subr.bf16.mxu0 %v4897_v35  ;;  %3448 = vmatprep.subr.bf16.mxu1 %v4902_v53 }
 0x2ee   : > { %3418 = vmatpush1.bf16.msra.mxu0 %v4908_v2  ;;  %3450 = vmatpush1.bf16.msra.mxu1 %v4915_v43 }
 0x2ef   : > { %3420 = vmatprep.subr.bf16.mxu0 %v4917_v9  ;;  %3452 = vmatprep.subr.bf16.mxu1 %v4923_v49 }
 0x2f2   : > { %3422 = vmatpush1.bf16.msra.mxu0 %v4932_v14  ;;  %3454 = vmatpush1.bf16.msra.mxu1 %v4936_v25 }
 0x2f3   : > { %3424 = vmatprep.subr.bf16.mxu0 %v4938_v26  ;;  %3456 = vmatprep.subr.bf16.mxu1 %v4943_v42 }
 0x2f6   : > { %3426 = vmatpush1.bf16.msra.mxu0 %v4948_v59  ;;  %3458 = vmatpush1.bf16.msra.mxu1 %v4952_v3 }
 0x2f7   : > { %3460 = vmatprep.subr.bf16.mxu0 %v4800_v38  ;;  %3492 = vmatprep.subr.bf16.mxu1 %v4805_v48 }
 0x3ab   : > { %v1415_v20 = vpop.f32.mrb[20].mxu0  ;;  %v1486_v28 = vpop.f32.mrb[20].mxu1 }
 0x3ac   : > { %v1491_v23 = vadd.f32 %v1415_v20, %v1281_v16  ;;  %v1417_v33 = vpop.f32.mrb[21].mxu0  ;;  %v1488_v44 = vpop.f32.mrb[21].mxu1  ;;  %v1493_v7 = vadd.f32 %v1486_v28, %v1283_v41 }
 0x3ad   : > { %v1492_v45 = vadd.f32 %v1417_v33, %v1282_v32  ;;  %v1494_v61 = vadd.f32 %v1488_v44, %v1284_v60 }
 0x3ae   : > { %v3086_v47 = vmul.f32 -1.442695, %v1491_v23 }
 0x3af   : > { %v3087_v54 = vmul.f32 -1.442695, %v1492_v45  ;;  %v3088_v36 = vmul.f32 -1.442695, %v1494_v61 }
 0x3b0   : > { %3833 = vpow2.f32 %v3086_v47  ;;  %v1541_v47 = vld [vmem:[%s1539_s21 + $0x8] sm:$0xff] }
 0x3b1   : > { %3835 = vpow2.f32 %v3087_v54 }
 0x3b2   : > { %3837 = vpow2.f32 %v3088_v36 }
 0x3b3   : > { %3839 = vtanh.f32 %v1493_v7  ;;  %v1542_v7 = vld [vmem:[%s1539_s21 + $0x10] sm:$0xff] }
 0x3ba   : > { %v3834_v30 = vpop.eup %3833 }
 0x3bb   : > { %v3836_v17 = vpop.eup %3835  ;;  %v1498_v19 = vadd.f32 1.0, %v3834_v30 }
 0x3bc   : > { %v1504_v50 = vadd.f32 1.0, %v3836_v17  ;;  %v3838_v51 = vpop.eup %3837 }
 0x3bd   : > { %3841 = vrcp.f32 %v1498_v19  ;;  %v3840_v63 = vpop.eup %3839  ;;  %v1511_v40 = vadd.f32 1.0, %v3838_v51 }
 0x3be   : > { %3843 = vrcp.f32 %v1504_v50 }
 0x3bf   : > { %3845 = vrcp.f32 %v1511_v40 }
 0x3c7   : > { %v3842_v1 = vpop.eup %3841 }
 0x3c8   : > { %v3844_v13 = vpop.eup %3843  ;;  %v1515_v27 = vmul.f32 %v3842_v1, %v3840_v63 }
 0x3c9   : > { %v1514_v46 = vmul.f32 %v3844_v13, %v4786_v24  ;;  %v3846_v20 = vpop.eup %3845 }
 0x3cb   : > { %v1516_v58 = vadd.f32 %v1515_v27, %v1514_v46  ;;  %v1778_v27 = vstv %s5013_s19 }
 0x3cc   : > { %vm1779_vm11 = vcmp.lt.s32.totalorder %v1778_v27, %v4729_v6  ;;  %v2335_v27 = vld [vmem:[%s4452_s8 + $0x78] sm:$0xff] }
 0x3cd   : > { %3847 = vtanh.f32 %v1516_v58  ;;  %v4968_v16 = vsel %vm1520_vm10, %v1516_v58, %v4786_v24  ;;  %v1540_v24 = vld [vmem:[%s1539_s21] sm:$0xff] }
 0x3d7   : > { %v3848_v28 = vpop.eup %3847 }
 0x3d8   : > { %v1518_v23 = vmul.f32 %v3848_v28, %v3846_v20 }
 0x3da   : > { %v4973_v32 = vsel %vm1520_vm10, %v1518_v23, %v4791_v29  ;;  %v1527_v33 = vsel %vm1520_vm10, %v1518_v23, 0.0 }
 0x3db   : > { %1530 = vst [vmem:[%s1529_s9] sm:$0xff] %v1527_v33  ;;  %1673 = vmatmul.mubr.f32.vlgmr.msra.gmra.mrb[22].mxu0 %v4973_v32  ;;  %1744 = vmatmul.mubr.f32.vlgmr.msra.gmra.mrb[22].mxu1 %v4973_v32  ;;  %s3104_s9 = sshll.u32 %s4107_s6, 1 }
 0x3dc   : > { %3462 = vmatpush1.bf16.msra.mxu0 %v4807_v52  ;;  %3494 = vmatpush1.bf16.msra.mxu1 %v4812_v56 }
 0x3dd   : > { %3464 = vmatprep.subr.bf16.mxu0 %v4820_v4  ;;  %3496 = vmatprep.subr.bf16.mxu1 %v4825_v37 }
 0x3de   : > { %1931 = vmatprep.mubr.f32.mxu0 %v4125_v0  ;;  %2002 = vmatprep.mubr.f32.mxu1 %v4125_v0 }
 0x3e0   : > { %3466 = vmatpush1.bf16.msra.mxu0 %v4827_v8  ;;  %3498 = vmatpush1.bf16.msra.mxu1 %v4832_v10 }
 0x3e1   : > { %3468 = vmatprep.subr.bf16.mxu0 %v4840_v21  ;;  %3500 = vmatprep.subr.bf16.mxu1 %v4845_v55 }
 0x3e4   : > { %3470 = vmatpush1.bf16.msra.mxu0 %v4847_v62  ;;  %3502 = vmatpush1.bf16.msra.mxu1 %v4852_v5 }
 0x3e5   : > { %3472 = vmatprep.subr.bf16.mxu0 %v4860_v18  ;;  %3504 = vmatprep.subr.bf16.mxu1 %v4865_v31 }
 0x3e8   : > { %3474 = vmatpush1.bf16.msra.mxu0 %v4867_v39  ;;  %3506 = vmatpush1.bf16.msra.mxu1 %v4873_v57 }
 0x3e9   : > { %3476 = vmatprep.subr.bf16.mxu0 %v4880_v11  ;;  %3508 = vmatprep.subr.bf16.mxu1 %v4882_v15 }
 0x3ec   : > { %3478 = vmatpush1.bf16.msra.mxu0 %v4888_v22  ;;  %3510 = vmatpush1.bf16.msra.mxu1 %v4895_v34 }
 0x3ed   : > { %3480 = vmatprep.subr.bf16.mxu0 %v4897_v35  ;;  %3512 = vmatprep.subr.bf16.mxu1 %v4902_v53 }
 0x3f0   : > { %3482 = vmatpush1.bf16.msra.mxu0 %v4908_v2  ;;  %3514 = vmatpush1.bf16.msra.mxu1 %v4915_v43 }
 0x3f1   : > { %3484 = vmatprep.subr.bf16.mxu0 %v4917_v9  ;;  %3516 = vmatprep.subr.bf16.mxu1 %v4923_v49 }
 0x3f4   : > { %3486 = vmatpush1.bf16.msra.mxu0 %v4932_v14  ;;  %3518 = vmatpush1.bf16.msra.mxu1 %v4936_v25 }
 0x3f5   : > { %3488 = vmatprep.subr.bf16.mxu0 %v4938_v26  ;;  %3520 = vmatprep.subr.bf16.mxu1 %v4943_v42 }
 0x3f8   : > { %3490 = vmatpush1.bf16.msra.mxu0 %v4948_v59  ;;  %3522 = vmatpush1.bf16.msra.mxu1 %v4952_v3 }
 0x3f9   : > { %3524 = vmatprep.subr.bf16.mxu0 %v4800_v38  ;;  %3556 = vmatprep.subr.bf16.mxu1 %v4805_v48  ;;  %v1543_v38 = vld [vmem:[%s1539_s21 + $0x18] sm:$0xff] }
 0x4ae   : > { %v1674_v29 = vpop.f32.mrb[22].mxu0  ;;  %v1745_v44 = vpop.f32.mrb[22].mxu1 }
 0x4af   : > { %v1750_v45 = vadd.f32 %v1674_v29, %v1540_v24  ;;  %v1676_v54 = vpop.f32.mrb[23].mxu0  ;;  %v1747_v60 = vpop.f32.mrb[23].mxu1  ;;  %v1752_v17 = vadd.f32 %v1745_v44, %v1542_v7  ;;  %v2324_v7 = vld [vmem:[%s4452_s8 + $0x20] sm:$0xff] }
 0x4b0   : > { %v1751_v61 = vadd.f32 %v1676_v54, %v1541_v47  ;;  %v1753_v48 = vadd.f32 %v1747_v60, %v1543_v38  ;;  %v2321_v60 = vld [vmem:[%s4452_s8 + $0x8] sm:$0xff]  ;;  %v2327_v38 = vld [vmem:[%s4452_s8 + $0x38] sm:$0xff] }
 0x4b1   : > { %v3093_v41 = vmul.f32 -1.442695, %v1750_v45 }
 0x4b2   : > { %v3094_v36 = vmul.f32 -1.442695, %v1751_v61  ;;  %v3095_v30 = vmul.f32 -1.442695, %v1753_v48  ;;  %v2325_v61 = vld [vmem:[%s4452_s8 + $0x28] sm:$0xff]  ;;  %v2320_v48 = vld [vmem:[%s4452_s8] sm:$0xff] }
 0x4b3   : > { %3849 = vpow2.f32 %v3093_v41  ;;  %v2323_v41 = vld [vmem:[%s4452_s8 + $0x18] sm:$0xff] }
 0x4b4   : > { %3851 = vpow2.f32 %v3094_v36  ;;  %v5084_v36 = vpack.c.bf16 %v2325_v61, %v2321_v60  ;;  %v2365_v60 = vld [vmem:[%s4452_s8 + $0x168] sm:$0xff]  ;;  %v2363_v61 = vld [vmem:[%s4452_s8 + $0x158] sm:$0xff] }
 0x4b5   : > { %3853 = vpow2.f32 %v3095_v30  ;;  %v5089_v30 = vpack.c.bf16 %v2327_v38, %v2323_v41 }
 0x4b6   : > { %3855 = vtanh.f32 %v1752_v17  ;;  %v5091_v17 = vpack.c.bf16 %v2324_v7, %v2320_v48  ;;  %v2367_v48 = vld [vmem:[%s4452_s8 + $0x178] sm:$0xff]  ;;  %v2360_v7 = vld [vmem:[%s4452_s8 + $0x140] sm:$0xff] }
 0x4bd   : > { %v3850_v19 = vpop.eup %3849 }
 0x4be   : > { %v3852_v50 = vpop.eup %3851  ;;  %v1757_v51 = vadd.f32 1.0, %v3850_v19  ;;  %v2322_v19 = vld [vmem:[%s4452_s8 + $0x10] sm:$0xff] }
 0x4bf   : > { %v1763_v63 = vadd.f32 1.0, %v3852_v50  ;;  %v3854_v1 = vpop.eup %3853  ;;  %v2326_v50 = vld [vmem:[%s4452_s8 + $0x30] sm:$0xff] }
 0x4c0   : > { %3857 = vrcp.f32 %v1757_v51  ;;  %v3856_v12 = vpop.eup %3855  ;;  %v1770_v58 = vadd.f32 1.0, %v3854_v1  ;;  %v5096_v51 = vpack.c.bf16 %v2326_v50, %v2322_v19  ;;  %v2333_v1 = vld [vmem:[%s4452_s8 + $0x68] sm:$0xff]  ;;  %v2364_v19 = vld [vmem:[%s4452_s8 + $0x160] sm:$0xff]  ;;  %v5187_v50 = vpack.c.bf16 %v2367_v48, %v2363_v61 }
 0x4c1   : > { %3859 = vrcp.f32 %v1763_v63  ;;  %v2329_v63 = vld [vmem:[%s4452_s8 + $0x48] sm:$0xff] }
 0x4c2   : > { %3861 = vrcp.f32 %v1770_v58 }
 0x4ca   : > { %v3858_v13 = vpop.eup %3857 }
 0x4cb   : > { %v3860_v40 = vpop.eup %3859  ;;  %v1774_v46 = vmul.f32 %v3858_v13, %v3856_v12  ;;  %v2331_v12 = vld [vmem:[%s4452_s8 + $0x58] sm:$0xff]  ;;  %v5104_v13 = vpack.c.bf16 %v2333_v1, %v2329_v63  ;;  %v2362_v63 = vld [vmem:[%s4452_s8 + $0x150] sm:$0xff] }
 0x4cc   : > { %v1773_v20 = vmul.f32 %v3860_v40, %v4968_v16  ;;  %v3862_v33 = vpop.eup %3861  ;;  %v2328_v40 = vld [vmem:[%s4452_s8 + $0x40] sm:$0xff]  ;;  %v5109_v58 = vpack.c.bf16 %v2335_v27, %v2331_v12  ;;  %v2366_v1 = vld [vmem:[%s4452_s8 + $0x170] sm:$0xff]  ;;  %v2369_v12 = vld [vmem:[%s4452_s8 + $0x188] sm:$0xff] }
 0x4cd   : > { %v2373_v27 = vld [vmem:[%s4452_s8 + $0x1a8] sm:$0xff] }
 0x4ce   : > { %v1775_v28 = vadd.f32 %v1774_v46, %v1773_v20  ;;  %v2332_v46 = vld [vmem:[%s4452_s8 + $0x60] sm:$0xff] }
 0x4cf   : > { %v5111_v20 = vpack.c.bf16 %v2332_v46, %v2328_v40  ;;  %v2371_v40 = vld [vmem:[%s4452_s8 + $0x198] sm:$0xff] }
 0x4d0   : > { %3863 = vtanh.f32 %v1775_v28  ;;  %v5020_v23 = vsel %vm1779_vm11, %v1775_v28, %v4968_v16  ;;  %v2330_v28 = vld [vmem:[%s4452_s8 + $0x50] sm:$0xff]  ;;  %v2375_v46 = vld [vmem:[%s4452_s8 + $0x1b8] sm:$0xff] }
 0x4da   : > { %v3864_v24 = vpop.eup %3863 }
 0x4db   : > { %v1777_v29 = vmul.f32 %v3864_v24, %v3862_v33  ;;  %v2337_v24 = vld [vmem:[%s4452_s8 + $0x88] sm:$0xff] }
 0x4dd   : > { %v5025_v44 = vsel %vm1779_vm11, %v1777_v29, %v4973_v32  ;;  %v1786_v45 = vsel %vm1779_vm11, %v1777_v29, 0.0  ;;  %v2341_v29 = vld [vmem:[%s4452_s8 + $0xa8] sm:$0xff] }
 0x4de   : > { %1789 = vst [vmem:[%s1788_s24] sm:$0xff] %v1786_v45  ;;  %1932 = vmatmul.mubr.f32.vlgmr.msra.gmra.mrb[24].mxu0 %v5025_v44  ;;  %2003 = vmatmul.mubr.f32.vlgmr.msra.gmra.mrb[24].mxu1 %v5025_v44  ;;  %v5124_v45 = vpack.c.bf16 %v2341_v29, %v2337_v24  ;;  %v5202_v24 = vpack.c.bf16 %v2373_v27, %v2369_v12  ;;  %v2368_v29 = vld [vmem:[%s4452_s8 + $0x180] sm:$0xff]  ;;  %s5295_s24 = sadd.s32 %s4107_s6, %s2308_s10 }
 0x4df   : > { %3526 = vmatpush1.bf16.msra.mxu0 %v4807_v52  ;;  %3558 = vmatpush1.bf16.msra.mxu1 %v4812_v56  ;;  %v1799_v52 = vld [vmem:[%s1798_s27] sm:$0xff]  ;;  %s3135_s20 = sshll.u32 %s5295_s24, 5 }
 0x4e0   : > { %3528 = vmatprep.subr.bf16.mxu0 %v4820_v4  ;;  %3560 = vmatprep.subr.bf16.mxu1 %v4825_v37  ;;  %s2315_s7 = scalar_lea.vmem [#allocation2], %s3135_s20 }
 0x4e1   : > { %2190 = vmatprep.mubr.f32.mxu0 %v4125_v0  ;;  %2261 = vmatprep.mubr.f32.mxu1 %v4125_v0 }
 0x4e3   : > { %3530 = vmatpush1.bf16.msra.mxu0 %v4827_v8  ;;  %3562 = vmatpush1.bf16.msra.mxu1 %v4832_v10  ;;  %v1800_v8 = vld [vmem:[%s1798_s27 + $0x8] sm:$0xff] }
 0x4e4   : > { %3532 = vmatprep.subr.bf16.mxu0 %v4840_v21  ;;  %3564 = vmatprep.subr.bf16.mxu1 %v4845_v55 }
 0x4e7   : > { %3534 = vmatpush1.bf16.msra.mxu0 %v4847_v62  ;;  %3566 = vmatpush1.bf16.msra.mxu1 %v4852_v5 }
 0x4e8   : > { %3536 = vmatprep.subr.bf16.mxu0 %v4860_v18  ;;  %3568 = vmatprep.subr.bf16.mxu1 %v4865_v31  ;;  %v1802_v18 = vld [vmem:[%s1798_s27 + $0x18] sm:$0xff] }
 0x4eb   : > { %3538 = vmatpush1.bf16.msra.mxu0 %v4867_v39  ;;  %3570 = vmatpush1.bf16.msra.mxu1 %v4873_v57  ;;  %v1801_v39 = vld [vmem:[%s1798_s27 + $0x10] sm:$0xff]  ;;  %s3136_s27 = smul.u32 224, %s4776_s11 }
 0x4ec   : > { %3540 = vmatprep.subr.bf16.mxu0 %v4880_v11  ;;  %3572 = vmatprep.subr.bf16.mxu1 %v4882_v15 }
 0x4ed   : > { %s2572_s23 = scalar_lea.vmem [#allocation2], %s3136_s27 }
 0x4ef   : > { %3542 = vmatpush1.bf16.msra.mxu0 %v4888_v22  ;;  %3574 = vmatpush1.bf16.msra.mxu1 %v4895_v34 }
 0x4f0   : > { %3544 = vmatprep.subr.bf16.mxu0 %v4897_v35  ;;  %3576 = vmatprep.subr.bf16.mxu1 %v4902_v53 }
 0x4f3   : > { %3546 = vmatpush1.bf16.msra.mxu0 %v4908_v2  ;;  %3578 = vmatpush1.bf16.msra.mxu1 %v4915_v43 }
 0x4f4   : > { %3548 = vmatprep.subr.bf16.mxu0 %v4917_v9  ;;  %3580 = vmatprep.subr.bf16.mxu1 %v4923_v49  ;;  %v2037_v9 = vstv %s5063_s12  ;;  %s3116_s12 = sshll.u32 %s5295_s24, 3 }
 0x4f5   : > { %vm2038_vm12 = vcmp.lt.s32.totalorder %v2037_v9, %v4729_v6  ;;  %s2564_s26 = scalar_lea.vmem %s4736_s18, %s3116_s12 [#allocation13] }
 0x4f7   : > { %3550 = vmatpush1.bf16.msra.mxu0 %v4932_v14  ;;  %3582 = vmatpush1.bf16.msra.mxu1 %v4936_v25 }
 0x4f8   : > { %3552 = vmatprep.subr.bf16.mxu0 %v4938_v26  ;;  %3584 = vmatprep.subr.bf16.mxu1 %v4943_v42 }
 0x4fb   : > { %3554 = vmatpush1.bf16.msra.mxu0 %v4948_v59  ;;  %3586 = vmatpush1.bf16.msra.mxu1 %v4952_v3 }
 0x4fc   : > { %3588 = vmatprep.subr.bf16.mxu0 %v5084_v36  ;;  %3620 = vmatprep.subr.bf16.mxu1 %v5089_v30 }
 0x5b1   : > { %v1933_v56 = vpop.f32.mrb[24].mxu0  ;;  %v2004_v4 = vpop.f32.mrb[24].mxu1 }
 0x5b2   : > { %v2009_v37 = vadd.f32 %v1933_v56, %v1799_v52  ;;  %v1935_v10 = vpop.f32.mrb[25].mxu0  ;;  %v2006_v21 = vpop.f32.mrb[25].mxu1  ;;  %v2011_v11 = vadd.f32 %v2004_v4, %v1801_v39  ;;  %v2343_v52 = vld [vmem:[%s4452_s8 + $0xb8] sm:$0xff]  ;;  %v2336_v56 = vld [vmem:[%s4452_s8 + $0x80] sm:$0xff] }
 0x5b3   : > { %v2010_v55 = vadd.f32 %v1935_v10, %v1800_v8  ;;  %v2012_v31 = vadd.f32 %v2006_v21, %v1802_v18  ;;  %v2340_v4 = vld [vmem:[%s4452_s8 + $0xa0] sm:$0xff]  ;;  %v2338_v10 = vld [vmem:[%s4452_s8 + $0x90] sm:$0xff]  ;;  %v2347_v18 = vld [vmem:[%s4452_s8 + $0xd8] sm:$0xff] }
 0x5b4   : > { %v3100_v62 = vmul.f32 -1.442695, %v2009_v37  ;;  %v5131_v8 = vpack.c.bf16 %v2340_v4, %v2336_v56  ;;  %v2342_v21 = vld [vmem:[%s4452_s8 + $0xb0] sm:$0xff]  ;;  %v5208_v56 = vpack.c.bf16 %v2375_v46, %v2371_v40 }
 0x5b5   : > { %v3101_v5 = vmul.f32 -1.442695, %v2010_v55  ;;  %v3102_v57 = vmul.f32 -1.442695, %v2012_v31  ;;  %v2345_v55 = vld [vmem:[%s4452_s8 + $0xc8] sm:$0xff]  ;;  %v2351_v31 = vld [vmem:[%s4452_s8 + $0xf8] sm:$0xff] }
 0x5b6   : > { %3865 = vpow2.f32 %v3100_v62  ;;  %v5137_v62 = vpack.c.bf16 %v2342_v21, %v2338_v10  ;;  %v2374_v4 = vld [vmem:[%s4452_s8 + $0x1b0] sm:$0xff]  ;;  %v2377_v10 = vld [vmem:[%s4452_s8 + $0x1c8] sm:$0xff] }
 0x5b7   : > { %3867 = vpow2.f32 %v3101_v5  ;;  %v2349_v5 = vld [vmem:[%s4452_s8 + $0xe8] sm:$0xff] }
 0x5b8   : > { %3869 = vpow2.f32 %v3102_v57  ;;  %v5144_v39 = vpack.c.bf16 %v2349_v5, %v2345_v55  ;;  %v5146_v57 = vpack.c.bf16 %v2351_v31, %v2347_v18  ;;  %v2381_v21 = vld [vmem:[%s4452_s8 + $0x1e8] sm:$0xff]  ;;  %v2379_v55 = vld [vmem:[%s4452_s8 + $0x1d8] sm:$0xff] }
 0x5b9   : > { %3871 = vtanh.f32 %v2011_v11  ;;  %v2344_v11 = vld [vmem:[%s4452_s8 + $0xc0] sm:$0xff]  ;;  %v2383_v5 = vld [vmem:[%s4452_s8 + $0x1f8] sm:$0xff] }
 0x5c0   : > { %v3866_v15 = vpop.eup %3865 }
 0x5c1   : > { %v3868_v22 = vpop.eup %3867  ;;  %v2016_v34 = vadd.f32 1.0, %v3866_v15  ;;  %v2348_v15 = vld [vmem:[%s4452_s8 + $0xe0] sm:$0xff] }
 0x5c2   : > { %v2022_v35 = vadd.f32 1.0, %v3868_v22  ;;  %v3870_v53 = vpop.eup %3869  ;;  %v2346_v22 = vld [vmem:[%s4452_s8 + $0xd0] sm:$0xff] }
 0x5c3   : > { %3873 = vrcp.f32 %v2016_v34  ;;  %v3872_v2 = vpop.eup %3871  ;;  %v2029_v25 = vadd.f32 1.0, %v3870_v53  ;;  %v5152_v34 = vpack.c.bf16 %v2348_v15, %v2344_v11  ;;  %v2353_v53 = vld [vmem:[%s4452_s8 + $0x108] sm:$0xff]  ;;  %v5222_v11 = vpack.c.bf16 %v2381_v21, %v2377_v10  ;;  %v2376_v15 = vld [vmem:[%s4452_s8 + $0x1c0] sm:$0xff] }
 0x5c4   : > { %3875 = vrcp.f32 %v2022_v35  ;;  %v2350_v35 = vld [vmem:[%s4452_s8 + $0xf0] sm:$0xff] }
 0x5c5   : > { %3877 = vrcp.f32 %v2029_v25  ;;  %v2352_v25 = vld [vmem:[%s4452_s8 + $0x100] sm:$0xff] }
 0x5cd   : > { %v3874_v43 = vpop.eup %3873 }
 0x5ce   : > { %v3876_v49 = vpop.eup %3875  ;;  %v2033_v14 = vmul.f32 %v3874_v43, %v3872_v2  ;;  %v2357_v2 = vld [vmem:[%s4452_s8 + $0x128] sm:$0xff]  ;;  %v5159_v43 = vpack.c.bf16 %v2350_v35, %v2346_v22  ;;  %v2380_v22 = vld [vmem:[%s4452_s8 + $0x1e0] sm:$0xff]  ;;  %v5227_v35 = vpack.c.bf16 %v2383_v5, %v2379_v55 }
 0x5cf   : > { %v2032_v26 = vmul.f32 %v3876_v49, %v5020_v23  ;;  %v3878_v3 = vpop.eup %3877  ;;  %v5161_v9 = vpack.c.bf16 %v2357_v2, %v2353_v53  ;;  %v2355_v49 = vld [vmem:[%s4452_s8 + $0x118] sm:$0xff]  ;;  %v2378_v53 = vld [vmem:[%s4452_s8 + $0x1d0] sm:$0xff] }
 0x5d0   : > { %v2382_v2 = vld [vmem:[%s4452_s8 + $0x1f0] sm:$0xff] }
 0x5d1   : > { %v2034_v42 = vadd.f32 %v2033_v14, %v2032_v26  ;;  %v2359_v14 = vld [vmem:[%s4452_s8 + $0x138] sm:$0xff] }
 0x5d2   : > { %v5166_v26 = vpack.c.bf16 %v2359_v14, %v2355_v49  ;;  %v5232_v49 = vpack.c.bf16 %v2380_v22, %v2376_v15  ;;  %v5236_v14 = vpack.c.bf16 %v2382_v2, %v2378_v53 }
 0x5d3   : > { %3879 = vtanh.f32 %v2034_v42  ;;  %v5070_v59 = vsel %vm2038_vm12, %v2034_v42, %v5020_v23  ;;  %v2334_v23 = vld [vmem:[%s4452_s8 + $0x70] sm:$0xff]  ;;  %v2356_v42 = vld [vmem:[%s4452_s8 + $0x120] sm:$0xff] }
 0x5d4   : > { %v5116_v33 = vpack.c.bf16 %v2334_v23, %v2330_v28  ;;  %v5196_v28 = vpack.c.bf16 %v2364_v19, %v2360_v7  ;;  %v5200_v23 = vpack.c.bf16 %v2366_v1, %v2362_v63 }
 0x5dd   : > { %v3880_v16 = vpop.eup %3879 }
 0x5de   : > { %v2036_v32 = vmul.f32 %v3880_v16, %v3878_v3  ;;  %v2354_v3 = vld [vmem:[%s4452_s8 + $0x110] sm:$0xff] }
 0x5df   : > { %v2358_v16 = vld [vmem:[%s4452_s8 + $0x130] sm:$0xff] }
 0x5e0   : > { %v5075_v47 = vsel %vm2038_vm12, %v2036_v32, %v5025_v44  ;;  %v2045_v54 = vsel %vm2038_vm12, %v2036_v32, 0.0  ;;  %v2339_v44 = vld [vmem:[%s4452_s8 + $0x98] sm:$0xff]  ;;  %v5172_v32 = vpack.c.bf16 %v2356_v42, %v2352_v25  ;;  %v5179_v41 = vpack.c.bf16 %v2358_v16, %v2354_v3 }
 0x5e1   : > { %2048 = vst [vmem:[%s2047_s2] sm:$0xff] %v2045_v54  ;;  %2191 = vmatmul.mubr.f32.vlgmr.msra.gmra.mrb[26].mxu0 %v5075_v47  ;;  %2262 = vmatmul.mubr.f32.vlgmr.msra.gmra.mrb[26].mxu1 %v5075_v47  ;;  %v5129_v37 = vpack.c.bf16 %v2343_v52, %v2339_v44  ;;  %v2361_v54 = vld [vmem:[%s4452_s8 + $0x148] sm:$0xff]  ;;  %v2372_v44 = vld [vmem:[%s4452_s8 + $0x1a0] sm:$0xff]  ;;  %v2370_v52 = vld [vmem:[%s4452_s8 + $0x190] sm:$0xff]  ;;  %s2049_s8 = smul.u32 5, %s4776_s11 }
 0x5e2   : > { %2448 = vmatprep.mubr.f32.mxu0 %v4125_v0  ;;  %2519 = vmatprep.mubr.f32.mxu1 %v4125_v0  ;;  %v5181_v38 = vpack.c.bf16 %v2365_v60, %v2361_v54  ;;  %v5216_v18 = vpack.c.bf16 %v2372_v44, %v2368_v29  ;;  %v5220_v31 = vpack.c.bf16 %v2374_v4, %v2370_v52  ;;  %s2566_s2 = smul.u32 7, %s4776_s11 }
 0x5e3   : > { %3590 = vmatpush1.bf16.msra.mxu0 %v5091_v17  ;;  %3622 = vmatpush1.bf16.msra.mxu1 %v5096_v51  ;;  %s5245_s14 = sadd.s32 %s3104_s9, %s2049_s8  ;;  %s3122_s8 = smul.u32 56, %s4776_s11 }
 0x5e4   : > { %3592 = vmatprep.subr.bf16.mxu0 %v5104_v13  ;;  %3624 = vmatprep.subr.bf16.mxu1 %v5109_v58  ;;  %s3134_s13 = sshll.u32 %s5245_s14, 5  ;;  %v2296_v10 = vstv %s5245_s14  ;;  %s3110_s25 = sshll.u32 %s5245_s14, 3 }
 0x5e5   : > { %s2057_s19 = scalar_lea.vmem [#allocation2], %s3134_s13  ;;  %vm2297_vm13 = vcmp.lt.s32.totalorder %v2296_v10, %v4729_v6  ;;  %s2306_s21 = scalar_lea.vmem %s4736_s18, %s3110_s25 [#allocation13] }
 0x5e6   : > { %v2058_v25 = vld [vmem:[%s2057_s19] sm:$0xff]  ;;  %v2059_v54 = vld [vmem:[%s2057_s19 + $0x8] sm:$0xff]  ;;  %v2060_v63 = vld [vmem:[%s2057_s19 + $0x10] sm:$0xff]  ;;  %s2843_s9 = sshll.u32 %s4736_s18, 4  ;;  %s3124_s14 = sshll.u32 %s4107_s6, 7  ;;  %s5321_s9 = int_to_ptr.vmem [resolvable:$true] %s2843_s9 }
 0x5e7   : > { %3594 = vmatpush1.bf16.msra.mxu0 %v5111_v20  ;;  %3626 = vmatpush1.bf16.msra.mxu1 %v5116_v33  ;;  %s2821_s13 = scalar_lea.vmem %s4736_s18, %s3122_s8 [#allocation13]  ;;  %s2824_s11 = scalar_lea.sflag [#allocation9], %s4373_s22 }
 0x5e8   : > { %3596 = vmatprep.subr.bf16.mxu0 %v5124_v45  ;;  %3628 = vmatprep.subr.bf16.mxu1 %v5129_v37  ;;  %s4027_s6 = scalar_lea.vmem %s5321_s9, 1024  ;;  %s4126_s18 = smov [#allocation13]  }
 0x5e9   : > { %p4028_p12 = scmp.ne.s32.totalorder %s5321_s9, %s4027_s6  ;;  %s4031_s10 = sshll.u32 %s4126_s18, 4  ;;  %s4032_s10 = int_to_ptr.vmem [resolvable:$false] %s4031_s10 }
 0x5ea   : > { %p4034_p4 = scmp.lt.s32.totalorder %s5321_s9, %s4032_s10 }
 0x5eb   : > { %3598 = vmatpush1.bf16.msra.mxu0 %v5131_v8  ;;  %3630 = vmatpush1.bf16.msra.mxu1 %v5137_v62  ;;  %p4029_p1 = pnand %p4028_p12, %p5418_p10 }
 0x5ec   : > { %3600 = vmatprep.subr.bf16.mxu0 %v5144_v39  ;;  %3632 = vmatprep.subr.bf16.mxu1 %v5146_v57 }
 0x5ed   : > { %p4030_p2 = pneg %p4029_p1 }
 0x5ef   : > { %3602 = vmatpush1.bf16.msra.mxu0 %v5152_v34  ;;  %3634 = vmatpush1.bf16.msra.mxu1 %v5159_v43 }
 0x5f0   : > { %3604 = vmatprep.subr.bf16.mxu0 %v5161_v9  ;;  %3636 = vmatprep.subr.bf16.mxu1 %v5166_v26 }
 0x5f3   : > { %3606 = vmatpush1.bf16.msra.mxu0 %v5172_v32  ;;  %3638 = vmatpush1.bf16.msra.mxu1 %v5179_v41 }
 0x5f4   : > { %3608 = vmatprep.subr.bf16.mxu0 %v5181_v38  ;;  %3640 = vmatprep.subr.bf16.mxu1 %v5187_v50 }
 0x5f7   : > { %3610 = vmatpush1.bf16.msra.mxu0 %v5196_v28  ;;  %3642 = vmatpush1.bf16.msra.mxu1 %v5200_v23 }
 0x5f8   : > { %3612 = vmatprep.subr.bf16.mxu0 %v5202_v24  ;;  %3644 = vmatprep.subr.bf16.mxu1 %v5208_v56 }
 0x5fb   : > { %3614 = vmatpush1.bf16.msra.mxu0 %v5216_v18  ;;  %3646 = vmatpush1.bf16.msra.mxu1 %v5220_v31 }
 0x5fc   : > { %3616 = vmatprep.subr.bf16.mxu0 %v5222_v11  ;;  %3648 = vmatprep.subr.bf16.mxu1 %v5227_v35 }
 0x5ff   : > { %3618 = vmatpush1.bf16.msra.mxu0 %v5232_v49  ;;  %3650 = vmatpush1.bf16.msra.mxu1 %v5236_v14 }
 0x600   : > { %3652 = vmatprep.subr.bf16.mxu0 %v5084_v36  ;;  %3684 = vmatprep.subr.bf16.mxu1 %v5089_v30  ;;  %v2061_v36 = vld [vmem:[%s2057_s19 + $0x18] sm:$0xff] }
 0x6b4   : > { %v2192_v42 = vpop.f32.mrb[26].mxu0  ;;  %v2263_v3 = vpop.f32.mrb[26].mxu1 }
 0x6b5   : > { %v2268_v16 = vadd.f32 %v2192_v42, %v2058_v25  ;;  %v2194_v60 = vpop.f32.mrb[27].mxu0  ;;  %v2265_v61 = vpop.f32.mrb[27].mxu1  ;;  %v2270_v12 = vadd.f32 %v2263_v3, %v2060_v63 }
 0x6b6   : > { %v2269_v48 = vadd.f32 %v2194_v60, %v2059_v54  ;;  %v2271_v30 = vadd.f32 %v2265_v61, %v2061_v36  ;;  %v2573_v61 = vld [vmem:[%s2572_s23] sm:$0xff]  ;;  %v2574_v36 = vld [vmem:[%s2572_s23 + $0x8] sm:$0xff] }
 0x6b7   : > { %v3107_v7 = vmul.f32 -1.442695, %v2268_v16 }
 0x6b8   : > { %v3108_v19 = vmul.f32 -1.442695, %v2269_v48  ;;  %v3109_v1 = vmul.f32 -1.442695, %v2271_v30 }
 0x6b9   : > { %3881 = vpow2.f32 %v3107_v7 }
 0x6ba   : > { %3883 = vpow2.f32 %v3108_v19 }
 0x6bb   : > { %3885 = vpow2.f32 %v3109_v1 }
 0x6bc   : > { %3887 = vtanh.f32 %v2270_v12 }
 0x6c3   : > { %v3882_v27 = vpop.eup %3881 }
 0x6c4   : > { %v3884_v40 = vpop.eup %3883  ;;  %v2275_v46 = vadd.f32 1.0, %v3882_v27 }
 0x6c5   : > { %v2281_v29 = vadd.f32 1.0, %v3884_v40  ;;  %v3886_v44 = vpop.eup %3885  ;;  %v2576_v40 = vld [vmem:[%s2572_s23 + $0x18] sm:$0xff] }
 0x6c6   : > { %3889 = vrcp.f32 %v2275_v46  ;;  %v3888_v52 = vpop.eup %3887  ;;  %v2288_v5 = vadd.f32 1.0, %v3886_v44 }
 0x6c7   : > { %3891 = vrcp.f32 %v2281_v29  ;;  %v2575_v29 = vld [vmem:[%s2572_s23 + $0x10] sm:$0xff] }
 0x6c8   : > { %3893 = vrcp.f32 %v2288_v5 }
 0x6d0   : > { %v3890_v4 = vpop.eup %3889 }
 0x6d1   : > { %v3892_v21 = vpop.eup %3891  ;;  %v2292_v55 = vmul.f32 %v3890_v4, %v3888_v52 }
 0x6d2   : > { %v2291_v15 = vmul.f32 %v3892_v21, %v5070_v59  ;;  %v3894_v2 = vpop.eup %3893 }
 0x6d4   : > { %v2293_v22 = vadd.f32 %v2292_v55, %v2291_v15 }
 0x6d6   : > { %3895 = vtanh.f32 %v2293_v22  ;;  %v5252_v53 = vsel %vm2297_vm13, %v2293_v22, %v5070_v59 }
 0x6e0   : > { %v3896_v25 = vpop.eup %3895 }
 0x6e1   : > { %v2295_v42 = vmul.f32 %v3896_v25, %v3894_v2 }
 0x6e3   : > { %v5257_v3 = vsel %vm2297_vm13, %v2295_v42, %v5075_v47  ;;  %v2304_v16 = vsel %vm2297_vm13, %v2295_v42, 0.0 }
 0x6e4   : > { %2307 = vst [vmem:[%s2306_s21] sm:$0xff] %v2304_v16  ;;  %2449 = vmatmul.mubr.f32.vlgmr.msra.gmra.mrb[28].mxu0 %v5257_v3  ;;  %2520 = vmatmul.mubr.f32.vlgmr.msra.gmra.mrb[28].mxu1 %v5257_v3  ;;  %v2811_v16 = vstv %s2566_s2  ;;  %s5327_s21 = scalar_lea.hbm %s5381_s5, %s3124_s14 }
 0x6e5   : > { %3654 = vmatpush1.bf16.msra.mxu0 %v5091_v17  ;;  %3686 = vmatpush1.bf16.msra.mxu1 %v5096_v51  ;;  %v2317_v51 = vld [vmem:[%s2315_s7 + $0x8] sm:$0xff]  ;;  %vm2812_vm15 = vcmp.lt.s32.totalorder %v2811_v16, %v4729_v6 }
 0x6e6   : > { %3656 = vmatprep.subr.bf16.mxu0 %v5104_v13  ;;  %3688 = vmatprep.subr.bf16.mxu1 %v5109_v58 }
 0x6e7   : > { %2705 = vmatprep.mubr.f32.mxu0 %v4125_v0  ;;  %2776 = vmatprep.mubr.f32.mxu1 %v4125_v0  ;;  %v2316_v0 = vld [vmem:[%s2315_s7] sm:$0xff] }
 0x6e9   : > { %3658 = vmatpush1.bf16.msra.mxu0 %v5111_v20  ;;  %3690 = vmatpush1.bf16.msra.mxu1 %v5116_v33 }
 0x6ea   : > { %3660 = vmatprep.subr.bf16.mxu0 %v5124_v45  ;;  %3692 = vmatprep.subr.bf16.mxu1 %v5129_v37  ;;  %v2319_v37 = vld [vmem:[%s2315_s7 + $0x18] sm:$0xff] }
 0x6ed   : > { %3662 = vmatpush1.bf16.msra.mxu0 %v5131_v8  ;;  %3694 = vmatpush1.bf16.msra.mxu1 %v5137_v62  ;;  %v2318_v62 = vld [vmem:[%s2315_s7 + $0x10] sm:$0xff] }
 0x6ee   : > { %3664 = vmatprep.subr.bf16.mxu0 %v5144_v39  ;;  %3696 = vmatprep.subr.bf16.mxu1 %v5146_v57 }
 0x6f1   : > { %3666 = vmatpush1.bf16.msra.mxu0 %v5152_v34  ;;  %3698 = vmatpush1.bf16.msra.mxu1 %v5159_v43 }
 0x6f2   : > { %3668 = vmatprep.subr.bf16.mxu0 %v5161_v9  ;;  %3700 = vmatprep.subr.bf16.mxu1 %v5166_v26 }
 0x6f5   : > { %3670 = vmatpush1.bf16.msra.mxu0 %v5172_v32  ;;  %3702 = vmatpush1.bf16.msra.mxu1 %v5179_v41 }
 0x6f6   : > { %3672 = vmatprep.subr.bf16.mxu0 %v5181_v38  ;;  %3704 = vmatprep.subr.bf16.mxu1 %v5187_v50  ;;  %v2554_v50 = vstv %s5295_s24  ;;  %s4033_s24 = scalar_lea.vmem %s4032_s10, 2048 }
 0x6f7   : > { %vm5301_vm14 = vcmp.lt.s32.totalorder %v2554_v50, %v4729_v6  ;;  %p4035_p7 = scmp.lt.s32.totalorder %s4033_s24, %s4027_s6 }
 0x6f9   : > { %3674 = vmatpush1.bf16.msra.mxu0 %v5196_v28  ;;  %3706 = vmatpush1.bf16.msra.mxu1 %v5200_v23  ;;  %p4036_p11 = por %p4035_p7, %p4034_p4 }
 0x6fa   : > { %3676 = vmatprep.subr.bf16.mxu0 %v5202_v24  ;;  %3708 = vmatprep.subr.bf16.mxu1 %v5208_v56 }
 0x6fb   : > { %p4037_p3 = pnand %p4036_p11, %p4030_p2 }
 0x6fd   : > { %3678 = vmatpush1.bf16.msra.mxu0 %v5216_v18  ;;  %3710 = vmatpush1.bf16.msra.mxu1 %v5220_v31 }
 0x6fe   : > { %3680 = vmatprep.subr.bf16.mxu0 %v5222_v11  ;;  %3712 = vmatprep.subr.bf16.mxu1 %v5227_v35 }
 0x701   : > { %3682 = vmatpush1.bf16.msra.mxu0 %v5232_v49  ;;  %3714 = vmatpush1.bf16.msra.mxu1 %v5236_v14 }
 0x7b7   : > { %v2450_v59 = vpop.f32.mrb[28].mxu0  ;;  %v2521_v47 = vpop.f32.mrb[28].mxu1 }
 0x7b8   : > { %v2526_v17 = vadd.f32 %v2450_v59, %v2316_v0  ;;  %v2452_v13 = vpop.f32.mrb[29].mxu0  ;;  %v2523_v58 = vpop.f32.mrb[29].mxu1  ;;  %v2528_v57 = vadd.f32 %v2521_v47, %v2318_v62 }
 0x7b9   : > { %v2527_v20 = vadd.f32 %v2452_v13, %v2317_v51  ;;  %v2529_v8 = vadd.f32 %v2523_v58, %v2319_v37 }
 0x7ba   : > { %v3113_v33 = vmul.f32 -1.442695, %v2526_v17 }
 0x7bb   : > { %v3114_v45 = vmul.f32 -1.442695, %v2527_v20  ;;  %v3115_v39 = vmul.f32 -1.442695, %v2529_v8 }
 0x7bc   : > { %3897 = vpow2.f32 %v3113_v33 }
 0x7bd   : > { %3899 = vpow2.f32 %v3114_v45 }
 0x7be   : > { %3901 = vpow2.f32 %v3115_v39 }
 0x7bf   : > { %3903 = vtanh.f32 %v2528_v57 }
 0x7c6   : > { %v3898_v34 = vpop.eup %3897 }
 0x7c7   : > { %v3900_v43 = vpop.eup %3899  ;;  %v2533_v9 = vadd.f32 1.0, %v3898_v34 }
 0x7c8   : > { %v2539_v26 = vadd.f32 1.0, %v3900_v43  ;;  %v3902_v32 = vpop.eup %3901 }
 0x7c9   : > { %3905 = vrcp.f32 %v2533_v9  ;;  %v3904_v41 = vpop.eup %3903  ;;  %v2546_v24 = vadd.f32 1.0, %v3902_v32 }
 0x7ca   : > { %3907 = vrcp.f32 %v2539_v26 }
 0x7cb   : > { %3909 = vrcp.f32 %v2546_v24 }
 0x7d3   : > { %v3906_v38 = vpop.eup %3905 }
 0x7d4   : > { %v3908_v28 = vpop.eup %3907  ;;  %v2550_v23 = vmul.f32 %v3906_v38, %v3904_v41 }
 0x7d5   : > { %v2549_v56 = vmul.f32 %v3908_v28, %v5252_v53  ;;  %v3910_v35 = vpop.eup %3909 }
 0x7d7   : > { %v2551_v31 = vadd.f32 %v2550_v23, %v2549_v56 }
 0x7d9   : > { %3911 = vtanh.f32 %v2551_v31  ;;  %v2560_v11 = vsel %vm5301_vm14, %v2551_v31, %v5252_v53 }
 0x7e3   : > { %v3912_v49 = vpop.eup %3911 }
 0x7e4   : > { %v2553_v14 = vmul.f32 %v3912_v49, %v3910_v35 }
 0x7e6   : > { %v2558_v54 = vsel %vm5301_vm14, %v2553_v14, %v5257_v3  ;;  %v2562_v60 = vsel %vm5301_vm14, %v2553_v14, 0.0 }
 0x7e7   : > { %2565 = vst [vmem:[%s2564_s26] sm:$0xff] %v2562_v60  ;;  %2706 = vmatmul.mubr.f32.vlgmr.msra.gmra.mrb[30].mxu0 %v2558_v54  ;;  %2777 = vmatmul.mubr.f32.vlgmr.msra.gmra.mrb[30].mxu1 %v2558_v54 }
 0x8ba   : > { %v2707_v48 = vpop.f32.mrb[30].mxu0  ;;  %v2778_v7 = vpop.f32.mrb[30].mxu1 }
 0x8bb   : > { %v2783_v19 = vadd.f32 %v2707_v48, %v2573_v61  ;;  %v2709_v30 = vpop.f32.mrb[31].mxu0  ;;  %v2780_v63 = vpop.f32.mrb[31].mxu1  ;;  %v2785_v52 = vadd.f32 %v2778_v7, %v2575_v29 }
 0x8bc   : > { %v2784_v1 = vadd.f32 %v2709_v30, %v2574_v36  ;;  %v2786_v46 = vadd.f32 %v2780_v63, %v2576_v40 }
 0x8bd   : > { %v3119_v12 = vmul.f32 -1.442695, %v2783_v19 }
 0x8be   : > { %v3120_v27 = vmul.f32 -1.442695, %v2784_v1  ;;  %v3121_v44 = vmul.f32 -1.442695, %v2786_v46 }
 0x8bf   : > { %3913 = vpow2.f32 %v3119_v12 }
 0x8c0   : > { %3915 = vpow2.f32 %v3120_v27 }
 0x8c1   : > { %3917 = vpow2.f32 %v3121_v44 }
 0x8c2   : > { %3919 = vtanh.f32 %v2785_v52 }
 0x8c9   : > { %v3914_v4 = vpop.eup %3913 }
 0x8ca   : > { %v3916_v10 = vpop.eup %3915  ;;  %v2790_v21 = vadd.f32 1.0, %v3914_v4 }
 0x8cb   : > { %v2796_v55 = vadd.f32 1.0, %v3916_v10  ;;  %v3918_v5 = vpop.eup %3917 }
 0x8cc   : > { %3921 = vrcp.f32 %v2790_v21  ;;  %v3920_v15 = vpop.eup %3919  ;;  %v2803_v25 = vadd.f32 1.0, %v3918_v5 }
 0x8cd   : > { %3923 = vrcp.f32 %v2796_v55 }
 0x8ce   : > { %3925 = vrcp.f32 %v2803_v25 }
 0x8d6   : > { %v3922_v22 = vpop.eup %3921 }
 0x8d7   : > { %v3924_v53 = vpop.eup %3923  ;;  %v2807_v2 = vmul.f32 %v3922_v22, %v3920_v15 }
 0x8d8   : > { %v2806_v42 = vmul.f32 %v3924_v53, %v2560_v11  ;;  %v3926_v0 = vpop.eup %3925 }
 0x8da   : > { %v2808_v3 = vadd.f32 %v2807_v2, %v2806_v42 }
 0x8dc   : > { %3927 = vtanh.f32 %v2808_v3 }
 0x8e6   : > { %v3928_v59 = vpop.eup %3927 }
 0x8e7   : > { %v2810_v47 = vmul.f32 %v3928_v59, %v3926_v0 }
 0x8e9   : > { %v2819_v17 = vsel %vm2812_vm15, %v2810_v47, 0.0 }
 0x8ea   : > { %2822 = vst [vmem:[%s2821_s13] sm:$0xff] %v2819_v17 }
 0x8eb   : > { %4040 = shalt.err (!%p4037_p3)
}
 0x8ec   : > { %s4041_s20 = scalar_lea.hbm %s5327_s21, 1024  ;;  %s4045_s26 = scalar_lea.hbm %s5381_s5, 2048 }
 0x8ed   : > { %p4042_p0 = scmp.ne.s32.totalorder %s5327_s21, %s4041_s20  ;;  %p4046_p8 = scmp.lt.u32.totalorder %s5327_s21, %s5381_s5 }
 0x8ee   : > { %p4047_p9 = scmp.lt.u32.totalorder %s4045_s26, %s4041_s20  ;;  %p4049_p12 = scmp.lt.u32.totalorder %s4041_s20, %s5327_s21 }
 0x8ef   : > { %p4043_p6 = pnand %p4042_p0, %p5418_p10 }
 0x8f0   : > { %p4048_p5 = por %p4047_p9, %p4046_p8 }
 0x8f1   : > { %p4044_p13 = pneg %p4043_p6 }
 0x8f2   : > { %p4050_p1 = por %p4049_p12, %p4048_p5 }
 0x8f4   : > { %p4051_p2 = pnand %p4050_p1, %p4044_p13 }
 0x8f6   : > { %4054 = shalt.err (!%p4051_p2)
}
 0x8f7   : > { %s4127_s2 = smov 128   ;;  %s4128_s8 = smov 256  }
 0x8f8   : > { %s4129_s14 = smov 8  }
 0x8f9   : > { %3723 = dma.vmem_to_hbm [thread:$0]  (%p5418_p10), %s5321_s9, 1024, %s5327_s21, %s2824_s11, %s4127_s2, %s4128_s8, %s4129_s14  }
 0x8fa PF: > { %s2858_s13 = sand.u32 1, %s4095_s28   ;;  %p5419_p4 = scmp.ne.s32.totalorder %s5400_s17, 0 }
 0x8fb   : > { %p5420_p7 = scmp.ge.s32.totalorder %s4115_s0, 2  ;;  %s2859_s19 = scalar_lea.sflag [#allocation9], %s2858_s13 }
 0x8fd   : > { %p3736_p11 = pnand %p5420_p7, %p5419_p4 }
 0x8ff   : > { %4090 = dma.done.wait (!%p3736_p11), %s2859_s19, 1024  }
 0x900   : > { %4092 = vsyncadd (!%p3736_p11), %s2859_s19, 4294966272  ;;  %s28_s0 = sadd.s32 1, %s4115_s0   ;;  %s5421_s6 = sld [smem:[#allocation18_spill]] }
 0x901   : > { %p25_p3 = scmp.ge.s32.totalorder %s28_s0, 4   ;;  %s5422_s7 = sld [smem:[#allocation19_spill]] }
 0x902   : > { %s5423_s28 = smov %s4099_s29  ;;  %s5424_s29 = smov %s4103_s30 }
 0x903   : > { %s5425_s30 = smov %s4236_s16  ;;  %27 = sbr.rel (!%p25_p3) target bundleno = 20 (0x14), region = 128 }
 0x90a   :  { %2864 = vsyncpa [#allocation8], 1 }
 0x90b   :  { %2866 = vsyncpa [#allocation8 + $0x1], 1 }
 0x90c   :  { %2867 = vsyncpa [#allocation11], 1 }
 0x90d   :  { %2869 = vsyncpa [#allocation11 + $0x1], 1 }
 0x90e   :  { %2870 = vsyncpa [#allocation9], 1 }
 0x90f   :  { %2872 = vsyncpa [#allocation9 + $0x1], 1 }

</bundles_post_ra>
